<compile_context>
chip_gen: v7x
topology: tpu7x:2x2x1
jax: 0.10.0
libtpu: 0.0.40
codegen_flags: <defaults>
</compile_context>

<pallas_src>
import math

import jax
import jax.numpy as jnp
from jax.experimental import pallas as pl
from jax.experimental.pallas import tpu as pltpu

# ----------------------------- configuration -------------------------------
B = 2            # batch
L = 256          # sequence length
CIN = 1          # input_channels
RES = 32         # res_channels
SKIP = 16        # skip_channels
OUTC = 1         # out_channels
NUM_LAYERS = 6   # num_res_layers
CYCLE = 3        # dilation_cycle
EIN = 16         # diffusion_step_embed_dim_in
EMID = 32        # diffusion_step_embed_dim_mid
EOUT = 32        # diffusion_step_embed_dim_out

DILATIONS = [2 ** (n % CYCLE) for n in range(NUM_LAYERS)]   # static: [1,2,4,1,2,4]
SQRT_HALF = math.sqrt(0.5)
SKIP_SCALE = math.sqrt(1.0 / NUM_LAYERS)


# ------------------------------ fused kernel --------------------------------
def _wavenet_kernel(audio_ref, ds_ref, wi_ref, bi_ref, w1_ref, b1_ref,
                    w2_ref, b2_ref, wt_ref, bt_ref, wd_ref, bd_ref,
                    wrs_ref, brs_ref, wf_ref, bf_ref, wz_ref, bz_ref,
                    out_ref, skip_ref):
    f32 = jnp.float32

    # ---- init 1x1 conv + ReLU, channels-on-sublanes layout (C, L) ----
    x = audio_ref[0]                                       # (CIN, L)
    if CIN == 1:
        h = wi_ref[...] * x + bi_ref[...]                  # (RES,1)*(1,L)+(RES,1)
    else:
        h = jnp.dot(wi_ref[...], x, preferred_element_type=f32) + bi_ref[...]
    h = jnp.maximum(h, 0.0)                                # (RES, L)

    # ---- diffusion-step embedding MLP (column vectors, per batch) ----
    e = jnp.dot(w1_ref[...], ds_ref[0], preferred_element_type=f32) + b1_ref[...]
    e = e * jax.nn.sigmoid(e)                              # swish, (EMID, 1)
    e = jnp.dot(w2_ref[...], e, preferred_element_type=f32) + b2_ref[...]
    e = e * jax.nn.sigmoid(e)                              # (EOUT, 1)
    # part_t for ALL layers in one matmul -> (NUM_LAYERS*RES, 1)
    part_all = jnp.dot(wt_ref[...], e, preferred_element_type=f32) + bt_ref[...]

    # ---- residual layers (unrolled, static dilations) ----
    l_idx = jax.lax.broadcasted_iota(jnp.int32, (1, L), 1)
    edge_masks = {}
    for d in sorted(set(DILATIONS)):
        edge_masks[d] = ((l_idx >= d).astype(f32),          # valid for x[l-d]
                         (l_idx < (L - d)).astype(f32))      # valid for x[l+d]

    skip_acc = jnp.zeros((SKIP, L), f32)
    for n in range(NUM_LAYERS):
        d = DILATIONS[n]
        m_left, m_right = edge_masks[d]

        pt = part_all[n * RES:(n + 1) * RES, :]             # (RES, 1), static slice
        hp = h + pt                                         # h += part_t (aliases x)

        # dilated kernel-size-3 conv taps: lane rolls + zero-pad edge masks
        left = pltpu.roll(hp, d, axis=1) * m_left           # x[l - d]
        right = pltpu.roll(hp, L - d, axis=1) * m_right     # x[l + d]
        hcat = jnp.concatenate([left, hp, right], axis=0)   # (3*RES, L)

        conv = jnp.dot(wd_ref[n], hcat,
                       preferred_element_type=f32) + bd_ref[n]      # (2*RES, L)
        gate = jnp.tanh(conv[:RES, :]) * jax.nn.sigmoid(conv[RES:, :])  # (RES, L)

        rs = jnp.dot(wrs_ref[n], gate,
                     preferred_element_type=f32) + brs_ref[n]        # (RES+SKIP, L)
        h = (hp + rs[:RES, :]) * SQRT_HALF
        skip_acc = skip_acc + rs[RES:, :]

    skip_acc = skip_acc * SKIP_SCALE
    skip_ref[0] = skip_acc

    # ---- final 1x1 conv + ReLU + ZeroConv1d ----
    y = jnp.dot(wf_ref[...], skip_acc, preferred_element_type=f32) + bf_ref[...]
    y = jnp.maximum(y, 0.0)                                  # (SKIP, L)
    out_ref[0] = jnp.dot(wz_ref[...], y,
                         preferred_element_type=f32) + bz_ref[...]   # (OUTC, L)


def wavenet_forward(audio, diffusion_steps, kp):
    """audio: (B, CIN, L) NCL; diffusion_steps: (B, EIN). Returns (out, skip)."""
    ds_col = diffusion_steps[:, :, None]                    # (B, EIN, 1)

    in_specs = [
        pl.BlockSpec((1, CIN, L), lambda b: (b, 0, 0)),                 # audio
        pl.BlockSpec((1, EIN, 1), lambda b: (b, 0, 0)),                 # ds
        pl.BlockSpec((RES, CIN), lambda b: (0, 0)),                     # init W^T
        pl.BlockSpec((RES, 1), lambda b: (0, 0)),                       # init b
        pl.BlockSpec((EMID, EIN), lambda b: (0, 0)),                    # fc1 W^T
        pl.BlockSpec((EMID, 1), lambda b: (0, 0)),                      # fc1 b
        pl.BlockSpec((EOUT, EMID), lambda b: (0, 0)),                   # fc2 W^T
        pl.BlockSpec((EOUT, 1), lambda b: (0, 0)),                      # fc2 b
        pl.BlockSpec((NUM_LAYERS * RES, EOUT), lambda b: (0, 0)),       # fc_t all
        pl.BlockSpec((NUM_LAYERS * RES, 1), lambda b: (0, 0)),          # fc_t bias
        pl.BlockSpec((NUM_LAYERS, 2 * RES, 3 * RES), lambda b: (0, 0, 0)),  # dil conv
        pl.BlockSpec((NUM_LAYERS, 2 * RES, 1), lambda b: (0, 0, 0)),    # dil bias
        pl.BlockSpec((NUM_LAYERS, RES + SKIP, RES), lambda b: (0, 0, 0)),   # res|skip
        pl.BlockSpec((NUM_LAYERS, RES + SKIP, 1), lambda b: (0, 0, 0)),     # bias
        pl.BlockSpec((SKIP, SKIP), lambda b: (0, 0)),                   # final W^T
        pl.BlockSpec((SKIP, 1), lambda b: (0, 0)),                      # final b
        pl.BlockSpec((OUTC, SKIP), lambda b: (0, 0)),                   # zero W^T
        pl.BlockSpec((OUTC, 1), lambda b: (0, 0)),                      # zero b
    ]
    out_specs = [
        pl.BlockSpec((1, OUTC, L), lambda b: (b, 0, 0)),
        pl.BlockSpec((1, SKIP, L), lambda b: (b, 0, 0)),
    ]
    out, skip = pl.pallas_call(
        _wavenet_kernel,
        out_shape=(jax.ShapeDtypeStruct((B, OUTC, L), jnp.float32),
                   jax.ShapeDtypeStruct((B, SKIP, L), jnp.float32)),
        grid=(B,),
        in_specs=in_specs,
        out_specs=out_specs,
        compiler_params=pltpu.CompilerParams(
            dimension_semantics=("parallel",)),
    )(audio, ds_col,
      kp["init_wT"], kp["init_b"], kp["fc1_wT"], kp["fc1_b"],
      kp["fc2_wT"], kp["fc2_b"], kp["wt_allT"], kp["bt_all"],
      kp["wd"], kp["bd"], kp["wrs"], kp["brs"],
      kp["fin_wT"], kp["fin_b"], kp["zero_wT"], kp["zero_b"])
    return out, skip


# ------------------------------ parameters ----------------------------------
def make_params(key):
    """Natural (row-layout) effective weights; weight_norm is folded in."""
    ks = jax.random.split(key, 16)
    s = 0.1
    nrm = lambda k, shp: jax.random.normal(k, shp, jnp.float32) * s
    return {
        "init_w": nrm(ks[0], (CIN, RES)),
        "init_b": nrm(ks[1], (1, RES)),
        "fc1_w": nrm(ks[2], (EIN, EMID)),
        "fc1_b": nrm(ks[3], (1, EMID)),
        "fc2_w": nrm(ks[4], (EMID, EOUT)),
        "fc2_b": nrm(ks[5], (1, EOUT)),
        "wt": nrm(ks[6], (NUM_LAYERS, EOUT, RES)),
        "bt": nrm(ks[7], (NUM_LAYERS, RES)),
        "wd": nrm(ks[8], (NUM_LAYERS, 3, RES, 2 * RES)),   # (layer, tap, in, out)
        "bd": nrm(ks[9], (NUM_LAYERS, 2 * RES)),
        "wr": nrm(ks[10], (NUM_LAYERS, RES, RES)),
        "br": nrm(ks[11], (NUM_LAYERS, RES)),
        "ws": nrm(ks[12], (NUM_LAYERS, RES, SKIP)),
        "bs": nrm(ks[13], (NUM_LAYERS, SKIP)),
        "fin_w": nrm(ks[14], (SKIP, SKIP)),
        "fin_b": nrm(ks[15], (1, SKIP)),
        "zero_w": jnp.zeros((SKIP, OUTC), jnp.float32),    # ZeroConv1d
        "zero_b": jnp.zeros((1, OUTC), jnp.float32),
    }


def pack_params(p):
    """Repack into the kernel's transposed / fused layout (host-side, once)."""
    wd = p["wd"]                                           # (NL, 3, RES, 2RES)
    wd_packed = jnp.concatenate(
        [jnp.transpose(wd[:, k], (0, 2, 1)) for k in range(3)], axis=2)  # (NL,2R,3R)
    wrs = jnp.concatenate(
        [jnp.transpose(p["wr"], (0, 2, 1)),
         jnp.transpose(p["ws"], (0, 2, 1))], axis=1)        # (NL, R+S, R)
    brs = jnp.concatenate([p["br"], p["bs"]], axis=1)[:, :, None]  # (NL, R+S, 1)
    wt_allT = jnp.transpose(p["wt"], (0, 2, 1)).reshape(NUM_LAYERS * RES, EOUT)
    bt_all = p["bt"].reshape(NUM_LAYERS * RES, 1)
    return {
        "init_wT": p["init_w"].T, "init_b": p["init_b"].T,
        "fc1_wT": p["fc1_w"].T, "fc1_b": p["fc1_b"].T,
        "fc2_wT": p["fc2_w"].T, "fc2_b": p["fc2_b"].T,
        "wt_allT": wt_allT, "bt_all": bt_all,
        "wd": wd_packed, "bd": p["bd"][:, :, None],
        "wrs": wrs, "brs": brs,
        "fin_wT": p["fin_w"].T, "fin_b": p["fin_b"].T,
        "zero_wT": p["zero_w"].T, "zero_b": p["zero_b"].T,
    }


# -------------------------- pure-JAX reference -------------------------------
def reference(audio, diffusion_steps, p):
    x = jnp.transpose(audio, (0, 2, 1))                      # (B, L, CIN)
    x = jnp.maximum(x @ p["init_w"] + p["init_b"], 0.0)      # (B, L, RES)
    e = diffusion_steps @ p["fc1_w"] + p["fc1_b"]
    e = e * jax.nn.sigmoid(e)
    e = e @ p["fc2_w"] + p["fc2_b"]
    e = e * jax.nn.sigmoid(e)
    h = x
    skip = jnp.zeros((B, L, SKIP), jnp.float32)
    for n in range(NUM_LAYERS):
        d = DILATIONS[n]
        part_t = e @ p["wt"][n] + p["bt"][n]
        hp = h + part_t[:, None, :]
        hp_pad = jnp.pad(hp, ((0, 0), (d, d), (0, 0)))
        acc = jnp.zeros((B, L, 2 * RES), jnp.float32) + p["bd"][n]
        for k in range(3):
            acc = acc + hp_pad[:, k * d:k * d + L, :] @ p["wd"][n, k]
        gate = jnp.tanh(acc[..., :RES]) * jax.nn.sigmoid(acc[..., RES:])
        res_o = gate @ p["wr"][n] + p["br"][n]
        skip_o = gate @ p["ws"][n] + p["bs"][n]
        h = (hp + res_o) * SQRT_HALF
        skip = skip + skip_o
    skip = skip * SKIP_SCALE
    y = jnp.maximum(skip @ p["fin_w"] + p["fin_b"], 0.0)
    y = y @ p["zero_w"] + p["zero_b"]
    return jnp.transpose(y, (0, 2, 1)), skip


# ----------------------------------- main ------------------------------------
if __name__ == "__main__":
    key = jax.random.PRNGKey(0)
    k_p, k_a, k_d = jax.random.split(key, 3)
    params = make_params(k_p)
    kparams = pack_params(params)

    audio = jax.random.normal(k_a, (B, CIN, L), jnp.float32)
    diffusion_steps = jax.random.normal(k_d, (B, EIN), jnp.float32)

    out, skip = wavenet_forward(audio, diffusion_steps, kparams)
    out = jax.block_until_ready(out)
    skip = jax.block_until_ready(skip)

    out_ref, skip_ref = reference(audio, diffusion_steps, params)

    assert out.shape == (B, OUTC, L), out.shape
    skip_blc = jnp.transpose(skip, (0, 2, 1))                # (B, L, SKIP)
    assert bool(jnp.allclose(skip_blc, skip_ref, rtol=5e-2, atol=5e-3)), (
        float(jnp.max(jnp.abs(skip_blc - skip_ref))))
    assert bool(jnp.allclose(out, out_ref, rtol=5e-2, atol=5e-3))

    print("KERNEL_OK")
</pallas_src>

<mosaic_0001>
module attributes {stable_mosaic.version = 11 : i64} {
  func.func @_wavenet_kernel(%arg0: i32, %arg1: memref<1x1x256xf32, #tpu.memory_space<vmem>>, %arg2: memref<1x16x1xf32, #tpu.memory_space<vmem>>, %arg3: memref<32x1xf32, #tpu.memory_space<vmem>>, %arg4: memref<32x1xf32, #tpu.memory_space<vmem>>, %arg5: memref<32x16xf32, #tpu.memory_space<vmem>>, %arg6: memref<32x1xf32, #tpu.memory_space<vmem>>, %arg7: memref<32x32xf32, #tpu.memory_space<vmem>>, %arg8: memref<32x1xf32, #tpu.memory_space<vmem>>, %arg9: memref<192x32xf32, #tpu.memory_space<vmem>>, %arg10: memref<192x1xf32, #tpu.memory_space<vmem>>, %arg11: memref<6x64x96xf32, #tpu.memory_space<vmem>>, %arg12: memref<6x64x1xf32, #tpu.memory_space<vmem>>, %arg13: memref<6x48x32xf32, #tpu.memory_space<vmem>>, %arg14: memref<6x48x1xf32, #tpu.memory_space<vmem>>, %arg15: memref<16x16xf32, #tpu.memory_space<vmem>>, %arg16: memref<16x1xf32, #tpu.memory_space<vmem>>, %arg17: memref<1x16xf32, #tpu.memory_space<vmem>>, %arg18: memref<1x1xf32, #tpu.memory_space<vmem>>, %arg19: memref<1x1x256xf32, #tpu.memory_space<vmem>>, %arg20: memref<1x16x256xf32, #tpu.memory_space<vmem>>) attributes {dimension_semantics = [#tpu.dimension_semantics<parallel>], iteration_bounds = array<i64: 2>, scalar_prefetch = 0 : i64, scratch_operands = 0 : i64, tpu.core_type = #tpu.core_type<tc>, window_params = [{transform_indices = @transform_0, window_bounds = array<i64: 1, 1, 256>}, {transform_indices = @transform_1, window_bounds = array<i64: 1, 16, 1>}, {pipeline_mode = #tpu.pipeline_mode<synchronous>, transform_indices = @transform_2, window_bounds = array<i64: 32, 1>}, {pipeline_mode = #tpu.pipeline_mode<synchronous>, transform_indices = @transform_3, window_bounds = array<i64: 32, 1>}, {pipeline_mode = #tpu.pipeline_mode<synchronous>, transform_indices = @transform_4, window_bounds = array<i64: 32, 16>}, {pipeline_mode = #tpu.pipeline_mode<synchronous>, transform_indices = @transform_5, window_bounds = array<i64: 32, 1>}, {pipeline_mode = #tpu.pipeline_mode<synchronous>, transform_indices = @transform_6, window_bounds = array<i64: 32, 32>}, {pipeline_mode = #tpu.pipeline_mode<synchronous>, transform_indices = @transform_7, window_bounds = array<i64: 32, 1>}, {pipeline_mode = #tpu.pipeline_mode<synchronous>, transform_indices = @transform_8, window_bounds = array<i64: 192, 32>}, {pipeline_mode = #tpu.pipeline_mode<synchronous>, transform_indices = @transform_9, window_bounds = array<i64: 192, 1>}, {pipeline_mode = #tpu.pipeline_mode<synchronous>, transform_indices = @transform_10, window_bounds = array<i64: 6, 64, 96>}, {pipeline_mode = #tpu.pipeline_mode<synchronous>, transform_indices = @transform_11, window_bounds = array<i64: 6, 64, 1>}, {pipeline_mode = #tpu.pipeline_mode<synchronous>, transform_indices = @transform_12, window_bounds = array<i64: 6, 48, 32>}, {pipeline_mode = #tpu.pipeline_mode<synchronous>, transform_indices = @transform_13, window_bounds = array<i64: 6, 48, 1>}, {pipeline_mode = #tpu.pipeline_mode<synchronous>, transform_indices = @transform_14, window_bounds = array<i64: 16, 16>}, {pipeline_mode = #tpu.pipeline_mode<synchronous>, transform_indices = @transform_15, window_bounds = array<i64: 16, 1>}, {pipeline_mode = #tpu.pipeline_mode<synchronous>, transform_indices = @transform_16, window_bounds = array<i64: 1, 16>}, {pipeline_mode = #tpu.pipeline_mode<synchronous>, transform_indices = @transform_17, window_bounds = array<i64: 1, 1>}, {transform_indices = @transform_18, window_bounds = array<i64: 1, 1, 256>}, {transform_indices = @transform_19, window_bounds = array<i64: 1, 16, 256>}]} {
    %c0 = arith.constant 0 : index
    %c0_0 = arith.constant 0 : index
    %c0_1 = arith.constant 0 : index
    %0 = vector.load %arg1[%c0, %c0_0, %c0_1] : memref<1x1x256xf32, #tpu.memory_space<vmem>>, vector<1x1x256xf32>
    %1 = vector.shape_cast %0 : vector<1x1x256xf32> to vector<1x256xf32>
    %c0_2 = arith.constant 0 : index
    %c0_3 = arith.constant 0 : index
    %2 = vector.load %arg3[%c0_2, %c0_3] : memref<32x1xf32, #tpu.memory_space<vmem>>, vector<32x1xf32>
    %3 = vector.broadcast %2 : vector<32x1xf32> to vector<32x256xf32>
    %4 = vector.broadcast %1 : vector<1x256xf32> to vector<32x256xf32>
    %5 = arith.mulf %3, %4 : vector<32x256xf32>
    %c0_4 = arith.constant 0 : index
    %c0_5 = arith.constant 0 : index
    %6 = vector.load %arg4[%c0_4, %c0_5] : memref<32x1xf32, #tpu.memory_space<vmem>>, vector<32x1xf32>
    %7 = vector.broadcast %6 : vector<32x1xf32> to vector<32x256xf32>
    %8 = arith.addf %5, %7 : vector<32x256xf32>
    %cst = arith.constant 0.000000e+00 : f32
    %9 = vector.broadcast %cst : f32 to vector<32x256xf32>
    %10 = arith.maximumf %8, %9 : vector<32x256xf32>
    %c0_6 = arith.constant 0 : index
    %c0_7 = arith.constant 0 : index
    %11 = vector.load %arg5[%c0_6, %c0_7] : memref<32x16xf32, #tpu.memory_space<vmem>>, vector<32x16xf32>
    %c0_8 = arith.constant 0 : index
    %c0_9 = arith.constant 0 : index
    %c0_10 = arith.constant 0 : index
    %12 = vector.load %arg2[%c0_8, %c0_9, %c0_10] : memref<1x16x1xf32, #tpu.memory_space<vmem>>, vector<1x16x1xf32>
    %13 = vector.shape_cast %12 : vector<1x16x1xf32> to vector<16x1xf32>
    %cst_11 = arith.constant dense<0.000000e+00> : vector<32x1xf32>
    %14 = tpu.matmul %11, %13, %cst_11 {dimension_numbers = #tpu.dot_dimension_numbers<[1], [0], [0], [1], [0, 0, 1, 1], [], []>} : vector<32x16xf32>, vector<16x1xf32>, vector<32x1xf32> -> vector<32x1xf32>
    %c0_12 = arith.constant 0 : index
    %c0_13 = arith.constant 0 : index
    %15 = vector.load %arg6[%c0_12, %c0_13] : memref<32x1xf32, #tpu.memory_space<vmem>>, vector<32x1xf32>
    %16 = arith.addf %14, %15 : vector<32x1xf32>
    %17 = arith.negf %16 : vector<32x1xf32>
    %18 = math.exp %17 : vector<32x1xf32>
    %cst_14 = arith.constant 1.000000e+00 : f32
    %19 = vector.broadcast %cst_14 : f32 to vector<32x1xf32>
    %20 = arith.addf %19, %18 : vector<32x1xf32>
    %21 = arith.divf %19, %20 : vector<32x1xf32>
    %22 = arith.mulf %16, %21 : vector<32x1xf32>
    %c0_15 = arith.constant 0 : index
    %c0_16 = arith.constant 0 : index
    %23 = vector.load %arg7[%c0_15, %c0_16] : memref<32x32xf32, #tpu.memory_space<vmem>>, vector<32x32xf32>
    %cst_17 = arith.constant dense<0.000000e+00> : vector<32x1xf32>
    %24 = tpu.matmul %23, %22, %cst_17 {dimension_numbers = #tpu.dot_dimension_numbers<[1], [0], [0], [1], [0, 0, 1, 1], [], []>} : vector<32x32xf32>, vector<32x1xf32>, vector<32x1xf32> -> vector<32x1xf32>
    %c0_18 = arith.constant 0 : index
    %c0_19 = arith.constant 0 : index
    %25 = vector.load %arg8[%c0_18, %c0_19] : memref<32x1xf32, #tpu.memory_space<vmem>>, vector<32x1xf32>
    %26 = arith.addf %24, %25 : vector<32x1xf32>
    %27 = arith.negf %26 : vector<32x1xf32>
    %28 = math.exp %27 : vector<32x1xf32>
    %cst_20 = arith.constant 1.000000e+00 : f32
    %29 = vector.broadcast %cst_20 : f32 to vector<32x1xf32>
    %30 = arith.addf %29, %28 : vector<32x1xf32>
    %31 = arith.divf %29, %30 : vector<32x1xf32>
    %32 = arith.mulf %26, %31 : vector<32x1xf32>
    %c0_21 = arith.constant 0 : index
    %c0_22 = arith.constant 0 : index
    %33 = vector.load %arg9[%c0_21, %c0_22] : memref<192x32xf32, #tpu.memory_space<vmem>>, vector<192x32xf32>
    %cst_23 = arith.constant dense<0.000000e+00> : vector<192x1xf32>
    %34 = tpu.matmul %33, %32, %cst_23 {dimension_numbers = #tpu.dot_dimension_numbers<[1], [0], [0], [1], [0, 0, 1, 1], [], []>} : vector<192x32xf32>, vector<32x1xf32>, vector<192x1xf32> -> vector<192x1xf32>
    %c0_24 = arith.constant 0 : index
    %c0_25 = arith.constant 0 : index
    %35 = vector.load %arg10[%c0_24, %c0_25] : memref<192x1xf32, #tpu.memory_space<vmem>>, vector<192x1xf32>
    %36 = arith.addf %34, %35 : vector<192x1xf32>
    %37 = tpu.iota {dimensions = array<i32: 1>} : vector<1x256xi32>
    %c1_i32 = arith.constant 1 : i32
    %38 = vector.broadcast %c1_i32 : i32 to vector<1x256xi32>
    %39 = arith.cmpi sge, %37, %38 : vector<1x256xi32>
    %40 = arith.extui %39 : vector<1x256xi1> to vector<1x256xi32>
    %41 = arith.sitofp %40 : vector<1x256xi32> to vector<1x256xf32>
    %c255_i32 = arith.constant 255 : i32
    %42 = vector.broadcast %c255_i32 : i32 to vector<1x256xi32>
    %43 = arith.cmpi slt, %37, %42 : vector<1x256xi32>
    %44 = arith.extui %43 : vector<1x256xi1> to vector<1x256xi32>
    %45 = arith.sitofp %44 : vector<1x256xi32> to vector<1x256xf32>
    %c2_i32 = arith.constant 2 : i32
    %46 = vector.broadcast %c2_i32 : i32 to vector<1x256xi32>
    %47 = arith.cmpi sge, %37, %46 : vector<1x256xi32>
    %48 = arith.extui %47 : vector<1x256xi1> to vector<1x256xi32>
    %49 = arith.sitofp %48 : vector<1x256xi32> to vector<1x256xf32>
    %c254_i32 = arith.constant 254 : i32
    %50 = vector.broadcast %c254_i32 : i32 to vector<1x256xi32>
    %51 = arith.cmpi slt, %37, %50 : vector<1x256xi32>
    %52 = arith.extui %51 : vector<1x256xi1> to vector<1x256xi32>
    %53 = arith.sitofp %52 : vector<1x256xi32> to vector<1x256xf32>
    %c4_i32 = arith.constant 4 : i32
    %54 = vector.broadcast %c4_i32 : i32 to vector<1x256xi32>
    %55 = arith.cmpi sge, %37, %54 : vector<1x256xi32>
    %56 = arith.extui %55 : vector<1x256xi1> to vector<1x256xi32>
    %57 = arith.sitofp %56 : vector<1x256xi32> to vector<1x256xf32>
    %c252_i32 = arith.constant 252 : i32
    %58 = vector.broadcast %c252_i32 : i32 to vector<1x256xi32>
    %59 = arith.cmpi slt, %37, %58 : vector<1x256xi32>
    %60 = arith.extui %59 : vector<1x256xi1> to vector<1x256xi32>
    %61 = arith.sitofp %60 : vector<1x256xi32> to vector<1x256xf32>
    %cst_26 = arith.constant 0.000000e+00 : f32
    %62 = vector.broadcast %cst_26 : f32 to vector<16x256xf32>
    %63 = vector.extract_strided_slice %36 {offsets = [0, 0], sizes = [32, 1], strides = [1, 1]} : vector<192x1xf32> to vector<32x1xf32>
    %64 = vector.broadcast %63 : vector<32x1xf32> to vector<32x256xf32>
    %65 = arith.addf %10, %64 : vector<32x256xf32>
    %c1_i32_27 = arith.constant 1 : i32
    %66 = tpu.dynamic_rotate %65 by %c1_i32_27 dim 1 : vector<32x256xf32>, i32 -> vector<32x256xf32>
    %67 = vector.broadcast %41 : vector<1x256xf32> to vector<32x256xf32>
    %68 = arith.mulf %66, %67 : vector<32x256xf32>
    %c255_i32_28 = arith.constant 255 : i32
    %69 = tpu.dynamic_rotate %65 by %c255_i32_28 dim 1 : vector<32x256xf32>, i32 -> vector<32x256xf32>
    %70 = vector.broadcast %45 : vector<1x256xf32> to vector<32x256xf32>
    %71 = arith.mulf %69, %70 : vector<32x256xf32>
    %72 = tpu.concatenate %68, %65, %71 in 0 : vector<32x256xf32>, vector<32x256xf32>, vector<32x256xf32> -> vector<96x256xf32>
    %c0_29 = arith.constant 0 : index
    %c0_30 = arith.constant 0 : index
    %c0_31 = arith.constant 0 : index
    %73 = vector.load %arg11[%c0_29, %c0_30, %c0_31] : memref<6x64x96xf32, #tpu.memory_space<vmem>>, vector<1x64x96xf32>
    %74 = vector.shape_cast %73 : vector<1x64x96xf32> to vector<64x96xf32>
    %cst_32 = arith.constant dense<0.000000e+00> : vector<64x256xf32>
    %75 = tpu.matmul %74, %72, %cst_32 {dimension_numbers = #tpu.dot_dimension_numbers<[1], [0], [0], [1], [0, 0, 1, 1], [], []>} : vector<64x96xf32>, vector<96x256xf32>, vector<64x256xf32> -> vector<64x256xf32>
    %c0_33 = arith.constant 0 : index
    %c0_34 = arith.constant 0 : index
    %c0_35 = arith.constant 0 : index
    %76 = vector.load %arg12[%c0_33, %c0_34, %c0_35] : memref<6x64x1xf32, #tpu.memory_space<vmem>>, vector<1x64x1xf32>
    %77 = vector.shape_cast %76 : vector<1x64x1xf32> to vector<64x1xf32>
    %78 = vector.broadcast %77 : vector<64x1xf32> to vector<64x256xf32>
    %79 = arith.addf %75, %78 : vector<64x256xf32>
    %80 = vector.extract_strided_slice %79 {offsets = [0, 0], sizes = [32, 256], strides = [1, 1]} : vector<64x256xf32> to vector<32x256xf32>
    %81 = math.tanh %80 : vector<32x256xf32>
    %82 = vector.extract_strided_slice %79 {offsets = [32, 0], sizes = [32, 256], strides = [1, 1]} : vector<64x256xf32> to vector<32x256xf32>
    %83 = arith.negf %82 : vector<32x256xf32>
    %84 = math.exp %83 : vector<32x256xf32>
    %cst_36 = arith.constant 1.000000e+00 : f32
    %85 = vector.broadcast %cst_36 : f32 to vector<32x256xf32>
    %86 = arith.addf %85, %84 : vector<32x256xf32>
    %87 = arith.divf %85, %86 : vector<32x256xf32>
    %88 = arith.mulf %81, %87 : vector<32x256xf32>
    %c0_37 = arith.constant 0 : index
    %c0_38 = arith.constant 0 : index
    %c0_39 = arith.constant 0 : index
    %89 = vector.load %arg13[%c0_37, %c0_38, %c0_39] : memref<6x48x32xf32, #tpu.memory_space<vmem>>, vector<1x48x32xf32>
    %90 = vector.shape_cast %89 : vector<1x48x32xf32> to vector<48x32xf32>
    %cst_40 = arith.constant dense<0.000000e+00> : vector<48x256xf32>
    %91 = tpu.matmul %90, %88, %cst_40 {dimension_numbers = #tpu.dot_dimension_numbers<[1], [0], [0], [1], [0, 0, 1, 1], [], []>} : vector<48x32xf32>, vector<32x256xf32>, vector<48x256xf32> -> vector<48x256xf32>
    %c0_41 = arith.constant 0 : index
    %c0_42 = arith.constant 0 : index
    %c0_43 = arith.constant 0 : index
    %92 = vector.load %arg14[%c0_41, %c0_42, %c0_43] : memref<6x48x1xf32, #tpu.memory_space<vmem>>, vector<1x48x1xf32>
    %93 = vector.shape_cast %92 : vector<1x48x1xf32> to vector<48x1xf32>
    %94 = vector.broadcast %93 : vector<48x1xf32> to vector<48x256xf32>
    %95 = arith.addf %91, %94 : vector<48x256xf32>
    %96 = vector.extract_strided_slice %95 {offsets = [0, 0], sizes = [32, 256], strides = [1, 1]} : vector<48x256xf32> to vector<32x256xf32>
    %97 = arith.addf %65, %96 : vector<32x256xf32>
    %cst_44 = arith.constant 0.707106769 : f32
    %98 = vector.broadcast %cst_44 : f32 to vector<32x256xf32>
    %99 = arith.mulf %97, %98 : vector<32x256xf32>
    %100 = vector.extract_strided_slice %95 {offsets = [32, 0], sizes = [16, 256], strides = [1, 1]} : vector<48x256xf32> to vector<16x256xf32>
    %101 = arith.addf %62, %100 : vector<16x256xf32>
    %102 = vector.extract_strided_slice %36 {offsets = [32, 0], sizes = [32, 1], strides = [1, 1]} : vector<192x1xf32> to vector<32x1xf32>
    %103 = vector.broadcast %102 : vector<32x1xf32> to vector<32x256xf32>
    %104 = arith.addf %99, %103 : vector<32x256xf32>
    %c2_i32_45 = arith.constant 2 : i32
    %105 = tpu.dynamic_rotate %104 by %c2_i32_45 dim 1 : vector<32x256xf32>, i32 -> vector<32x256xf32>
    %106 = vector.broadcast %49 : vector<1x256xf32> to vector<32x256xf32>
    %107 = arith.mulf %105, %106 : vector<32x256xf32>
    %c254_i32_46 = arith.constant 254 : i32
    %108 = tpu.dynamic_rotate %104 by %c254_i32_46 dim 1 : vector<32x256xf32>, i32 -> vector<32x256xf32>
    %109 = vector.broadcast %53 : vector<1x256xf32> to vector<32x256xf32>
    %110 = arith.mulf %108, %109 : vector<32x256xf32>
    %111 = tpu.concatenate %107, %104, %110 in 0 : vector<32x256xf32>, vector<32x256xf32>, vector<32x256xf32> -> vector<96x256xf32>
    %c1 = arith.constant 1 : index
    %c0_47 = arith.constant 0 : index
    %c0_48 = arith.constant 0 : index
    %112 = vector.load %arg11[%c1, %c0_47, %c0_48] : memref<6x64x96xf32, #tpu.memory_space<vmem>>, vector<1x64x96xf32>
    %113 = vector.shape_cast %112 : vector<1x64x96xf32> to vector<64x96xf32>
    %cst_49 = arith.constant dense<0.000000e+00> : vector<64x256xf32>
    %114 = tpu.matmul %113, %111, %cst_49 {dimension_numbers = #tpu.dot_dimension_numbers<[1], [0], [0], [1], [0, 0, 1, 1], [], []>} : vector<64x96xf32>, vector<96x256xf32>, vector<64x256xf32> -> vector<64x256xf32>
    %c1_50 = arith.constant 1 : index
    %c0_51 = arith.constant 0 : index
    %c0_52 = arith.constant 0 : index
    %115 = vector.load %arg12[%c1_50, %c0_51, %c0_52] : memref<6x64x1xf32, #tpu.memory_space<vmem>>, vector<1x64x1xf32>
    %116 = vector.shape_cast %115 : vector<1x64x1xf32> to vector<64x1xf32>
    %117 = vector.broadcast %116 : vector<64x1xf32> to vector<64x256xf32>
    %118 = arith.addf %114, %117 : vector<64x256xf32>
    %119 = vector.extract_strided_slice %118 {offsets = [0, 0], sizes = [32, 256], strides = [1, 1]} : vector<64x256xf32> to vector<32x256xf32>
    %120 = math.tanh %119 : vector<32x256xf32>
    %121 = vector.extract_strided_slice %118 {offsets = [32, 0], sizes = [32, 256], strides = [1, 1]} : vector<64x256xf32> to vector<32x256xf32>
    %122 = arith.negf %121 : vector<32x256xf32>
    %123 = math.exp %122 : vector<32x256xf32>
    %cst_53 = arith.constant 1.000000e+00 : f32
    %124 = vector.broadcast %cst_53 : f32 to vector<32x256xf32>
    %125 = arith.addf %124, %123 : vector<32x256xf32>
    %126 = arith.divf %124, %125 : vector<32x256xf32>
    %127 = arith.mulf %120, %126 : vector<32x256xf32>
    %c1_54 = arith.constant 1 : index
    %c0_55 = arith.constant 0 : index
    %c0_56 = arith.constant 0 : index
    %128 = vector.load %arg13[%c1_54, %c0_55, %c0_56] : memref<6x48x32xf32, #tpu.memory_space<vmem>>, vector<1x48x32xf32>
    %129 = vector.shape_cast %128 : vector<1x48x32xf32> to vector<48x32xf32>
    %cst_57 = arith.constant dense<0.000000e+00> : vector<48x256xf32>
    %130 = tpu.matmul %129, %127, %cst_57 {dimension_numbers = #tpu.dot_dimension_numbers<[1], [0], [0], [1], [0, 0, 1, 1], [], []>} : vector<48x32xf32>, vector<32x256xf32>, vector<48x256xf32> -> vector<48x256xf32>
    %c1_58 = arith.constant 1 : index
    %c0_59 = arith.constant 0 : index
    %c0_60 = arith.constant 0 : index
    %131 = vector.load %arg14[%c1_58, %c0_59, %c0_60] : memref<6x48x1xf32, #tpu.memory_space<vmem>>, vector<1x48x1xf32>
    %132 = vector.shape_cast %131 : vector<1x48x1xf32> to vector<48x1xf32>
    %133 = vector.broadcast %132 : vector<48x1xf32> to vector<48x256xf32>
    %134 = arith.addf %130, %133 : vector<48x256xf32>
    %135 = vector.extract_strided_slice %134 {offsets = [0, 0], sizes = [32, 256], strides = [1, 1]} : vector<48x256xf32> to vector<32x256xf32>
    %136 = arith.addf %104, %135 : vector<32x256xf32>
    %cst_61 = arith.constant 0.707106769 : f32
    %137 = vector.broadcast %cst_61 : f32 to vector<32x256xf32>
    %138 = arith.mulf %136, %137 : vector<32x256xf32>
    %139 = vector.extract_strided_slice %134 {offsets = [32, 0], sizes = [16, 256], strides = [1, 1]} : vector<48x256xf32> to vector<16x256xf32>
    %140 = arith.addf %101, %139 : vector<16x256xf32>
    %141 = vector.extract_strided_slice %36 {offsets = [64, 0], sizes = [32, 1], strides = [1, 1]} : vector<192x1xf32> to vector<32x1xf32>
    %142 = vector.broadcast %141 : vector<32x1xf32> to vector<32x256xf32>
    %143 = arith.addf %138, %142 : vector<32x256xf32>
    %c4_i32_62 = arith.constant 4 : i32
    %144 = tpu.dynamic_rotate %143 by %c4_i32_62 dim 1 : vector<32x256xf32>, i32 -> vector<32x256xf32>
    %145 = vector.broadcast %57 : vector<1x256xf32> to vector<32x256xf32>
    %146 = arith.mulf %144, %145 : vector<32x256xf32>
    %c252_i32_63 = arith.constant 252 : i32
    %147 = tpu.dynamic_rotate %143 by %c252_i32_63 dim 1 : vector<32x256xf32>, i32 -> vector<32x256xf32>
    %148 = vector.broadcast %61 : vector<1x256xf32> to vector<32x256xf32>
    %149 = arith.mulf %147, %148 : vector<32x256xf32>
    %150 = tpu.concatenate %146, %143, %149 in 0 : vector<32x256xf32>, vector<32x256xf32>, vector<32x256xf32> -> vector<96x256xf32>
    %c2 = arith.constant 2 : index
    %c0_64 = arith.constant 0 : index
    %c0_65 = arith.constant 0 : index
    %151 = vector.load %arg11[%c2, %c0_64, %c0_65] : memref<6x64x96xf32, #tpu.memory_space<vmem>>, vector<1x64x96xf32>
    %152 = vector.shape_cast %151 : vector<1x64x96xf32> to vector<64x96xf32>
    %cst_66 = arith.constant dense<0.000000e+00> : vector<64x256xf32>
    %153 = tpu.matmul %152, %150, %cst_66 {dimension_numbers = #tpu.dot_dimension_numbers<[1], [0], [0], [1], [0, 0, 1, 1], [], []>} : vector<64x96xf32>, vector<96x256xf32>, vector<64x256xf32> -> vector<64x256xf32>
    %c2_67 = arith.constant 2 : index
    %c0_68 = arith.constant 0 : index
    %c0_69 = arith.constant 0 : index
    %154 = vector.load %arg12[%c2_67, %c0_68, %c0_69] : memref<6x64x1xf32, #tpu.memory_space<vmem>>, vector<1x64x1xf32>
    %155 = vector.shape_cast %154 : vector<1x64x1xf32> to vector<64x1xf32>
    %156 = vector.broadcast %155 : vector<64x1xf32> to vector<64x256xf32>
    %157 = arith.addf %153, %156 : vector<64x256xf32>
    %158 = vector.extract_strided_slice %157 {offsets = [0, 0], sizes = [32, 256], strides = [1, 1]} : vector<64x256xf32> to vector<32x256xf32>
    %159 = math.tanh %158 : vector<32x256xf32>
    %160 = vector.extract_strided_slice %157 {offsets = [32, 0], sizes = [32, 256], strides = [1, 1]} : vector<64x256xf32> to vector<32x256xf32>
    %161 = arith.negf %160 : vector<32x256xf32>
    %162 = math.exp %161 : vector<32x256xf32>
    %cst_70 = arith.constant 1.000000e+00 : f32
    %163 = vector.broadcast %cst_70 : f32 to vector<32x256xf32>
    %164 = arith.addf %163, %162 : vector<32x256xf32>
    %165 = arith.divf %163, %164 : vector<32x256xf32>
    %166 = arith.mulf %159, %165 : vector<32x256xf32>
    %c2_71 = arith.constant 2 : index
    %c0_72 = arith.constant 0 : index
    %c0_73 = arith.constant 0 : index
    %167 = vector.load %arg13[%c2_71, %c0_72, %c0_73] : memref<6x48x32xf32, #tpu.memory_space<vmem>>, vector<1x48x32xf32>
    %168 = vector.shape_cast %167 : vector<1x48x32xf32> to vector<48x32xf32>
    %cst_74 = arith.constant dense<0.000000e+00> : vector<48x256xf32>
    %169 = tpu.matmul %168, %166, %cst_74 {dimension_numbers = #tpu.dot_dimension_numbers<[1], [0], [0], [1], [0, 0, 1, 1], [], []>} : vector<48x32xf32>, vector<32x256xf32>, vector<48x256xf32> -> vector<48x256xf32>
    %c2_75 = arith.constant 2 : index
    %c0_76 = arith.constant 0 : index
    %c0_77 = arith.constant 0 : index
    %170 = vector.load %arg14[%c2_75, %c0_76, %c0_77] : memref<6x48x1xf32, #tpu.memory_space<vmem>>, vector<1x48x1xf32>
    %171 = vector.shape_cast %170 : vector<1x48x1xf32> to vector<48x1xf32>
    %172 = vector.broadcast %171 : vector<48x1xf32> to vector<48x256xf32>
    %173 = arith.addf %169, %172 : vector<48x256xf32>
    %174 = vector.extract_strided_slice %173 {offsets = [0, 0], sizes = [32, 256], strides = [1, 1]} : vector<48x256xf32> to vector<32x256xf32>
    %175 = arith.addf %143, %174 : vector<32x256xf32>
    %cst_78 = arith.constant 0.707106769 : f32
    %176 = vector.broadcast %cst_78 : f32 to vector<32x256xf32>
    %177 = arith.mulf %175, %176 : vector<32x256xf32>
    %178 = vector.extract_strided_slice %173 {offsets = [32, 0], sizes = [16, 256], strides = [1, 1]} : vector<48x256xf32> to vector<16x256xf32>
    %179 = arith.addf %140, %178 : vector<16x256xf32>
    %180 = vector.extract_strided_slice %36 {offsets = [96, 0], sizes = [32, 1], strides = [1, 1]} : vector<192x1xf32> to vector<32x1xf32>
    %181 = vector.broadcast %180 : vector<32x1xf32> to vector<32x256xf32>
    %182 = arith.addf %177, %181 : vector<32x256xf32>
    %c1_i32_79 = arith.constant 1 : i32
    %183 = tpu.dynamic_rotate %182 by %c1_i32_79 dim 1 : vector<32x256xf32>, i32 -> vector<32x256xf32>
    %184 = vector.broadcast %41 : vector<1x256xf32> to vector<32x256xf32>
    %185 = arith.mulf %183, %184 : vector<32x256xf32>
    %c255_i32_80 = arith.constant 255 : i32
    %186 = tpu.dynamic_rotate %182 by %c255_i32_80 dim 1 : vector<32x256xf32>, i32 -> vector<32x256xf32>
    %187 = vector.broadcast %45 : vector<1x256xf32> to vector<32x256xf32>
    %188 = arith.mulf %186, %187 : vector<32x256xf32>
    %189 = tpu.concatenate %185, %182, %188 in 0 : vector<32x256xf32>, vector<32x256xf32>, vector<32x256xf32> -> vector<96x256xf32>
    %c3 = arith.constant 3 : index
    %c0_81 = arith.constant 0 : index
    %c0_82 = arith.constant 0 : index
    %190 = vector.load %arg11[%c3, %c0_81, %c0_82] : memref<6x64x96xf32, #tpu.memory_space<vmem>>, vector<1x64x96xf32>
    %191 = vector.shape_cast %190 : vector<1x64x96xf32> to vector<64x96xf32>
    %cst_83 = arith.constant dense<0.000000e+00> : vector<64x256xf32>
    %192 = tpu.matmul %191, %189, %cst_83 {dimension_numbers = #tpu.dot_dimension_numbers<[1], [0], [0], [1], [0, 0, 1, 1], [], []>} : vector<64x96xf32>, vector<96x256xf32>, vector<64x256xf32> -> vector<64x256xf32>
    %c3_84 = arith.constant 3 : index
    %c0_85 = arith.constant 0 : index
    %c0_86 = arith.constant 0 : index
    %193 = vector.load %arg12[%c3_84, %c0_85, %c0_86] : memref<6x64x1xf32, #tpu.memory_space<vmem>>, vector<1x64x1xf32>
    %194 = vector.shape_cast %193 : vector<1x64x1xf32> to vector<64x1xf32>
    %195 = vector.broadcast %194 : vector<64x1xf32> to vector<64x256xf32>
    %196 = arith.addf %192, %195 : vector<64x256xf32>
    %197 = vector.extract_strided_slice %196 {offsets = [0, 0], sizes = [32, 256], strides = [1, 1]} : vector<64x256xf32> to vector<32x256xf32>
    %198 = math.tanh %197 : vector<32x256xf32>
    %199 = vector.extract_strided_slice %196 {offsets = [32, 0], sizes = [32, 256], strides = [1, 1]} : vector<64x256xf32> to vector<32x256xf32>
    %200 = arith.negf %199 : vector<32x256xf32>
    %201 = math.exp %200 : vector<32x256xf32>
    %cst_87 = arith.constant 1.000000e+00 : f32
    %202 = vector.broadcast %cst_87 : f32 to vector<32x256xf32>
    %203 = arith.addf %202, %201 : vector<32x256xf32>
    %204 = arith.divf %202, %203 : vector<32x256xf32>
    %205 = arith.mulf %198, %204 : vector<32x256xf32>
    %c3_88 = arith.constant 3 : index
    %c0_89 = arith.constant 0 : index
    %c0_90 = arith.constant 0 : index
    %206 = vector.load %arg13[%c3_88, %c0_89, %c0_90] : memref<6x48x32xf32, #tpu.memory_space<vmem>>, vector<1x48x32xf32>
    %207 = vector.shape_cast %206 : vector<1x48x32xf32> to vector<48x32xf32>
    %cst_91 = arith.constant dense<0.000000e+00> : vector<48x256xf32>
    %208 = tpu.matmul %207, %205, %cst_91 {dimension_numbers = #tpu.dot_dimension_numbers<[1], [0], [0], [1], [0, 0, 1, 1], [], []>} : vector<48x32xf32>, vector<32x256xf32>, vector<48x256xf32> -> vector<48x256xf32>
    %c3_92 = arith.constant 3 : index
    %c0_93 = arith.constant 0 : index
    %c0_94 = arith.constant 0 : index
    %209 = vector.load %arg14[%c3_92, %c0_93, %c0_94] : memref<6x48x1xf32, #tpu.memory_space<vmem>>, vector<1x48x1xf32>
    %210 = vector.shape_cast %209 : vector<1x48x1xf32> to vector<48x1xf32>
    %211 = vector.broadcast %210 : vector<48x1xf32> to vector<48x256xf32>
    %212 = arith.addf %208, %211 : vector<48x256xf32>
    %213 = vector.extract_strided_slice %212 {offsets = [0, 0], sizes = [32, 256], strides = [1, 1]} : vector<48x256xf32> to vector<32x256xf32>
    %214 = arith.addf %182, %213 : vector<32x256xf32>
    %cst_95 = arith.constant 0.707106769 : f32
    %215 = vector.broadcast %cst_95 : f32 to vector<32x256xf32>
    %216 = arith.mulf %214, %215 : vector<32x256xf32>
    %217 = vector.extract_strided_slice %212 {offsets = [32, 0], sizes = [16, 256], strides = [1, 1]} : vector<48x256xf32> to vector<16x256xf32>
    %218 = arith.addf %179, %217 : vector<16x256xf32>
    %219 = vector.extract_strided_slice %36 {offsets = [128, 0], sizes = [32, 1], strides = [1, 1]} : vector<192x1xf32> to vector<32x1xf32>
    %220 = vector.broadcast %219 : vector<32x1xf32> to vector<32x256xf32>
    %221 = arith.addf %216, %220 : vector<32x256xf32>
    %c2_i32_96 = arith.constant 2 : i32
    %222 = tpu.dynamic_rotate %221 by %c2_i32_96 dim 1 : vector<32x256xf32>, i32 -> vector<32x256xf32>
    %223 = vector.broadcast %49 : vector<1x256xf32> to vector<32x256xf32>
    %224 = arith.mulf %222, %223 : vector<32x256xf32>
    %c254_i32_97 = arith.constant 254 : i32
    %225 = tpu.dynamic_rotate %221 by %c254_i32_97 dim 1 : vector<32x256xf32>, i32 -> vector<32x256xf32>
    %226 = vector.broadcast %53 : vector<1x256xf32> to vector<32x256xf32>
    %227 = arith.mulf %225, %226 : vector<32x256xf32>
    %228 = tpu.concatenate %224, %221, %227 in 0 : vector<32x256xf32>, vector<32x256xf32>, vector<32x256xf32> -> vector<96x256xf32>
    %c4 = arith.constant 4 : index
    %c0_98 = arith.constant 0 : index
    %c0_99 = arith.constant 0 : index
    %229 = vector.load %arg11[%c4, %c0_98, %c0_99] : memref<6x64x96xf32, #tpu.memory_space<vmem>>, vector<1x64x96xf32>
    %230 = vector.shape_cast %229 : vector<1x64x96xf32> to vector<64x96xf32>
    %cst_100 = arith.constant dense<0.000000e+00> : vector<64x256xf32>
    %231 = tpu.matmul %230, %228, %cst_100 {dimension_numbers = #tpu.dot_dimension_numbers<[1], [0], [0], [1], [0, 0, 1, 1], [], []>} : vector<64x96xf32>, vector<96x256xf32>, vector<64x256xf32> -> vector<64x256xf32>
    %c4_101 = arith.constant 4 : index
    %c0_102 = arith.constant 0 : index
    %c0_103 = arith.constant 0 : index
    %232 = vector.load %arg12[%c4_101, %c0_102, %c0_103] : memref<6x64x1xf32, #tpu.memory_space<vmem>>, vector<1x64x1xf32>
    %233 = vector.shape_cast %232 : vector<1x64x1xf32> to vector<64x1xf32>
    %234 = vector.broadcast %233 : vector<64x1xf32> to vector<64x256xf32>
    %235 = arith.addf %231, %234 : vector<64x256xf32>
    %236 = vector.extract_strided_slice %235 {offsets = [0, 0], sizes = [32, 256], strides = [1, 1]} : vector<64x256xf32> to vector<32x256xf32>
    %237 = math.tanh %236 : vector<32x256xf32>
    %238 = vector.extract_strided_slice %235 {offsets = [32, 0], sizes = [32, 256], strides = [1, 1]} : vector<64x256xf32> to vector<32x256xf32>
    %239 = arith.negf %238 : vector<32x256xf32>
    %240 = math.exp %239 : vector<32x256xf32>
    %cst_104 = arith.constant 1.000000e+00 : f32
    %241 = vector.broadcast %cst_104 : f32 to vector<32x256xf32>
    %242 = arith.addf %241, %240 : vector<32x256xf32>
    %243 = arith.divf %241, %242 : vector<32x256xf32>
    %244 = arith.mulf %237, %243 : vector<32x256xf32>
    %c4_105 = arith.constant 4 : index
    %c0_106 = arith.constant 0 : index
    %c0_107 = arith.constant 0 : index
    %245 = vector.load %arg13[%c4_105, %c0_106, %c0_107] : memref<6x48x32xf32, #tpu.memory_space<vmem>>, vector<1x48x32xf32>
    %246 = vector.shape_cast %245 : vector<1x48x32xf32> to vector<48x32xf32>
    %cst_108 = arith.constant dense<0.000000e+00> : vector<48x256xf32>
    %247 = tpu.matmul %246, %244, %cst_108 {dimension_numbers = #tpu.dot_dimension_numbers<[1], [0], [0], [1], [0, 0, 1, 1], [], []>} : vector<48x32xf32>, vector<32x256xf32>, vector<48x256xf32> -> vector<48x256xf32>
    %c4_109 = arith.constant 4 : index
    %c0_110 = arith.constant 0 : index
    %c0_111 = arith.constant 0 : index
    %248 = vector.load %arg14[%c4_109, %c0_110, %c0_111] : memref<6x48x1xf32, #tpu.memory_space<vmem>>, vector<1x48x1xf32>
    %249 = vector.shape_cast %248 : vector<1x48x1xf32> to vector<48x1xf32>
    %250 = vector.broadcast %249 : vector<48x1xf32> to vector<48x256xf32>
    %251 = arith.addf %247, %250 : vector<48x256xf32>
    %252 = vector.extract_strided_slice %251 {offsets = [0, 0], sizes = [32, 256], strides = [1, 1]} : vector<48x256xf32> to vector<32x256xf32>
    %253 = arith.addf %221, %252 : vector<32x256xf32>
    %cst_112 = arith.constant 0.707106769 : f32
    %254 = vector.broadcast %cst_112 : f32 to vector<32x256xf32>
    %255 = arith.mulf %253, %254 : vector<32x256xf32>
    %256 = vector.extract_strided_slice %251 {offsets = [32, 0], sizes = [16, 256], strides = [1, 1]} : vector<48x256xf32> to vector<16x256xf32>
    %257 = arith.addf %218, %256 : vector<16x256xf32>
    %258 = vector.extract_strided_slice %36 {offsets = [160, 0], sizes = [32, 1], strides = [1, 1]} : vector<192x1xf32> to vector<32x1xf32>
    %259 = vector.broadcast %258 : vector<32x1xf32> to vector<32x256xf32>
    %260 = arith.addf %255, %259 : vector<32x256xf32>
    %c4_i32_113 = arith.constant 4 : i32
    %261 = tpu.dynamic_rotate %260 by %c4_i32_113 dim 1 : vector<32x256xf32>, i32 -> vector<32x256xf32>
    %262 = vector.broadcast %57 : vector<1x256xf32> to vector<32x256xf32>
    %263 = arith.mulf %261, %262 : vector<32x256xf32>
    %c252_i32_114 = arith.constant 252 : i32
    %264 = tpu.dynamic_rotate %260 by %c252_i32_114 dim 1 : vector<32x256xf32>, i32 -> vector<32x256xf32>
    %265 = vector.broadcast %61 : vector<1x256xf32> to vector<32x256xf32>
    %266 = arith.mulf %264, %265 : vector<32x256xf32>
    %267 = tpu.concatenate %263, %260, %266 in 0 : vector<32x256xf32>, vector<32x256xf32>, vector<32x256xf32> -> vector<96x256xf32>
    %c5 = arith.constant 5 : index
    %c0_115 = arith.constant 0 : index
    %c0_116 = arith.constant 0 : index
    %268 = vector.load %arg11[%c5, %c0_115, %c0_116] : memref<6x64x96xf32, #tpu.memory_space<vmem>>, vector<1x64x96xf32>
    %269 = vector.shape_cast %268 : vector<1x64x96xf32> to vector<64x96xf32>
    %cst_117 = arith.constant dense<0.000000e+00> : vector<64x256xf32>
    %270 = tpu.matmul %269, %267, %cst_117 {dimension_numbers = #tpu.dot_dimension_numbers<[1], [0], [0], [1], [0, 0, 1, 1], [], []>} : vector<64x96xf32>, vector<96x256xf32>, vector<64x256xf32> -> vector<64x256xf32>
    %c5_118 = arith.constant 5 : index
    %c0_119 = arith.constant 0 : index
    %c0_120 = arith.constant 0 : index
    %271 = vector.load %arg12[%c5_118, %c0_119, %c0_120] : memref<6x64x1xf32, #tpu.memory_space<vmem>>, vector<1x64x1xf32>
    %272 = vector.shape_cast %271 : vector<1x64x1xf32> to vector<64x1xf32>
    %273 = vector.broadcast %272 : vector<64x1xf32> to vector<64x256xf32>
    %274 = arith.addf %270, %273 : vector<64x256xf32>
    %275 = vector.extract_strided_slice %274 {offsets = [0, 0], sizes = [32, 256], strides = [1, 1]} : vector<64x256xf32> to vector<32x256xf32>
    %276 = math.tanh %275 : vector<32x256xf32>
    %277 = vector.extract_strided_slice %274 {offsets = [32, 0], sizes = [32, 256], strides = [1, 1]} : vector<64x256xf32> to vector<32x256xf32>
    %278 = arith.negf %277 : vector<32x256xf32>
    %279 = math.exp %278 : vector<32x256xf32>
    %cst_121 = arith.constant 1.000000e+00 : f32
    %280 = vector.broadcast %cst_121 : f32 to vector<32x256xf32>
    %281 = arith.addf %280, %279 : vector<32x256xf32>
    %282 = arith.divf %280, %281 : vector<32x256xf32>
    %283 = arith.mulf %276, %282 : vector<32x256xf32>
    %c5_122 = arith.constant 5 : index
    %c0_123 = arith.constant 0 : index
    %c0_124 = arith.constant 0 : index
    %284 = vector.load %arg13[%c5_122, %c0_123, %c0_124] : memref<6x48x32xf32, #tpu.memory_space<vmem>>, vector<1x48x32xf32>
    %285 = vector.shape_cast %284 : vector<1x48x32xf32> to vector<48x32xf32>
    %cst_125 = arith.constant dense<0.000000e+00> : vector<48x256xf32>
    %286 = tpu.matmul %285, %283, %cst_125 {dimension_numbers = #tpu.dot_dimension_numbers<[1], [0], [0], [1], [0, 0, 1, 1], [], []>} : vector<48x32xf32>, vector<32x256xf32>, vector<48x256xf32> -> vector<48x256xf32>
    %c5_126 = arith.constant 5 : index
    %c0_127 = arith.constant 0 : index
    %c0_128 = arith.constant 0 : index
    %287 = vector.load %arg14[%c5_126, %c0_127, %c0_128] : memref<6x48x1xf32, #tpu.memory_space<vmem>>, vector<1x48x1xf32>
    %288 = vector.shape_cast %287 : vector<1x48x1xf32> to vector<48x1xf32>
    %289 = vector.broadcast %288 : vector<48x1xf32> to vector<48x256xf32>
    %290 = arith.addf %286, %289 : vector<48x256xf32>
    %291 = vector.extract_strided_slice %290 {offsets = [32, 0], sizes = [16, 256], strides = [1, 1]} : vector<48x256xf32> to vector<16x256xf32>
    %292 = arith.addf %257, %291 : vector<16x256xf32>
    %cst_129 = arith.constant 0.408248305 : f32
    %293 = vector.broadcast %cst_129 : f32 to vector<16x256xf32>
    %294 = arith.mulf %292, %293 : vector<16x256xf32>
    %c0_130 = arith.constant 0 : index
    %c0_131 = arith.constant 0 : index
    %c0_132 = arith.constant 0 : index
    %295 = vector.load %arg20[%c0_130, %c0_131, %c0_132] : memref<1x16x256xf32, #tpu.memory_space<vmem>>, vector<1x16x256xf32>
    %296 = vector.shape_cast %295 : vector<1x16x256xf32> to vector<16x256xf32>
    %297 = vector.shape_cast %294 : vector<16x256xf32> to vector<1x16x256xf32>
    tpu.vector_store %arg20[%c0_130, %c0_131, %c0_132], %297 {strides = array<i32>} : memref<1x16x256xf32, #tpu.memory_space<vmem>>, vector<1x16x256xf32>,
    %c0_133 = arith.constant 0 : index
    %c0_134 = arith.constant 0 : index
    %298 = vector.load %arg15[%c0_133, %c0_134] : memref<16x16xf32, #tpu.memory_space<vmem>>, vector<16x16xf32>
    %cst_135 = arith.constant dense<0.000000e+00> : vector<16x256xf32>
    %299 = tpu.matmul %298, %294, %cst_135 {dimension_numbers = #tpu.dot_dimension_numbers<[1], [0], [0], [1], [0, 0, 1, 1], [], []>} : vector<16x16xf32>, vector<16x256xf32>, vector<16x256xf32> -> vector<16x256xf32>
    %c0_136 = arith.constant 0 : index
    %c0_137 = arith.constant 0 : index
    %300 = vector.load %arg16[%c0_136, %c0_137] : memref<16x1xf32, #tpu.memory_space<vmem>>, vector<16x1xf32>
    %301 = vector.broadcast %300 : vector<16x1xf32> to vector<16x256xf32>
    %302 = arith.addf %299, %301 : vector<16x256xf32>
    %cst_138 = arith.constant 0.000000e+00 : f32
    %303 = vector.broadcast %cst_138 : f32 to vector<16x256xf32>
    %304 = arith.maximumf %302, %303 : vector<16x256xf32>
    %c0_139 = arith.constant 0 : index
    %c0_140 = arith.constant 0 : index
    %305 = vector.load %arg17[%c0_139, %c0_140] : memref<1x16xf32, #tpu.memory_space<vmem>>, vector<1x16xf32>
    %cst_141 = arith.constant dense<0.000000e+00> : vector<1x256xf32>
    %306 = tpu.matmul %305, %304, %cst_141 {dimension_numbers = #tpu.dot_dimension_numbers<[1], [0], [0], [1], [0, 0, 1, 1], [], []>} : vector<1x16xf32>, vector<16x256xf32>, vector<1x256xf32> -> vector<1x256xf32>
    %c0_142 = arith.constant 0 : index
    %c0_143 = arith.constant 0 : index
    %307 = vector.load %arg18[%c0_142, %c0_143] : memref<1x1xf32, #tpu.memory_space<vmem>>, vector<1x1xf32>
    %308 = vector.broadcast %307 : vector<1x1xf32> to vector<1x256xf32>
    %309 = arith.addf %306, %308 : vector<1x256xf32>
    %c0_144 = arith.constant 0 : index
    %c0_145 = arith.constant 0 : index
    %c0_146 = arith.constant 0 : index
    %310 = vector.load %arg19[%c0_144, %c0_145, %c0_146] : memref<1x1x256xf32, #tpu.memory_space<vmem>>, vector<1x1x256xf32>
    %311 = vector.shape_cast %310 : vector<1x1x256xf32> to vector<1x256xf32>
    %312 = vector.shape_cast %309 : vector<1x256xf32> to vector<1x1x256xf32>
    tpu.vector_store %arg19[%c0_144, %c0_145, %c0_146], %312 {strides = array<i32>} : memref<1x1x256xf32, #tpu.memory_space<vmem>>, vector<1x1x256xf32>,
    return
  }
  func.func @transform_0(%arg0: i32) -> (i32, i32, i32) {
    %c0_i32 = arith.constant 0 : i32
    %c0_i32_0 = arith.constant 0 : i32
    %c0_i32_1 = arith.constant 0 : i32
    return %arg0, %c0_i32, %c0_i32_0 : i32, i32, i32
  }
  func.func @transform_1(%arg0: i32) -> (i32, i32, i32) {
    %c0_i32 = arith.constant 0 : i32
    %c0_i32_0 = arith.constant 0 : i32
    %c0_i32_1 = arith.constant 0 : i32
    return %arg0, %c0_i32, %c0_i32_0 : i32, i32, i32
  }
  func.func @transform_2(%arg0: i32) -> (i32, i32) {
    %c0_i32 = arith.constant 0 : i32
    %c0_i32_0 = arith.constant 0 : i32
    %c0_i32_1 = arith.constant 0 : i32
    return %c0_i32, %c0_i32_0 : i32, i32
  }
  func.func @transform_3(%arg0: i32) -> (i32, i32) {
    %c0_i32 = arith.constant 0 : i32
    %c0_i32_0 = arith.constant 0 : i32
    %c0_i32_1 = arith.constant 0 : i32
    return %c0_i32, %c0_i32_0 : i32, i32
  }
  func.func @transform_4(%arg0: i32) -> (i32, i32) {
    %c0_i32 = arith.constant 0 : i32
    %c0_i32_0 = arith.constant 0 : i32
    %c0_i32_1 = arith.constant 0 : i32
    return %c0_i32, %c0_i32_0 : i32, i32
  }
  func.func @transform_5(%arg0: i32) -> (i32, i32) {
    %c0_i32 = arith.constant 0 : i32
    %c0_i32_0 = arith.constant 0 : i32
    %c0_i32_1 = arith.constant 0 : i32
    return %c0_i32, %c0_i32_0 : i32, i32
  }
  func.func @transform_6(%arg0: i32) -> (i32, i32) {
    %c0_i32 = arith.constant 0 : i32
    %c0_i32_0 = arith.constant 0 : i32
    %c0_i32_1 = arith.constant 0 : i32
    return %c0_i32, %c0_i32_0 : i32, i32
  }
  func.func @transform_7(%arg0: i32) -> (i32, i32) {
    %c0_i32 = arith.constant 0 : i32
    %c0_i32_0 = arith.constant 0 : i32
    %c0_i32_1 = arith.constant 0 : i32
    return %c0_i32, %c0_i32_0 : i32, i32
  }
  func.func @transform_8(%arg0: i32) -> (i32, i32) {
    %c0_i32 = arith.constant 0 : i32
    %c0_i32_0 = arith.constant 0 : i32
    %c0_i32_1 = arith.constant 0 : i32
    return %c0_i32, %c0_i32_0 : i32, i32
  }
  func.func @transform_9(%arg0: i32) -> (i32, i32) {
    %c0_i32 = arith.constant 0 : i32
    %c0_i32_0 = arith.constant 0 : i32
    %c0_i32_1 = arith.constant 0 : i32
    return %c0_i32, %c0_i32_0 : i32, i32
  }
  func.func @transform_10(%arg0: i32) -> (i32, i32, i32) {
    %c0_i32 = arith.constant 0 : i32
    %c0_i32_0 = arith.constant 0 : i32
    %c0_i32_1 = arith.constant 0 : i32
    %c0_i32_2 = arith.constant 0 : i32
    return %c0_i32, %c0_i32_0, %c0_i32_1 : i32, i32, i32
  }
  func.func @transform_11(%arg0: i32) -> (i32, i32, i32) {
    %c0_i32 = arith.constant 0 : i32
    %c0_i32_0 = arith.constant 0 : i32
    %c0_i32_1 = arith.constant 0 : i32
    %c0_i32_2 = arith.constant 0 : i32
    return %c0_i32, %c0_i32_0, %c0_i32_1 : i32, i32, i32
  }
  func.func @transform_12(%arg0: i32) -> (i32, i32, i32) {
    %c0_i32 = arith.constant 0 : i32
    %c0_i32_0 = arith.constant 0 : i32
    %c0_i32_1 = arith.constant 0 : i32
    %c0_i32_2 = arith.constant 0 : i32
    return %c0_i32, %c0_i32_0, %c0_i32_1 : i32, i32, i32
  }
  func.func @transform_13(%arg0: i32) -> (i32, i32, i32) {
    %c0_i32 = arith.constant 0 : i32
    %c0_i32_0 = arith.constant 0 : i32
    %c0_i32_1 = arith.constant 0 : i32
    %c0_i32_2 = arith.constant 0 : i32
    return %c0_i32, %c0_i32_0, %c0_i32_1 : i32, i32, i32
  }
  func.func @transform_14(%arg0: i32) -> (i32, i32) {
    %c0_i32 = arith.constant 0 : i32
    %c0_i32_0 = arith.constant 0 : i32
    %c0_i32_1 = arith.constant 0 : i32
    return %c0_i32, %c0_i32_0 : i32, i32
  }
  func.func @transform_15(%arg0: i32) -> (i32, i32) {
    %c0_i32 = arith.constant 0 : i32
    %c0_i32_0 = arith.constant 0 : i32
    %c0_i32_1 = arith.constant 0 : i32
    return %c0_i32, %c0_i32_0 : i32, i32
  }
  func.func @transform_16(%arg0: i32) -> (i32, i32) {
    %c0_i32 = arith.constant 0 : i32
    %c0_i32_0 = arith.constant 0 : i32
    %c0_i32_1 = arith.constant 0 : i32
    return %c0_i32, %c0_i32_0 : i32, i32
  }
  func.func @transform_17(%arg0: i32) -> (i32, i32) {
    %c0_i32 = arith.constant 0 : i32
    %c0_i32_0 = arith.constant 0 : i32
    %c0_i32_1 = arith.constant 0 : i32
    return %c0_i32, %c0_i32_0 : i32, i32
  }
  func.func @transform_18(%arg0: i32) -> (i32, i32, i32) {
    %c0_i32 = arith.constant 0 : i32
    %c0_i32_0 = arith.constant 0 : i32
    %c0_i32_1 = arith.constant 0 : i32
    return %arg0, %c0_i32, %c0_i32_0 : i32, i32, i32
  }
  func.func @transform_19(%arg0: i32) -> (i32, i32, i32) {
    %c0_i32 = arith.constant 0 : i32
    %c0_i32_0 = arith.constant 0 : i32
    %c0_i32_1 = arith.constant 0 : i32
    return %arg0, %c0_i32, %c0_i32_0 : i32, i32, i32
  }
}

</mosaic_0001>

<bundles_post_ra>
// kernel: tpu_custom_call.1
= control target key start
LH: loop header
LB: loop body
LE: loop exit
PB: predicated region body
PF: predicated region fallthrough
CT: control target
= control target key end

     0   :  { %s8023_s0 = inlined_call_operand.vmem [shape: f32[2,1,256], index: 0, kind: input, shape index: {}]   ;;  %s8024_s1 = inlined_call_operand.vmem [shape: f32[2,16,1], index: 1, kind: input, shape index: {}]   ;;  %s8025_s2 = inlined_call_operand.vmem [shape: f32[32,1], index: 2, kind: input, shape index: {}]   ;;  %s8026_s3 = inlined_call_operand.vmem [shape: f32[32,1], index: 3, kind: input, shape index: {}]   ;;  %s8027_s4 = inlined_call_operand.vmem [shape: f32[32,16], index: 4, kind: input, shape index: {}]   ;;  %s8028_s5 = inlined_call_operand.vmem [shape: f32[32,1], index: 5, kind: input, shape index: {}]   ;;  %s8029_s6 = inlined_call_operand.vmem [shape: f32[32,32], index: 6, kind: input, shape index: {}]   ;;  %s8030_s7 = inlined_call_operand.vmem [shape: f32[32,1], index: 7, kind: input, shape index: {}]   ;;  %s8031_s8 = inlined_call_operand.vmem [shape: f32[192,32], index: 8, kind: input, shape index: {}]   ;;  %s8032_s9 = inlined_call_operand.vmem [shape: f32[192,1], index: 9, kind: input, shape index: {}]   ;;  %s8033_s10 = inlined_call_operand.vmem [shape: f32[6,64,96], index: 10, kind: input, shape index: {}]   ;;  %s8034_s11 = inlined_call_operand.vmem [shape: f32[6,64,1], index: 11, kind: input, shape index: {}]   ;;  %s8035_s12 = inlined_call_operand.vmem [shape: f32[6,48,32], index: 12, kind: input, shape index: {}]   ;;  %s8036_s13 = inlined_call_operand.vmem [shape: f32[6,48,1], index: 13, kind: input, shape index: {}]   ;;  %s8037_s14 = inlined_call_operand.vmem [shape: f32[16,16], index: 14, kind: input, shape index: {}]   ;;  %s8038_s15 = inlined_call_operand.vmem [shape: f32[16,1], index: 15, kind: input, shape index: {}]   ;;  %s8039_s16 = inlined_call_operand.vmem [shape: f32[1,16], index: 16, kind: input, shape index: {}]   ;;  %s8040_s17 = inlined_call_operand.<no memory space> [shape: f32[1,1], index: 17, kind: input, shape index: {}]   ;;  %s8041_s18 = inlined_call_operand.hbm [shape: f32[2,1,256], index: 18, kind: output, shape index: {0}]   ;;  %s8042_s19 = inlined_call_operand.hbm [shape: f32[2,16,256], index: 19, kind: output, shape index: {1}]  }
   0x1   :  { %8059 = sst [smem:[#allocation13_spill]] %s8023_s0  ;;  %v25_v0 = vstv %s8040_s17 }
   0x2   :  { %8060 = sst [smem:[#allocation14_spill]] %s8024_s1  ;;  %26 = vst [vmem:[#allocation2] sm:$0x1] %v25_v0 }
   0x3   :  { %8061 = sst [smem:[#allocation15_spill]] %s8025_s2 }
   0x4   :  { %8062 = sst [smem:[#allocation16_spill]] %s8026_s3 }
   0x5   :  { %8063 = sst [smem:[#allocation17_spill]] %s8027_s4 }
   0x6   :  { %8064 = sst [smem:[#allocation18_spill]] %s8028_s5 }
   0x7   :  { %27 = vsyncpa [#allocation4], 0 }
   0x8   :  { %29 = vsyncpa [#allocation4 + $0x1], 0 }
   0x9   :  { %30 = vsyncpa [#allocation6], 0 }
   0xa   :  { %32 = vsyncpa [#allocation6 + $0x1], 0  ;;  %s6172_s20 = smov 0   ;;  %s6174_s21 = smov 0  }
   0xb   :  { %s6176_s1 = smov 0   ;;  %s6178_s22 = smov 0  }
   0xc LB: > { %8065 = sst [smem:[#allocation9_spill]] %s6050_s1  ;;  %s6193_s17 = sadd.s32 4294967295, %s6054_s22   ;;  %s6054_s22 = sphi %s6178_s22, %s8084_s22   ;;  %s6050_s1 = sphi %s6176_s1, %s8086_s1   ;;  %s6046_s21 = sphi %s6174_s21, %s8088_s21   ;;  %s6042_s20 = sphi %s6172_s20, %s8087_s20  }
   0xd   : > { %s4864_s2 = sadd.s32 4294967294, %s6054_s22   ;;  %s6197_s23 = sadd.s32 1, %s6054_s22  }
   0xe   : > { %8066 = sst [smem:[#allocation10_spill]] %s6197_s23  ;;  %s433_s24 = sadd.s32 1, %s6050_s1 }
   0xf   : > { %s430_s25 = ssub.s32 %s6054_s22, %s6197_s23  ;;  %p443_p0 = scmp.ne.s32.totalorder %s6050_s1, %s6046_s21 }
  0x10   : > { %p431_p1 = scmp.eq.s32.totalorder %s430_s25, 0  ;;  %p444_p2 = scmp.eq.s32.totalorder %s6193_s17, 1 }
  0x11   : > { %p449_p3 = scmp.ne.s32.totalorder %s6046_s21, %s6042_s20  ;;  %p450_p4 = scmp.eq.s32.totalorder %s4864_s2, 1 }
  0x12   : > { %s6208_s3 = scalar_select %p431_p1, %s6050_s1, %s433_s24  }
  0x13   : > { %p6210_p5 = por %p444_p2, %p443_p0  ;;  %p6214_p6 = por %p450_p4, %p449_p3 }
  0x14   : > { %8067 = sst [smem:[#allocation11_spill]] %s6208_s3  ;;  %p4867_p7 = scmp.ge.s32.totalorder %s6054_s22, 1 }
  0x15   : > { %s8069_s27 = scalar_select %p6214_p6, 1, 0 }
  0x16   : > { %p557_p8 = scmp.lt.s32.totalorder %s6054_s22, 3 }
  0x17   : > { %8070 = sst [smem:[#allocation12_spill]] %s8069_s27 }
  0x18   : > { %p558_p9 = pnand %p4867_p7, %p557_p8 }
  0x19   : > { %p622_p10 = scmp.lt.s32.totalorder (!%p558_p9), %s6193_s17, 1  ;;  %s8071_s4 = sld [smem:[#allocation17_spill]] (!%p558_p9)  ;;  %vm725_vm0 = vcmask (!%p558_p9), 130048   ;;  %v851_v8 = vld [vmem:[%s8029_s6] sm:$0xff] (!%p558_p9)  ;;  %vm859_vm1 = vcmask (!%p558_p9), 261120   ;;  %v852_v43 = vld [vmem:[%s8029_s6 + $0x8] sm:$0xff] (!%p558_p9) }
  0x1a   : > { %561 = sbr.rel (%p558_p9) target bundleno = 5306 (0x14ba), region = 92  ;;  %s8072_s25 = sld [smem:[#allocation14_spill]] (!%p558_p9)  ;;  %5265 = vmatprep.mubr.msk.f32.mxu1 (!%p558_p9), %vm859_vm1, %v851_v8  ;;  %v853_v44 = vld [vmem:[%s8029_s6 + $0x10] sm:$0xff] (!%p558_p9)  ;;  %v854_v45 = vld [vmem:[%s8029_s6 + $0x18] sm:$0xff] (!%p558_p9)  ;;  %v985_v46 = vld [vmem:[%s8031_s8] sm:$0xff] (!%p558_p9)  ;;  %v6056_v47 = vmov (!%p558_p9), 0  }
  0x1b   : > { %s8073_s5 = sld [smem:[#allocation18_spill]] (!%p558_p9)  ;;  %5639 = vset.pattern.permute.xlu1 (!%p558_p9), %v6056_v47  ;;  %5638 = vset.pattern.permute.xlu0 (!%p558_p9), %v6056_v47  ;;  %s8075_s23 = sld [smem:[#allocation15_spill]] (!%p558_p9)  ;;  %v856_v56 = vld [vmem:[%s8030_s7 + $0x8] sm:$0xff] (!%p558_p9)  ;;  %v855_v57 = vld [vmem:[%s8030_s7] sm:$0xff] (!%p558_p9)  ;;  %v858_v62 = vld [vmem:[%s8030_s7 + $0x18] sm:$0xff] (!%p558_p9)  ;;  %vm1479_vm6 = vcmask (!%p558_p9), 785408  }
  0x1c   : > { %v857_v0 = vld [vmem:[%s8030_s7 + $0x10] sm:$0xff] (!%p558_p9)  ;;  %s6057_s24 = smov (!%p558_p9), 1   ;;  %s8051_s2 = smov (!%p558_p9), 126  }
  0x1f   : > { %v715_v1 = vld [vmem:[%s8071_s4] sm:$0xff] (!%p558_p9)  ;;  %v716_v5 = vld [vmem:[%s8071_s4 + $0x8] sm:$0xff] (!%p558_p9)  ;;  %v717_v6 = vld [vmem:[%s8071_s4 + $0x10] sm:$0xff] (!%p558_p9) }
  0x20   : > { %5251 = vmatprep.mubr.msk.f32.mxu0 (!%p558_p9), %vm725_vm0, %v715_v1  ;;  %v718_v7 = vld [vmem:[%s8071_s4 + $0x18] sm:$0xff] (!%p558_p9) }
  0x21   : > { %s6226_s0 = scalar_select %p622_p10, %s6193_s17, 1  ;;  %v722_v9 = vld [vmem:[%s8073_s5 + $0x8] sm:$0xff]  ;;  %v721_v10 = vld [vmem:[%s8073_s5] sm:$0xff]  ;;  %v724_v15 = vld [vmem:[%s8073_s5 + $0x18] sm:$0xff] }
  0x22   : > { %v723_v17 = vld [vmem:[%s8073_s5 + $0x10] sm:$0xff]  ;;  %v632_v49 = vld [vmem:[%s8075_s23] sm:$0xff]  ;;  %v633_v51 = vld [vmem:[%s8075_s23 + $0x8] sm:$0xff]  ;;  %s8076_s5 = sld [smem:[#allocation13_spill]] }
  0x23   : > { %s5202_s30 = sshll.u32 %s6226_s0, 4  ;;  %638 = vperm.xlu0 %5638, %v632_v49   ;;  %v635_v52 = vld [vmem:[%s8075_s23 + $0x18] sm:$0xff]  ;;  %v634_v53 = vld [vmem:[%s8075_s23 + $0x10] sm:$0xff]  ;;  %v657_v49 = vlaneseq  ;;  %s4870_s27 = sshll.u32 %s6226_s0, 1 }
  0x24   : > { %s630_s3 = scalar_lea.vmem %s8072_s25, %s5202_s30  ;;  %s8049_s0 = smov 127  }
  0x25   : > { %v719_v2 = vld [vmem:[%s630_s3] sm:$0xff]  ;;  %v720_v3 = vld [vmem:[%s630_s3 + $0x8] sm:$0xff]  ;;  %s8074_s3 = sld [smem:[#allocation16_spill]]  ;;  %s8079_s30 = smov 126  }
  0x26   : > { %v5315_v4 = vpack.c.bf16 %v720_v3, %v719_v2 }
  0x27   : > { %643 = vperm.xlu0 %5638, %v633_v51   ;;  %v6362_v51 = vshrl.u32 %v657_v49, 7 }
  0x28   : > { %5316 = vmatprep.subr.bf16.mxu0 %v5315_v4  ;;  %s625_s29 = scalar_lea.vmem %s8076_s5, %s4870_s27  ;;  %s8078_s5 = smov 2  }
  0x29   : > { %5318 = vmatpush3.bf16.msra.mxu0 %v5315_v4  ;;  %s8081_s27 = smov 124  }
  0x2b   : > { %v675_v48 = vld [vmem:[%s8074_s3] sm:$0xff]  ;;  %v676_v50 = vld [vmem:[%s8074_s3 + $0x8] sm:$0xff]  ;;  %648 = vperm.xlu0 %5638, %v634_v53   ;;  %v678_v54 = vld [vmem:[%s8074_s3 + $0x18] sm:$0xff]  ;;  %v659_v53 = vsub.s32 0, %v6362_v51 }
  0x2c   : > { %5252 = vmatmul.mubr.msk.f32.vlgmr.msra.gmra.mrb[0].mxu0 %vm725_vm0, %v716_v5  ;;  %681 = vperm.xlu1 %5639, %v675_v48   ;;  %v677_v55 = vld [vmem:[%s8074_s3 + $0x10] sm:$0xff] }
  0x2d   : > { %5254 = vmatprep.mubr.msk.f32.mxu0 %vm725_vm0, %v717_v6 }
  0x2f   : > { %691 = vperm.xlu0 %5638, %v677_v55  }
  0x30   : > { %5255 = vmatmul.mubr.msk.f32.gmra.mrb[2].mxu0 %vm725_vm0, %v718_v7  ;;  %686 = vperm.xlu1 %5639, %v676_v50  }
  0x31   : > { %5279 = vmatprep.mubr.msk.f32.mxu0 %vm859_vm1, %v985_v46 }
  0x34   : > { %653 = vperm.xlu1 %5639, %v635_v52  }
  0x38   : > { %696 = vperm.xlu1 %5639, %v678_v54   ;;  %v631_v54 = vld [vmem:[%s625_s29] sm:$0x3]  ;;  %s8053_s29 = smov 2  }
  0xa2   : > { %v639_v52 = vpop.permute.xlu0 %638 }
  0xab   : > { %v682_v50 = vpop.permute.xlu1 %681 }
  0xaf   : > { %v687_v55 = vpop.permute.xlu1 %686 }
  0xff   : > { %v5253_v11 = vpop.f32.mrb[0].mxu0 }
 0x100   : > { %v810_v12 = vadd.f32 %v5253_v11, %v722_v9  ;;  %v804_v13 = vpop.f32.mrb[1].mxu0 }
 0x101   : > { %v805_v14 = vadd.f32 %v804_v13, %v721_v10 }
 0x102   : > { %v4878_v16 = vmul.f32 -1.442695, %v810_v12 }
 0x103   : > { %v4877_v18 = vmul.f32 -1.442695, %v805_v14  ;;  %v5256_v19 = vpop.f32.mrb[2].mxu0 }
 0x104   : > { %5640 = vpow2.f32 %v4878_v16  ;;  %v820_v20 = vadd.f32 %v5256_v19, %v724_v15  ;;  %v814_v21 = vpop.f32.mrb[3].mxu0 }
 0x105   : > { %5642 = vpow2.f32 %v4877_v18  ;;  %v815_v22 = vadd.f32 %v814_v21, %v723_v17 }
 0x106   : > { %v4880_v23 = vmul.f32 -1.442695, %v820_v20 }
 0x107   : > { %v4879_v24 = vmul.f32 -1.442695, %v815_v22 }
 0x108   : > { %5644 = vpow2.f32 %v4880_v23 }
 0x109   : > { %5646 = vpow2.f32 %v4879_v24 }
 0x10e   : > { %v5641_v25 = vpop.eup %5640 }
 0x10f   : > { %v5643_v26 = vpop.eup %5642  ;;  %v836_v27 = vadd.f32 1.0, %v5641_v25 }
 0x110   : > { %v835_v28 = vadd.f32 1.0, %v5643_v26  ;;  %v986_v26 = vld [vmem:[%s8031_s8 + $0x8] sm:$0xff] }
 0x111   : > { %5648 = vrcp.f32 %v836_v27  ;;  %v987_v27 = vld [vmem:[%s8031_s8 + $0x10] sm:$0xff] }
 0x112   : > { %v5645_v29 = vpop.eup %5644  ;;  %5650 = vrcp.f32 %v835_v28  ;;  %v988_v28 = vld [vmem:[%s8031_s8 + $0x18] sm:$0xff] }
 0x113   : > { %v5647_v30 = vpop.eup %5646  ;;  %v838_v31 = vadd.f32 1.0, %v5645_v29  ;;  %v989_v29 = vld [vmem:[%s8031_s8 + $0x20] sm:$0xff] }
 0x114   : > { %v837_v32 = vadd.f32 1.0, %v5647_v30  ;;  %v990_v30 = vld [vmem:[%s8031_s8 + $0x28] sm:$0xff] }
 0x115   : > { %5652 = vrcp.f32 %v838_v31  ;;  %v991_v31 = vld [vmem:[%s8031_s8 + $0x30] sm:$0xff] }
 0x116   : > { %5654 = vrcp.f32 %v837_v32  ;;  %v992_v32 = vld [vmem:[%s8031_s8 + $0x38] sm:$0xff] }
 0x11b   : > { %v5649_v33 = vpop.eup %5648 }
 0x11c   : > { %v5651_v34 = vpop.eup %5650  ;;  %v848_v35 = vmul.f32 %v5649_v33, %v810_v12  ;;  %v1010_v33 = vld [vmem:[%s8032_s9 + $0x8] sm:$0xff] }
 0x11d   : > { %v847_v36 = vmul.f32 %v5651_v34, %v805_v14  ;;  %v1009_v34 = vld [vmem:[%s8032_s9] sm:$0xff] }
 0x11f   : > { %v5653_v37 = vpop.eup %5652  ;;  %v5319_v38 = vpack.c.bf16 %v848_v35, %v847_v36 }
 0x120   : > { %v5655_v39 = vpop.eup %5654  ;;  %v850_v40 = vmul.f32 %v5653_v37, %v820_v20 }
 0x121   : > { %v849_v41 = vmul.f32 %v5655_v39, %v815_v22  ;;  %5320 = vmatprep.subr.bf16.mxu1 %v5319_v38  ;;  %v1012_v39 = vld [vmem:[%s8032_s9 + $0x18] sm:$0xff] }
 0x122   : > { %5322 = vmatpush3.bf16.msra.mxu1 %v5319_v38 }
 0x123   : > { %v5323_v42 = vpack.c.bf16 %v850_v40, %v849_v41  ;;  %v1011_v40 = vld [vmem:[%s8032_s9 + $0x10] sm:$0xff] }
 0x125   : > { %5324 = vmatprep.subr.bf16.mxu1 %v5323_v42 }
 0x126   : > { %5326 = vmatpush3.bf16.msra.mxu1 %v5323_v42 }
 0x129   : > { %5266 = vmatmul.mubr.msk.f32.vlgmr.msra.gmra.mrb[0].mxu1 %vm859_vm1, %v852_v43 }
 0x12a   : > { %5268 = vmatprep.mubr.msk.f32.mxu1 %vm859_vm1, %v853_v44 }
 0x12d   : > { %5269 = vmatmul.mubr.msk.f32.gmra.mrb[2].mxu1 %vm859_vm1, %v854_v45 }
 0x1fc   : > { %v5267_v58 = vpop.f32.mrb[0].mxu1 }
 0x1fd   : > { %v944_v59 = vadd.f32 %v5267_v58, %v856_v56  ;;  %v938_v60 = vpop.f32.mrb[1].mxu1  ;;  %v644_v56 = vpop.permute.xlu0 %643  ;;  %v663_v58 = vsub.s32 1, %v6362_v51 }
 0x1fe   : > { %v939_v61 = vadd.f32 %v938_v60, %v855_v57  ;;  %v660_v57 = vrot.slane %v631_v54, %v659_v53 }
 0x1ff   : > { %v4886_v63 = vmul.f32 -1.442695, %v944_v59  ;;  %v664_v60 = vrot.slane %v631_v54, %v663_v58  ;;  %v1008_v54 = vld [vmem:[%s8031_s8 + $0xb8] sm:$0xff] }
 0x200   : > { %v4885_v1 = vmul.f32 -1.442695, %v939_v61  ;;  %v5270_v2 = vpop.f32.mrb[2].mxu1  ;;  %v1438_v58 = vld [vmem:[%s8034_s11 + $0x38] sm:$0xff] }
 0x201   : > { %5656 = vpow2.f32 %v4886_v63  ;;  %v954_v3 = vadd.f32 %v5270_v2, %v858_v62  ;;  %v948_v4 = vpop.f32.mrb[3].mxu1  ;;  %v649_v62 = vpop.permute.xlu0 %648  ;;  %v667_v63 = vmul.f32 %v660_v57, %v639_v52  ;;  %v668_v2 = vmul.f32 %v664_v60, %v639_v52  ;;  %v1007_v52 = vld [vmem:[%s8031_s8 + $0xb0] sm:$0xff] }
 0x202   : > { %5658 = vpow2.f32 %v4885_v1  ;;  %v949_v5 = vadd.f32 %v948_v4, %v857_v0  ;;  %v670_v0 = vmul.f32 %v664_v60, %v644_v56 }
 0x203   : > { %v4888_v6 = vmul.f32 -1.442695, %v954_v3 }
 0x204   : > { %v4887_v7 = vmul.f32 -1.442695, %v949_v5 }
 0x205   : > { %5660 = vpow2.f32 %v4888_v6  ;;  %v997_v6 = vld [vmem:[%s8031_s8 + $0x60] sm:$0xff] }
 0x206   : > { %5662 = vpow2.f32 %v4887_v7  ;;  %v998_v7 = vld [vmem:[%s8031_s8 + $0x68] sm:$0xff]  ;;  %5297 = vmatprep.mubr.msk.f32.mxu1 %vm859_vm1, %v997_v6 }
 0x20b   : > { %v5657_v8 = vpop.eup %5656 }
 0x20c   : > { %v5659_v9 = vpop.eup %5658  ;;  %v970_v10 = vadd.f32 1.0, %v5657_v8  ;;  %v702_v8 = vadd.f32 %v687_v55, %v670_v0  ;;  %v1688_v0 = vld [vmem:[%s8036_s13 + $0x8] sm:$0xff] }
 0x20d   : > { %v969_v11 = vadd.f32 1.0, %v5659_v9 }
 0x20e   : > { %5664 = vrcp.f32 %v970_v10 }
 0x20f   : > { %v5661_v12 = vpop.eup %5660  ;;  %5666 = vrcp.f32 %v969_v11  ;;  %v700_v11 = vadd.f32 %v682_v50, %v668_v2  ;;  %v1690_v2 = vld [vmem:[%s8036_s13 + $0x18] sm:$0xff] }
 0x210   : > { %v5663_v13 = vpop.eup %5662  ;;  %v972_v14 = vadd.f32 1.0, %v5661_v12  ;;  %v671_v12 = vmul.f32 %v660_v57, %v649_v62 }
 0x211   : > { %v971_v15 = vadd.f32 1.0, %v5663_v13 }
 0x212   : > { %5668 = vrcp.f32 %v972_v14 }
 0x213   : > { %5670 = vrcp.f32 %v971_v15 }
 0x218   : > { %v5665_v16 = vpop.eup %5664 }
 0x219   : > { %v5667_v17 = vpop.eup %5666  ;;  %v982_v18 = vmul.f32 %v5665_v16, %v944_v59  ;;  %v654_v59 = vpop.permute.xlu1 %653 }
 0x21a   : > { %v981_v19 = vmul.f32 %v5667_v17, %v939_v61  ;;  %v669_v61 = vmul.f32 %v660_v57, %v644_v56  ;;  %v673_v9 = vmul.f32 %v660_v57, %v654_v59  ;;  %v1436_v56 = vld [vmem:[%s8034_s11 + $0x28] sm:$0xff]  ;;  %v1435_v57 = vld [vmem:[%s8034_s11 + $0x20] sm:$0xff] }
 0x21c   : > { %v5669_v20 = vpop.eup %5668  ;;  %v5327_v21 = vpack.c.bf16 %v982_v18, %v981_v19  ;;  %v701_v1 = vadd.f32 %v687_v55, %v669_v61  ;;  %v674_v18 = vmul.f32 %v664_v60, %v654_v59  ;;  %v6059_v55 = vmov 0.0   ;;  %v1437_v59 = vld [vmem:[%s8034_s11 + $0x30] sm:$0xff]  ;;  %v1431_v61 = vld [vmem:[%s8034_s11] sm:$0xff] }
 0x21d   : > { %v5671_v22 = vpop.eup %5670  ;;  %v984_v23 = vmul.f32 %v5669_v20, %v954_v3  ;;  %v699_v3 = vadd.f32 %v682_v50, %v667_v63  ;;  %v697_v4 = vpop.permute.xlu1 %696  ;;  %v710_v20 = vmax.f32 %v702_v8, 0.0  ;;  %v1006_v50 = vld [vmem:[%s8031_s8 + $0xa8] sm:$0xff]  ;;  %v1433_v63 = vld [vmem:[%s8034_s11 + $0x10] sm:$0xff]  ;;  %v1016_v8 = vld [vmem:[%s8032_s9 + $0x38] sm:$0xff] }
 0x21e   : > { %v983_v24 = vmul.f32 %v5671_v22, %v949_v5  ;;  %5328 = vmatprep.subr.bf16.mxu0 %v5327_v21  ;;  %5535 = vmatprep.subr.bf16.mxu1 %v5327_v21  ;;  %v692_v5 = vpop.permute.xlu0 %691  ;;  %v709_v10 = vmax.f32 %v701_v1, 0.0  ;;  %v705_v19 = vadd.f32 %v697_v4, %v673_v9  ;;  %v1687_v1 = vld [vmem:[%s8036_s13] sm:$0xff]  ;;  %v1015_v9 = vld [vmem:[%s8032_s9 + $0x30] sm:$0xff] }
 0x21f   : > { %5330 = vmatpush3.bf16.msra.mxu0 %v5327_v21  ;;  %5537 = vmatpush3.bf16.msra.mxu1 %v5327_v21  ;;  %v707_v14 = vmax.f32 %v699_v3, 0.0  ;;  %v672_v21 = vmul.f32 %v664_v60, %v649_v62  ;;  %v703_v22 = vadd.f32 %v692_v5, %v671_v12  ;;  %v1432_v60 = vld [vmem:[%s8034_s11 + $0x8] sm:$0xff]  ;;  %v1434_v62 = vld [vmem:[%s8034_s11 + $0x18] sm:$0xff] }
 0x220   : > { %v5331_v25 = vpack.c.bf16 %v984_v23, %v983_v24  ;;  %v708_v23 = vmax.f32 %v700_v11, 0.0  ;;  %v1014_v3 = vld [vmem:[%s8032_s9 + $0x28] sm:$0xff] }
 0x222   : > { %5332 = vmatprep.subr.bf16.mxu0 %v5331_v25  ;;  %5536 = vmatprep.subr.bf16.mxu1 %v5331_v25 }
 0x223   : > { %5334 = vmatpush3.bf16.msra.mxu0 %v5331_v25  ;;  %5538 = vmatpush3.bf16.msra.mxu1 %v5331_v25  ;;  %v999_v25 = vld [vmem:[%s8031_s8 + $0x70] sm:$0xff] }
 0x226   : > { %5280 = vmatmul.mubr.msk.f32.vlgmr.msra.gmra.mrb[4].mxu0 %vm859_vm1, %v986_v26  ;;  %5298 = vmatmul.mubr.msk.f32.vlgmr.msra.gmra.mrb[4].mxu1 %vm859_vm1, %v998_v7 }
 0x227   : > { %5282 = vmatprep.mubr.msk.f32.mxu0 %vm859_vm1, %v987_v27  ;;  %5300 = vmatprep.mubr.msk.f32.mxu1 %vm859_vm1, %v999_v25 }
 0x22a   : > { %5283 = vmatmul.mubr.msk.f32.gmra.mrb[6].mxu0 %vm859_vm1, %v988_v28  ;;  %v1000_v28 = vld [vmem:[%s8031_s8 + $0x78] sm:$0xff] }
 0x22b   : > { %5285 = vmatprep.mubr.msk.f32.mxu0 %vm859_vm1, %v989_v29  ;;  %v706_v29 = vadd.f32 %v697_v4, %v674_v18  ;;  %5301 = vmatmul.mubr.msk.f32.gmra.mrb[6].mxu1 %vm859_vm1, %v1000_v28  ;;  %v1689_v4 = vld [vmem:[%s8036_s13 + $0x10] sm:$0xff] }
 0x22e   : > { %5286 = vmatmul.mubr.msk.f32.gmra.mrb[8].mxu0 %vm859_vm1, %v990_v30  ;;  %v713_v30 = vmax.f32 %v705_v19, 0.0 }
 0x22f   : > { %5288 = vmatprep.mubr.msk.f32.mxu0 %vm859_vm1, %v991_v31 }
 0x232   : > { %5289 = vmatmul.mubr.msk.f32.gmra.mrb[10].mxu0 %vm859_vm1, %v992_v32  ;;  %v704_v32 = vadd.f32 %v692_v5, %v672_v21  ;;  %v1013_v5 = vld [vmem:[%s8032_s9 + $0x20] sm:$0xff] }
 0x2f9   : > { %v5281_v35 = vpop.f32.mrb[4].mxu0 }
 0x2fa   : > { %v1177_v36 = vadd.f32 %v5281_v35, %v1010_v33  ;;  %v1171_v37 = vpop.f32.mrb[5].mxu0  ;;  %v711_v33 = vmax.f32 %v703_v22, 0.0  ;;  %v1001_v35 = vld [vmem:[%s8031_s8 + $0x80] sm:$0xff] }
 0x2fb   : > { %v1172_v38 = vadd.f32 %v1171_v37, %v1009_v34  ;;  %5303 = vmatprep.mubr.msk.f32.mxu1 %vm859_vm1, %v1001_v35  ;;  %v1002_v37 = vld [vmem:[%s8031_s8 + $0x88] sm:$0xff] }
 0x2fc   : > { %1336 = vperm.xlu1 %5639, %v1177_v36   ;;  %5304 = vmatmul.mubr.msk.f32.gmra.mrb[8].mxu1 %vm859_vm1, %v1002_v37 }
 0x2fd   : > { %v5284_v41 = vpop.f32.mrb[6].mxu0  ;;  %1331 = vperm.xlu0 %5638, %v1172_v38   ;;  %v714_v38 = vmax.f32 %v706_v29, 0.0 }
 0x2fe   : > { %v1187_v42 = vadd.f32 %v5284_v41, %v1012_v39  ;;  %v1181_v43 = vpop.f32.mrb[7].mxu0  ;;  %v712_v39 = vmax.f32 %v704_v32, 0.0  ;;  %v1003_v41 = vld [vmem:[%s8031_s8 + $0x90] sm:$0xff] }
 0x2ff   : > { %v1182_v44 = vadd.f32 %v1181_v43, %v1011_v40  ;;  %5306 = vmatprep.mubr.msk.f32.mxu1 %vm859_vm1, %v1003_v41  ;;  %v1004_v43 = vld [vmem:[%s8031_s8 + $0x98] sm:$0xff] }
 0x300   : > { %1346 = vperm.xlu1 %5639, %v1187_v42   ;;  %5307 = vmatmul.mubr.msk.f32.gmra.mrb[10].mxu1 %vm859_vm1, %v1004_v43 }
 0x301   : > { %1341 = vperm.xlu0 %5638, %v1182_v44   ;;  %v6352_v45 = vpop.f32.mrb[8].mxu0  ;;  %v1005_v44 = vld [vmem:[%s8031_s8 + $0xa0] sm:$0xff] }
 0x302   : > { %v6354_v46 = vpop.f32.mrb[9].mxu0  ;;  %5309 = vmatprep.mubr.msk.f32.mxu1 %vm859_vm1, %v1005_v44  ;;  %v1197_v6 = vadd.f32 %v6352_v45, %v1014_v3  ;;  %v6521_v45 = vand.u32 127, %v657_v49 }
 0x303   : > { %v1192_v7 = vadd.f32 %v6354_v46, %v1013_v5 }
 0x304   : > { %5310 = vmatmul.mubr.msk.f32.gmra.mrb[12].mxu1 %vm859_vm1, %v1006_v50  ;;  %vm1293_vm2 = vcmp.ge.s32.totalorder %v6521_v45, 1  ;;  %vm1373_vm3 = vcmp.lt.s32.totalorder %v6521_v45, 1  ;;  %v6539_v29 = vadd.s32 128, %v6521_v45  ;;  %vm1406_vm5 = vcmp.lt.s32.totalorder %v6521_v45, 127 }
 0x305   : > { %v6356_v47 = vpop.f32.mrb[10].mxu0  ;;  %5312 = vmatprep.mubr.msk.f32.mxu1 %vm859_vm1, %v1007_v52  ;;  %vm1305_vm7 = vcmp.ge.s32.totalorder %v6521_v45, 2  ;;  %vm1906_vm8 = vcmp.lt.s32.totalorder %v6521_v45, 2  ;;  %vm1939_vm10 = vcmp.lt.s32.totalorder %v6521_v45, 126  ;;  %vm1317_vm11 = vcmp.ge.s32.totalorder %v6521_v45, 4 }
 0x306   : > { %v6358_v48 = vpop.f32.mrb[11].mxu0  ;;  %vm1300_vm4 = vcmp.lt.s32.totalorder %v6539_v29, 255  ;;  %vm1312_vm9 = vcmp.lt.s32.totalorder %v6539_v29, 254  ;;  %vm2442_vm12 = vcmp.lt.s32.totalorder %v6521_v45, 4  ;;  %vm1324_vm13 = vcmp.lt.s32.totalorder %v6539_v29, 252 }
 0x307   : > { %v1202_v11 = vadd.f32 %v6358_v48, %v1015_v9  ;;  %v6556_v52 = vsel %vm1300_vm4, 1.0, %v6059_v55  ;;  %vm2475_vm14 = vcmp.lt.s32.totalorder %v6521_v45, 124  ;;  %v5143_v45 = vld [vmem:[%s8033_s10 + $0x150] sm:$0xff] }
 0x308   : > { %5313 = vmatmul.mubr.msk.f32.gmra.mrb[14].mxu1 %vm859_vm1, %v1008_v54 }
 0x309   : > { %1568 = vmatprep.mubr.f32.mxu1 %v6059_v55 }
 0x37b   : > { %v1337_v13 = vpop.permute.xlu1 %1336 }
 0x37c   : > { %v6379_v15 = vadd.f32 %v1337_v13, %v709_v10  ;;  %v1332_v16 = vpop.permute.xlu0 %1331  ;;  %v6387_v24 = vadd.f32 %v1337_v13, %v710_v20  ;;  %v1207_v10 = vadd.f32 %v6356_v47, %v1016_v8  ;;  %v6526_v13 = vsel %vm1293_vm2, 1.0, %v6059_v55 }
 0x37d   : > { %v6381_v17 = vadd.f32 %v1332_v16, %v707_v14  ;;  %v6392_v26 = vadd.f32 %v1332_v16, %v708_v23 }
 0x37e   : > { %1359 = vrot.lane.b32.xlu1 %v6379_v15, %s6057_s24 }
 0x37f   : > { %1357 = vrot.lane.b32.xlu0 %v6381_v17, %s6057_s24  ;;  %v1347_v27 = vpop.permute.xlu1 %1346  ;;  %v5343_v50 = vpack.c.bf16 %v6387_v24, %v6392_v26 }
 0x380   : > { %v1342_v31 = vpop.permute.xlu0 %1341  ;;  %v6403_v34 = vadd.f32 %v1347_v27, %v713_v30  ;;  %v6419_v40 = vadd.f32 %v1347_v27, %v714_v38 }
 0x381   : > { %v6408_v36 = vadd.f32 %v1342_v31, %v711_v33  ;;  %v6424_v42 = vadd.f32 %v1342_v31, %v712_v39 }
 0x382   : > { %1367 = vrot.lane.b32.xlu1 %v6387_v24, %s6057_s24 }
 0x383   : > { %1365 = vrot.lane.b32.xlu0 %v6392_v26, %s6057_s24 }
 0x386   : > { %1363 = vrot.lane.b32.xlu1 %v6403_v34, %s6057_s24 }
 0x387   : > { %1361 = vrot.lane.b32.xlu0 %v6408_v36, %s6057_s24 }
 0x38a   : > { %1371 = vrot.lane.b32.xlu1 %v6419_v40, %s6057_s24 }
 0x38b   : > { %1369 = vrot.lane.b32.xlu0 %v6424_v42, %s6057_s24 }
 0x38e   : > { %1392 = vrot.lane.b32.xlu1 %v6379_v15, %s8049_s0 }
 0x38f   : > { %1390 = vrot.lane.b32.xlu0 %v6381_v17, %s8049_s0 }
 0x392   : > { %1400 = vrot.lane.b32.xlu1 %v6387_v24, %s8049_s0 }
 0x393   : > { %1398 = vrot.lane.b32.xlu0 %v6392_v26, %s8049_s0 }
 0x396   : > { %1396 = vrot.lane.b32.xlu1 %v6403_v34, %s8049_s0 }
 0x397   : > { %1394 = vrot.lane.b32.xlu0 %v6408_v36, %s8049_s0 }
 0x39a   : > { %1404 = vrot.lane.b32.xlu1 %v6419_v40, %s8049_s0 }
 0x39b   : > { %1402 = vrot.lane.b32.xlu0 %v6424_v42, %s8049_s0 }
 0x39e   : > { %1466 = vperm.xlu1 %5639, %v1436_v56  }
 0x39f   : > { %1461 = vperm.xlu0 %5638, %v1435_v57  }
 0x3a2   : > { %1476 = vperm.xlu1 %5639, %v1438_v58   ;;  %v5345_v58 = vpack.c.bf16 %v6379_v15, %v6381_v17 }
 0x3a3   : > { %1471 = vperm.xlu0 %5638, %v1437_v59  }
 0x3a6   : > { %1446 = vperm.xlu1 %5639, %v1432_v60  }
 0x3a7   : > { %1441 = vperm.xlu0 %5638, %v1431_v61   ;;  %v5347_v61 = vpack.c.bf16 %v6419_v40, %v6424_v42 }
 0x3aa   : > { %1456 = vperm.xlu1 %5639, %v1434_v62  }
 0x3ab   : > { %1451 = vperm.xlu0 %5638, %v1433_v63  }
 0x3ae   : > { %1700 = vperm.xlu1 %5639, %v1688_v0  }
 0x3af   : > { %1695 = vperm.xlu0 %5638, %v1687_v1   ;;  %v5349_v1 = vpack.c.bf16 %v6403_v34, %v6408_v36 }
 0x3b2   : > { %1710 = vperm.xlu1 %5639, %v1690_v2  }
 0x3b3   : > { %1705 = vperm.xlu0 %5638, %v1689_v4  }
 0x3b6   : > { %1869 = vperm.xlu1 %5639, %v1197_v6  }
 0x3b7   : > { %1864 = vperm.xlu0 %5638, %v1192_v7  }
 0x3ba   : > { %1879 = vperm.xlu1 %5639, %v1207_v10  }
 0x3bb   : > { %1874 = vperm.xlu0 %5638, %v1202_v11  }
 0x3f0   : > { %v1360_v46 = vpop.permute.xlu1 %1359 }
 0x3f1   : > { %v1358_v12 = vpop.permute.xlu0 %1357 }
 0x3f4   : > { %v1368_v14 = vpop.permute.xlu1 %1367 }
 0x3f5   : > { %v1375_v47 = vsel %vm1373_vm3, %v1360_v46, %v1368_v14  ;;  %v1379_v48 = vsel %vm1373_vm3, %v1368_v14, %v1360_v46  ;;  %v1366_v16 = vpop.permute.xlu0 %1365 }
 0x3f6   : > { %v1384_v18 = vmul.f32 %v6526_v13, %v1379_v48  ;;  %v1374_v19 = vsel %vm1373_vm3, %v1358_v12, %v1366_v16  ;;  %v1378_v20 = vsel %vm1373_vm3, %v1366_v16, %v1358_v12  ;;  %v1423_v48 = vld [vmem:[%s8033_s10] sm:$0xff]  ;;  %v1424_v16 = vld [vmem:[%s8033_s10 + $0x8] sm:$0xff] }
 0x3f7   : > { %v1382_v21 = vmul.f32 %v6526_v13, %v1378_v20  ;;  %v5335_v22 = vpack.c.bf16 %v1375_v47, %v1374_v19  ;;  %v1426_v19 = vld [vmem:[%s8033_s10 + $0x18] sm:$0xff]  ;;  %v1427_v20 = vld [vmem:[%s8033_s10 + $0x20] sm:$0xff] }
 0x3f8   : > { %v1364_v23 = vpop.permute.xlu1 %1363 }
 0x3f9   : > { %v5337_v25 = vpack.c.bf16 %v1384_v18, %v1382_v21  ;;  %5336 = vmatprep.subr.bf16.mxu1 %v5335_v22  ;;  %v1362_v27 = vpop.permute.xlu0 %1361  ;;  %v1425_v18 = vld [vmem:[%s8033_s10 + $0x10] sm:$0xff]  ;;  %v1428_v21 = vld [vmem:[%s8033_s10 + $0x28] sm:$0xff] }
 0x3fa   : > { %v1429_v22 = vld [vmem:[%s8033_s10 + $0x30] sm:$0xff] }
 0x3fb   : > { %5338 = vmatpush1.bf16.msra.mxu1 %v5337_v25  ;;  %v6624_v25 = vpop.f32.mrb[4].mxu1 }
 0x3fc   : > { %v1372_v28 = vpop.permute.xlu1 %1371 }
 0x3fd   : > { %v1377_v30 = vsel %vm1373_vm3, %v1364_v23, %v1372_v28  ;;  %v1381_v31 = vsel %vm1373_vm3, %v1372_v28, %v1364_v23  ;;  %v1370_v32 = vpop.permute.xlu0 %1369  ;;  %v1430_v23 = vld [vmem:[%s8033_s10 + $0x38] sm:$0xff] }
 0x3fe   : > { %v1388_v33 = vmul.f32 %v6526_v13, %v1381_v31  ;;  %v1376_v35 = vsel %vm1373_vm3, %v1362_v27, %v1370_v32  ;;  %v1380_v37 = vsel %vm1373_vm3, %v1370_v32, %v1362_v27  ;;  %v6626_v27 = vpop.f32.mrb[5].mxu1 }
 0x3ff   : > { %v1386_v38 = vmul.f32 %v6526_v13, %v1380_v37  ;;  %v5339_v39 = vpack.c.bf16 %v1377_v30, %v1376_v35  ;;  %v6628_v28 = vpop.f32.mrb[6].mxu1 }
 0x400   : > { %v1393_v41 = vpop.permute.xlu1 %1392  ;;  %v6630_v30 = vpop.f32.mrb[7].mxu1 }
 0x401   : > { %v5341_v43 = vpack.c.bf16 %v1388_v33, %v1386_v38  ;;  %5340 = vmatprep.subr.bf16.mxu1 %v5339_v39  ;;  %v1391_v44 = vpop.permute.xlu0 %1390  ;;  %v6632_v31 = vpop.f32.mrb[8].mxu1 }
 0x402   : > { %v6634_v32 = vpop.f32.mrb[9].mxu1 }
 0x403   : > { %5342 = vmatpush1.bf16.msra.mxu1 %v5341_v43  ;;  %v6636_v33 = vpop.f32.mrb[10].mxu1  ;;  %v993_v43 = vld [vmem:[%s8031_s8 + $0x40] sm:$0xff] }
 0x404   : > { %v1401_v54 = vpop.permute.xlu1 %1400  ;;  %5344 = vmatprep.subr.bf16.mxu1 %v5343_v50  ;;  %v6638_v35 = vpop.f32.mrb[11].mxu1  ;;  %v995_v50 = vld [vmem:[%s8031_s8 + $0x50] sm:$0xff]  ;;  %5291 = vmatprep.mubr.msk.f32.mxu0 %vm859_vm1, %v993_v43 }
 0x405   : > { %v1412_v56 = vsel %vm1406_vm5, %v1401_v54, %v1393_v41  ;;  %v1399_v57 = vpop.permute.xlu0 %1398  ;;  %v1408_v3 = vsel %vm1406_vm5, %v1393_v41, %v1401_v54  ;;  %v6640_v37 = vpop.f32.mrb[12].mxu1  ;;  %v996_v54 = vld [vmem:[%s8031_s8 + $0x58] sm:$0xff] }
 0x406   : > { %v1418_v59 = vmul.f32 %v6556_v52, %v1412_v56  ;;  %v1411_v60 = vsel %vm1406_vm5, %v1399_v57, %v1391_v44  ;;  %v1407_v4 = vsel %vm1406_vm5, %v1391_v44, %v1399_v57  ;;  %v6642_v38 = vpop.f32.mrb[13].mxu1  ;;  %v994_v44 = vld [vmem:[%s8031_s8 + $0x48] sm:$0xff] }
 0x407   : > { %v1416_v62 = vmul.f32 %v6556_v52, %v1411_v60  ;;  %5346 = vmatpush1.bf16.msra.mxu1 %v5345_v58  ;;  %v5353_v6 = vpack.c.bf16 %v1408_v3, %v1407_v4  ;;  %v6644_v39 = vpop.f32.mrb[14].mxu1  ;;  %5292 = vmatmul.mubr.msk.f32.gmra.mrb[12].mxu0 %vm859_vm1, %v994_v44 }
 0x408   : > { %v1397_v63 = vpop.permute.xlu1 %1396  ;;  %5348 = vmatprep.subr.bf16.mxu1 %v5347_v61  ;;  %v6646_v41 = vpop.f32.mrb[15].mxu1  ;;  %5294 = vmatprep.mubr.msk.f32.mxu0 %vm859_vm1, %v995_v50 }
 0x409   : > { %v1395_v0 = vpop.permute.xlu0 %1394  ;;  %v5351_v2 = vpack.c.bf16 %v1418_v59, %v1416_v62 }
 0x40b   : > { %5350 = vmatpush1.bf16.msra.mxu1 %v5349_v1  ;;  %5295 = vmatmul.mubr.msk.f32.gmra.mrb[14].mxu0 %vm859_vm1, %v996_v54 }
 0x40c   : > { %v1405_v5 = vpop.permute.xlu1 %1404  ;;  %5352 = vmatprep.subr.bf16.mxu1 %v5351_v2  ;;  %1805 = vmatprep.mubr.f32.mxu0 %v6059_v55 }
 0x40d   : > { %v1414_v7 = vsel %vm1406_vm5, %v1405_v5, %v1397_v63  ;;  %v1403_v8 = vpop.permute.xlu0 %1402  ;;  %v1410_v11 = vsel %vm1406_vm5, %v1397_v63, %v1405_v5 }
 0x40e   : > { %v1422_v9 = vmul.f32 %v6556_v52, %v1414_v7  ;;  %v1413_v10 = vsel %vm1406_vm5, %v1403_v8, %v1395_v0  ;;  %v1409_v46 = vsel %vm1406_vm5, %v1395_v0, %v1403_v8 }
 0x40f   : > { %v1420_v12 = vmul.f32 %v6556_v52, %v1413_v10  ;;  %5354 = vmatpush1.bf16.msra.mxu1 %v5353_v6  ;;  %v5357_v47 = vpack.c.bf16 %v1410_v11, %v1409_v46 }
 0x411   : > { %v5355_v14 = vpack.c.bf16 %v1422_v9, %v1420_v12 }
 0x413   : > { %5356 = vmatprep.subr.bf16.mxu1 %v5355_v14 }
 0x414   : > { %5358 = vmatpush1.bf16.msra.mxu1 %v5357_v47 }
 0x417   : > { %4919 = vmatmul.mubr.msk.f32.vlgmr.msra.gmra.mrb[16].mxu1 %vm1479_vm6, %v1423_v48 }
 0x418   : > { %1574 = vmatprep.mubr.f32.mxu1 %v6059_v55 }
 0x41b   : > { %4920 = vmatmul.mubr.msk.f32.gmra.mrb[18].mxu1 %vm1479_vm6, %v1424_v16 }
 0x41c   : > { %1580 = vmatprep.mubr.f32.mxu1 %v6059_v55 }
 0x41d   : > { %v1467_v1 = vpop.permute.xlu1 %1466 }
 0x41e   : > { %v1462_v62 = vpop.permute.xlu0 %1461 }
 0x41f   : > { %4921 = vmatmul.mubr.msk.f32.gmra.mrb[20].mxu1 %vm1479_vm6, %v1425_v18 }
 0x420   : > { %1586 = vmatprep.mubr.f32.mxu1 %v6059_v55 }
 0x421   : > { %v1477_v10 = vpop.permute.xlu1 %1476 }
 0x422   : > { %v1472_v3 = vpop.permute.xlu0 %1471 }
 0x423   : > { %4922 = vmatmul.mubr.msk.f32.gmra.mrb[22].mxu1 %vm1479_vm6, %v1426_v19 }
 0x424   : > { %1592 = vmatprep.mubr.f32.mxu1 %v6059_v55 }
 0x426   : > { %v1442_v14 = vpop.permute.xlu0 %1441 }
 0x427   : > { %4923 = vmatmul.mubr.msk.f32.gmra.mrb[24].mxu1 %vm1479_vm6, %v1427_v20 }
 0x428   : > { %1598 = vmatprep.mubr.f32.mxu1 %v6059_v55 }
 0x42b   : > { %4924 = vmatmul.mubr.msk.f32.gmra.mrb[26].mxu1 %vm1479_vm6, %v1428_v21 }
 0x42c   : > { %1604 = vmatprep.mubr.f32.mxu1 %v6059_v55 }
 0x42f   : > { %4925 = vmatmul.mubr.msk.f32.gmra.mrb[28].mxu1 %vm1479_vm6, %v1429_v22  ;;  %v1447_v22 = vpop.permute.xlu1 %1446 }
 0x430   : > { %1610 = vmatprep.mubr.f32.mxu1 %v6059_v55 }
 0x433   : > { %4926 = vmatmul.mubr.msk.f32.gmra.mrb[30].mxu1 %vm1479_vm6, %v1430_v23 }
 0x434   : > { %2102 = vmatprep.mubr.f32.mxu1 %v6059_v55 }
 0x4ea   : > { %v1570_v56 = vpop.f32.mrb[16].mxu1 }
 0x4eb   : > { %v1572_v57 = vpop.f32.mrb[17].mxu1  ;;  %v1571_v48 = vadd.f32 %v1570_v56, %v1442_v14 }
 0x4ec   : > { %v1573_v23 = vadd.f32 %v1572_v57, %v1442_v14 }
 0x4ee   : > { %v1576_v58 = vpop.f32.mrb[18].mxu1 }
 0x4ef   : > { %v1578_v59 = vpop.f32.mrb[19].mxu1  ;;  %v1577_v44 = vadd.f32 %v1576_v58, %v1447_v22  ;;  %v1452_v58 = vpop.permute.xlu0 %1451 }
 0x4f2   : > { %v1582_v60 = vpop.f32.mrb[20].mxu1 }
 0x4f3   : > { %v1584_v61 = vpop.f32.mrb[21].mxu1 }
 0x4f6   : > { %v6665_v63 = vpop.f32.mrb[22].mxu1 }
 0x4f7   : > { %v6667_v0 = vpop.f32.mrb[23].mxu1 }
 0x4fa   : > { %v1594_v2 = vpop.f32.mrb[24].mxu1 }
 0x4fb   : > { %v1595_v4 = vadd.f32 %v1594_v2, %v1462_v62  ;;  %v1596_v5 = vpop.f32.mrb[25].mxu1 }
 0x4fc   : > { %v1597_v6 = vadd.f32 %v1596_v5, %v1462_v62 }
 0x4fd   : > { %v4927_v7 = vmul.f32 -1.442695, %v1595_v4 }
 0x4fe   : > { %v4928_v8 = vmul.f32 -1.442695, %v1597_v6  ;;  %v1600_v9 = vpop.f32.mrb[26].mxu1 }
 0x4ff   : > { %5672 = vpow2.f32 %v4927_v7  ;;  %v1601_v11 = vadd.f32 %v1600_v9, %v1467_v1  ;;  %v1602_v46 = vpop.f32.mrb[27].mxu1 }
 0x500   : > { %5674 = vpow2.f32 %v4928_v8  ;;  %v1603_v12 = vadd.f32 %v1602_v46, %v1467_v1 }
 0x501   : > { %v4929_v47 = vmul.f32 -1.442695, %v1601_v11  ;;  %v1583_v11 = vadd.f32 %v1582_v60, %v1452_v58 }
 0x502   : > { %v4930_v16 = vmul.f32 -1.442695, %v1603_v12  ;;  %v1606_v18 = vpop.f32.mrb[28].mxu1 }
 0x503   : > { %5676 = vpow2.f32 %v4929_v47  ;;  %v1607_v19 = vadd.f32 %v1606_v18, %v1472_v3  ;;  %v1608_v20 = vpop.f32.mrb[29].mxu1 }
 0x504   : > { %5678 = vpow2.f32 %v4930_v16  ;;  %v1609_v21 = vadd.f32 %v1608_v20, %v1472_v3  ;;  %v1579_v3 = vadd.f32 %v1578_v59, %v1447_v22  ;;  %v1457_v16 = vpop.permute.xlu1 %1456 }
 0x505   : > { %v4931_v43 = vmul.f32 -1.442695, %v1607_v19  ;;  %5680 = vtanh.f32 %v1571_v48  ;;  %v1589_v19 = vadd.f32 %v6665_v63, %v1457_v16 }
 0x506   : > { %v4932_v50 = vmul.f32 -1.442695, %v1609_v21  ;;  %v1612_v54 = vpop.f32.mrb[30].mxu1 }
 0x507   : > { %5682 = vpow2.f32 %v4931_v43  ;;  %v1613_v62 = vadd.f32 %v1612_v54, %v1477_v10  ;;  %v1614_v1 = vpop.f32.mrb[31].mxu1 }
 0x508   : > { %5684 = vpow2.f32 %v4932_v50  ;;  %v1615_v2 = vadd.f32 %v1614_v1, %v1477_v10  ;;  %v1585_v10 = vadd.f32 %v1584_v61, %v1452_v58  ;;  %v1591_v61 = vadd.f32 %v6667_v0, %v1457_v16  ;;  %v1681_v16 = vld [vmem:[%s8035_s12] sm:$0xff] }
 0x509   : > { %v5673_v56 = vpop.eup %5672  ;;  %5686 = vtanh.f32 %v1573_v23  ;;  %v4933_v4 = vmul.f32 -1.442695, %v1613_v62 }
 0x50a   : > { %v5675_v5 = vpop.eup %5674  ;;  %5688 = vtanh.f32 %v1577_v44  ;;  %v1649_v6 = vadd.f32 1.0, %v5673_v56  ;;  %v4934_v7 = vmul.f32 -1.442695, %v1615_v2 }
 0x50b   : > { %v1650_v8 = vadd.f32 1.0, %v5675_v5  ;;  %5690 = vpow2.f32 %v4933_v4 }
 0x50c   : > { %5692 = vrcp.f32 %v1649_v6 }
 0x50d   : > { %v5677_v57 = vpop.eup %5676  ;;  %5694 = vrcp.f32 %v1650_v8 }
 0x50e   : > { %v5679_v9 = vpop.eup %5678  ;;  %v1651_v46 = vadd.f32 1.0, %v5677_v57  ;;  %5696 = vpow2.f32 %v4934_v7 }
 0x50f   : > { %5698 = vtanh.f32 %v1579_v3  ;;  %v1652_v12 = vadd.f32 1.0, %v5679_v9  ;;  %v5681_v14 = vpop.eup %5680 }
 0x510   : > { %5700 = vrcp.f32 %v1651_v46 }
 0x511   : > { %v5683_v47 = vpop.eup %5682  ;;  %5702 = vrcp.f32 %v1652_v12 }
 0x512   : > { %v5685_v48 = vpop.eup %5684  ;;  %5704 = vtanh.f32 %v1583_v11  ;;  %v1653_v59 = vadd.f32 1.0, %v5683_v47 }
 0x513   : > { %v5687_v18 = vpop.eup %5686  ;;  %5706 = vtanh.f32 %v1585_v10  ;;  %v1654_v20 = vadd.f32 1.0, %v5685_v48 }
 0x514   : > { %v5689_v21 = vpop.eup %5688  ;;  %5708 = vrcp.f32 %v1653_v59  ;;  %v1682_v59 = vld [vmem:[%s8035_s12 + $0x8] sm:$0xff] }
 0x515   : > { %v5691_v60 = vpop.eup %5690  ;;  %5710 = vrcp.f32 %v1654_v20  ;;  %v6691_v20 = vpop.f32.mrb[12].mxu0 }
 0x516   : > { %v5693_v22 = vpop.eup %5692  ;;  %v1655_v23 = vadd.f32 1.0, %v5691_v60  ;;  %5712 = vtanh.f32 %v1589_v19  ;;  %v1684_v19 = vld [vmem:[%s8035_s12 + $0x18] sm:$0xff] }
 0x517   : > { %v5695_v43 = vpop.eup %5694  ;;  %v1673_v44 = vmul.f32 %v5693_v22, %v5681_v14 }
 0x518   : > { %v5697_v50 = vpop.eup %5696  ;;  %5714 = vrcp.f32 %v1655_v23  ;;  %v1674_v54 = vmul.f32 %v5695_v43, %v5687_v18  ;;  %v1683_v18 = vld [vmem:[%s8035_s12 + $0x10] sm:$0xff]  ;;  %v1701_v23 = vpop.permute.xlu1 %1700 }
 0x519   : > { %v5699_v62 = vpop.eup %5698  ;;  %v1656_v1 = vadd.f32 1.0, %v5697_v50  ;;  %5716 = vtanh.f32 %v1591_v61  ;;  %v1696_v61 = vpop.permute.xlu0 %1695 }
 0x51a   : > { %v5701_v2 = vpop.eup %5700 }
 0x51b   : > { %v5703_v63 = vpop.eup %5702  ;;  %5718 = vrcp.f32 %v1656_v1  ;;  %v1675_v56 = vmul.f32 %v5701_v2, %v5689_v21  ;;  %v6693_v21 = vpop.f32.mrb[13].mxu0 }
 0x51c   : > { %v5705_v4 = vpop.eup %5704  ;;  %v1676_v5 = vmul.f32 %v5703_v63, %v5699_v62  ;;  %v6695_v60 = vpop.f32.mrb[14].mxu0 }
 0x51d   : > { %v5707_v6 = vpop.eup %5706  ;;  %v5361_v7 = vpack.c.bf16 %v1675_v56, %v1673_v44  ;;  %v6697_v22 = vpop.f32.mrb[15].mxu0 }
 0x51e   : > { %v5709_v3 = vpop.eup %5708  ;;  %v5359_v0 = vpack.c.bf16 %v1676_v5, %v1674_v54  ;;  %v1706_v43 = vpop.permute.xlu0 %1705 }
 0x51f   : > { %v5711_v8 = vpop.eup %5710  ;;  %v1677_v57 = vmul.f32 %v5709_v3, %v5705_v4  ;;  %v1711_v2 = vpop.permute.xlu1 %1710 }
 0x520   : > { %5360 = vmatprep.subr.bf16.mxu0 %v5359_v0  ;;  %v1678_v58 = vmul.f32 %v5711_v8, %v5707_v6  ;;  %v5713_v9 = vpop.eup %5712 }
 0x521   : > { %5362 = vmatpush1.bf16.msra.mxu0 %v5361_v7 }
 0x522   : > { %v5715_v11 = vpop.eup %5714  ;;  %v1865_v7 = vpop.permute.xlu0 %1864 }
 0x523   : > { %v1679_v46 = vmul.f32 %v5715_v11, %v5713_v9  ;;  %v5717_v10 = vpop.eup %5716 }
 0x525   : > { %v5719_v12 = vpop.eup %5718  ;;  %v5365_v14 = vpack.c.bf16 %v1679_v46, %v1677_v57 }
 0x526   : > { %v1680_v47 = vmul.f32 %v5719_v12, %v5717_v10 }
 0x528   : > { %v5363_v48 = vpack.c.bf16 %v1680_v47, %v1678_v58 }
 0x52a   : > { %5364 = vmatprep.subr.bf16.mxu0 %v5363_v48 }
 0x52b   : > { %5366 = vmatpush1.bf16.msra.mxu0 %v5365_v14 }
 0x52e   : > { %4935 = vmatmul.mubr.msk.f32.vlgmr.msra.gmra.mrb[16].mxu0 %vm859_vm1, %v1681_v16 }
 0x52f   : > { %1811 = vmatprep.mubr.f32.mxu0 %v6059_v55 }
 0x532   : > { %4936 = vmatmul.mubr.msk.f32.gmra.mrb[18].mxu0 %vm859_vm1, %v1682_v59 }
 0x533   : > { %1817 = vmatprep.mubr.f32.mxu0 %v6059_v55 }
 0x536   : > { %4937 = vmatmul.mubr.msk.f32.gmra.mrb[20].mxu0 %vm859_vm1, %v1683_v18 }
 0x537   : > { %1823 = vmatprep.mubr.f32.mxu0 %v6059_v55 }
 0x53a   : > { %4938 = vmatmul.mubr.msk.f32.gmra.mrb[22].mxu0 %vm859_vm1, %v1684_v19  ;;  %v1875_v19 = vpop.permute.xlu0 %1874 }
 0x53b   : > { %1829 = vmatprep.mubr.f32.mxu0 %v6059_v55 }
 0x601   : > { %v1807_v44 = vpop.f32.mrb[16].mxu0 }
 0x602   : > { %v1808_v50 = vadd.f32 %v1807_v44, %v1696_v61  ;;  %v1809_v54 = vpop.f32.mrb[17].mxu0 }
 0x603   : > { %v1810_v62 = vadd.f32 %v1809_v54, %v1696_v61 }
 0x604   : > { %v1842_v1 = vadd.f32 %v1808_v50, %v6381_v17 }
 0x605   : > { %v1843_v63 = vadd.f32 %v1810_v62, %v6392_v26  ;;  %v1813_v56 = vpop.f32.mrb[18].mxu0  ;;  %v1870_v26 = vpop.permute.xlu1 %1869 }
 0x606   : > { %v1850_v4 = vmul.f32 0.70710677, %v1842_v1  ;;  %v1814_v5 = vadd.f32 %v1813_v56, %v1701_v23  ;;  %v1815_v6 = vpop.f32.mrb[19].mxu0  ;;  %v4955_v56 = vld [vmem:[%s8034_s11 + $0x70] sm:$0xff] }
 0x607   : > { %v1816_v3 = vadd.f32 %v1815_v6, %v1701_v23  ;;  %v1851_v8 = vmul.f32 0.70710677, %v1843_v63  ;;  %v4954_v63 = vld [vmem:[%s8034_s11 + $0x68] sm:$0xff] }
 0x608   : > { %v6701_v0 = vadd.f32 %v1865_v7, %v1850_v4  ;;  %v1844_v57 = vadd.f32 %v1814_v5, %v6379_v15  ;;  %v4956_v4 = vld [vmem:[%s8034_s11 + $0x78] sm:$0xff]  ;;  %v4949_v5 = vld [vmem:[%s8034_s11 + $0x40] sm:$0xff]  ;;  %v4950_v6 = vld [vmem:[%s8034_s11 + $0x48] sm:$0xff] }
 0x609   : > { %v1845_v58 = vadd.f32 %v1816_v3, %v6387_v24  ;;  %v1819_v9 = vpop.f32.mrb[20].mxu0  ;;  %v6707_v12 = vadd.f32 %v1865_v7, %v1851_v8  ;;  %v1880_v54 = vpop.permute.xlu1 %1879  ;;  %v4951_v7 = vld [vmem:[%s8034_s11 + $0x50] sm:$0xff]  ;;  %v4952_v3 = vld [vmem:[%s8034_s11 + $0x58] sm:$0xff] }
 0x60a   : > { %v1852_v11 = vmul.f32 0.70710677, %v1844_v57  ;;  %v1820_v46 = vadd.f32 %v1819_v9, %v1706_v43  ;;  %v1821_v17 = vpop.f32.mrb[21].mxu0  ;;  %1890 = vrot.lane.b32.xlu0 %v6701_v0, %s8053_s29  ;;  %v4979_v8 = vld [vmem:[%s8036_s13 + $0x30] sm:$0xff]  ;;  %v4980_v57 = vld [vmem:[%s8036_s13 + $0x38] sm:$0xff]  ;;  %v1017_v9 = vld [vmem:[%s8032_s9 + $0x40] sm:$0xff] }
 0x60b   : > { %v1822_v10 = vadd.f32 %v1821_v17, %v1706_v43  ;;  %v1853_v47 = vmul.f32 0.70710677, %v1845_v58  ;;  %v4981_v58 = vld [vmem:[%s8036_s13 + $0x40] sm:$0xff]  ;;  %v1018_v17 = vld [vmem:[%s8032_s9 + $0x48] sm:$0xff] }
 0x60c   : > { %v6709_v14 = vadd.f32 %v1870_v26, %v1852_v11  ;;  %v1846_v48 = vadd.f32 %v1820_v46, %v6408_v36  ;;  %v4982_v11 = vld [vmem:[%s8036_s13 + $0x48] sm:$0xff]  ;;  %v1212_v46 = vadd.f32 %v6693_v21, %v1017_v9 }
 0x60d   : > { %v1847_v15 = vadd.f32 %v1822_v10, %v6424_v42  ;;  %v1825_v24 = vpop.f32.mrb[22].mxu0  ;;  %v6717_v23 = vadd.f32 %v1870_v26, %v1853_v47  ;;  %v1019_v26 = vld [vmem:[%s8032_s9 + $0x50] sm:$0xff]  ;;  %v1217_v10 = vadd.f32 %v6691_v20, %v1018_v17  ;;  %v6810_v20 = vsel %vm1305_vm7, 1.0, %v6059_v55 }
 0x60e   : > { %v1854_v16 = vmul.f32 0.70710677, %v1846_v48  ;;  %v1826_v59 = vadd.f32 %v1825_v24, %v1711_v2  ;;  %v1827_v18 = vpop.f32.mrb[23].mxu0  ;;  %1892 = vrot.lane.b32.xlu1 %v6709_v14, %s8053_s29  ;;  %1898 = vrot.lane.b32.xlu0 %v6707_v12, %s8053_s29  ;;  %v1222_v47 = vadd.f32 %v6697_v22, %v1019_v26  ;;  %v1020_v48 = vld [vmem:[%s8032_s9 + $0x58] sm:$0xff] }
 0x60f   : > { %v1828_v61 = vadd.f32 %v1827_v18, %v1711_v2  ;;  %v1855_v44 = vmul.f32 0.70710677, %v1847_v15  ;;  %v1227_v21 = vadd.f32 %v6695_v60, %v1020_v48 }
 0x610   : > { %v6719_v43 = vadd.f32 %v1875_v19, %v1854_v16  ;;  %v1848_v36 = vadd.f32 %v1826_v59, %v6403_v34 }
 0x611   : > { %v1849_v42 = vadd.f32 %v1828_v61, %v6419_v40  ;;  %v6727_v62 = vadd.f32 %v1875_v19, %v1855_v44  ;;  %v4953_v40 = vld [vmem:[%s8034_s11 + $0x60] sm:$0xff] }
 0x612   : > { %v1856_v50 = vmul.f32 0.70710677, %v1848_v36  ;;  %1900 = vrot.lane.b32.xlu1 %v6717_v23, %s8053_s29  ;;  %1894 = vrot.lane.b32.xlu0 %v6719_v43, %s8053_s29 }
 0x613   : > { %v1857_v2 = vmul.f32 0.70710677, %v1849_v42 }
 0x614   : > { %v6729_v1 = vadd.f32 %v1880_v54, %v1856_v50 }
 0x615   : > { %v6735_v34 = vadd.f32 %v1880_v54, %v1857_v2 }
 0x616   : > { %1896 = vrot.lane.b32.xlu1 %v6729_v1, %s8053_s29  ;;  %1902 = vrot.lane.b32.xlu0 %v6727_v62, %s8053_s29 }
 0x61a   : > { %1904 = vrot.lane.b32.xlu1 %v6735_v34, %s8053_s29  ;;  %1923 = vrot.lane.b32.xlu0 %v6701_v0, %s8051_s2  ;;  %s8057_s29 = smov 4  }
 0x61e   : > { %1925 = vrot.lane.b32.xlu1 %v6709_v14, %s8051_s2  ;;  %1931 = vrot.lane.b32.xlu0 %v6707_v12, %s8051_s2 }
 0x622   : > { %1933 = vrot.lane.b32.xlu1 %v6717_v23, %s8051_s2  ;;  %1927 = vrot.lane.b32.xlu0 %v6719_v43, %s8051_s2 }
 0x626   : > { %1929 = vrot.lane.b32.xlu1 %v6729_v1, %s8051_s2  ;;  %1935 = vrot.lane.b32.xlu0 %v6727_v62, %s8051_s2 }
 0x62a   : > { %1937 = vrot.lane.b32.xlu1 %v6735_v34, %s8051_s2  ;;  %1996 = vperm.xlu0 %5638, %v4953_v40   ;;  %s8055_s2 = smov 124  }
 0x62e   : > { %2001 = vperm.xlu1 %5639, %v4954_v63   ;;  %2006 = vperm.xlu0 %5638, %v4955_v56  }
 0x632   : > { %2011 = vperm.xlu1 %5639, %v4956_v4   ;;  %1976 = vperm.xlu0 %5638, %v4949_v5  }
 0x636   : > { %1981 = vperm.xlu1 %5639, %v4950_v6   ;;  %1986 = vperm.xlu0 %5638, %v4951_v7  }
 0x63a   : > { %1991 = vperm.xlu1 %5639, %v4952_v3   ;;  %2231 = vperm.xlu0 %5638, %v4979_v8  }
 0x63e   : > { %2236 = vperm.xlu1 %5639, %v4980_v57   ;;  %2241 = vperm.xlu0 %5638, %v4981_v58  }
 0x642   : > { %2246 = vperm.xlu1 %5639, %v4982_v11   ;;  %2400 = vperm.xlu0 %5638, %v1212_v46   ;;  %v5375_v11 = vpack.c.bf16 %v6717_v23, %v6707_v12  ;;  %v6837_v46 = vsel %vm1312_vm9, 1.0, %v6059_v55 }
 0x646   : > { %2405 = vperm.xlu1 %5639, %v1217_v10   ;;  %2410 = vperm.xlu0 %5638, %v1222_v47   ;;  %v5377_v47 = vpack.c.bf16 %v6709_v14, %v6701_v0 }
 0x64a   : > { %2415 = vperm.xlu1 %5639, %v1227_v21   ;;  %v5379_v21 = vpack.c.bf16 %v6735_v34, %v6727_v62 }
 0x67c   : > { %v1891_v15 = vpop.permute.xlu0 %1890 }
 0x680   : > { %v1893_v24 = vpop.permute.xlu1 %1892  ;;  %v1899_v16 = vpop.permute.xlu0 %1898 }
 0x681   : > { %v1911_v22 = vsel %vm1906_vm8, %v1899_v16, %v1891_v15  ;;  %v1907_v19 = vsel %vm1906_vm8, %v1891_v15, %v1899_v16 }
 0x682   : > { %v1915_v44 = vmul.f32 %v6810_v20, %v1911_v22 }
 0x684   : > { %v1901_v59 = vpop.permute.xlu1 %1900  ;;  %v1895_v18 = vpop.permute.xlu0 %1894 }
 0x685   : > { %v1908_v60 = vsel %vm1906_vm8, %v1893_v24, %v1901_v59  ;;  %v1912_v61 = vsel %vm1906_vm8, %v1901_v59, %v1893_v24  ;;  %v5381_v59 = vpack.c.bf16 %v6729_v1, %v6719_v43 }
 0x686   : > { %v1917_v36 = vmul.f32 %v6810_v20, %v1912_v61  ;;  %v5367_v42 = vpack.c.bf16 %v1908_v60, %v1907_v19 }
 0x688   : > { %v5369_v50 = vpack.c.bf16 %v1917_v36, %v1915_v44  ;;  %v1897_v54 = vpop.permute.xlu1 %1896  ;;  %5368 = vmatprep.subr.bf16.mxu1 %v5367_v42  ;;  %v1903_v2 = vpop.permute.xlu0 %1902 }
 0x689   : > { %v1913_v40 = vsel %vm1906_vm8, %v1903_v2, %v1895_v18  ;;  %v1909_v4 = vsel %vm1906_vm8, %v1895_v18, %v1903_v2 }
 0x68a   : > { %5370 = vmatpush1.bf16.msra.mxu1 %v5369_v50  ;;  %v1919_v7 = vmul.f32 %v6810_v20, %v1913_v40 }
 0x68c   : > { %v1905_v63 = vpop.permute.xlu1 %1904  ;;  %v1924_v56 = vpop.permute.xlu0 %1923 }
 0x68d   : > { %v1910_v5 = vsel %vm1906_vm8, %v1897_v54, %v1905_v63  ;;  %v1914_v6 = vsel %vm1906_vm8, %v1905_v63, %v1897_v54 }
 0x68e   : > { %v1921_v3 = vmul.f32 %v6810_v20, %v1914_v6  ;;  %v5371_v8 = vpack.c.bf16 %v1910_v5, %v1909_v4  ;;  %v4941_v4 = vld [vmem:[%s8033_s10 + $0x40] sm:$0xff]  ;;  %v4942_v5 = vld [vmem:[%s8033_s10 + $0x48] sm:$0xff]  ;;  %v4943_v6 = vld [vmem:[%s8033_s10 + $0x50] sm:$0xff] }
 0x690   : > { %v5373_v57 = vpack.c.bf16 %v1921_v3, %v1919_v7  ;;  %v1926_v58 = vpop.permute.xlu1 %1925  ;;  %5372 = vmatprep.subr.bf16.mxu1 %v5371_v8  ;;  %v1932_v9 = vpop.permute.xlu0 %1931  ;;  %v4944_v7 = vld [vmem:[%s8033_s10 + $0x58] sm:$0xff]  ;;  %v4945_v3 = vld [vmem:[%s8033_s10 + $0x60] sm:$0xff]  ;;  %v4946_v8 = vld [vmem:[%s8033_s10 + $0x68] sm:$0xff] }
 0x691   : > { %v1944_v17 = vsel %vm1939_vm10, %v1932_v9, %v1924_v56  ;;  %v1940_v60 = vsel %vm1939_vm10, %v1924_v56, %v1932_v9  ;;  %v1685_v9 = vld [vmem:[%s8035_s12 + $0x20] sm:$0xff] }
 0x692   : > { %5374 = vmatpush1.bf16.msra.mxu1 %v5373_v57  ;;  %v1949_v15 = vmul.f32 %v6837_v46, %v1944_v17  ;;  %v4947_v57 = vld [vmem:[%s8033_s10 + $0x70] sm:$0xff]  ;;  %4939 = vmatmul.mubr.msk.f32.gmra.mrb[24].mxu0 %vm859_vm1, %v1685_v9 }
 0x693   : > { %5376 = vmatprep.subr.bf16.mxu1 %v5375_v11  ;;  %1835 = vmatprep.mubr.f32.mxu0 %v6059_v55  ;;  %v1686_v11 = vld [vmem:[%s8035_s12 + $0x28] sm:$0xff] }
 0x694   : > { %v1934_v26 = vpop.permute.xlu1 %1933  ;;  %v1928_v10 = vpop.permute.xlu0 %1927 }
 0x695   : > { %v1945_v48 = vsel %vm1939_vm10, %v1934_v26, %v1926_v58  ;;  %v1941_v19 = vsel %vm1939_vm10, %v1926_v58, %v1934_v26  ;;  %v4948_v58 = vld [vmem:[%s8033_s10 + $0x78] sm:$0xff] }
 0x696   : > { %v1951_v24 = vmul.f32 %v6837_v46, %v1945_v48  ;;  %5378 = vmatpush1.bf16.msra.mxu1 %v5377_v47  ;;  %v5385_v44 = vpack.c.bf16 %v1941_v19, %v1940_v60  ;;  %4940 = vmatmul.mubr.msk.f32.gmra.mrb[26].mxu0 %vm859_vm1, %v1686_v11 }
 0x697   : > { %5380 = vmatprep.subr.bf16.mxu1 %v5379_v21  ;;  %2341 = vmatprep.mubr.f32.mxu0 %v6059_v55 }
 0x698   : > { %v1930_v16 = vpop.permute.xlu1 %1929  ;;  %v1936_v22 = vpop.permute.xlu0 %1935  ;;  %v5383_v18 = vpack.c.bf16 %v1951_v24, %v1949_v15 }
 0x699   : > { %v1946_v61 = vsel %vm1939_vm10, %v1936_v22, %v1928_v10  ;;  %v1942_v40 = vsel %vm1939_vm10, %v1928_v10, %v1936_v22 }
 0x69a   : > { %5382 = vmatpush1.bf16.msra.mxu1 %v5381_v59  ;;  %v1953_v50 = vmul.f32 %v6837_v46, %v1946_v61 }
 0x69b   : > { %5384 = vmatprep.subr.bf16.mxu1 %v5383_v18 }
 0x69c   : > { %v1938_v36 = vpop.permute.xlu1 %1937 }
 0x69d   : > { %v1947_v42 = vsel %vm1939_vm10, %v1938_v36, %v1930_v16  ;;  %v1943_v54 = vsel %vm1939_vm10, %v1930_v16, %v1938_v36 }
 0x69e   : > { %v1955_v2 = vmul.f32 %v6837_v46, %v1947_v42  ;;  %5386 = vmatpush1.bf16.msra.mxu1 %v5385_v44  ;;  %v5389_v56 = vpack.c.bf16 %v1943_v54, %v1942_v40 }
 0x6a0   : > { %v5387_v63 = vpack.c.bf16 %v1955_v2, %v1953_v50 }
 0x6a2   : > { %5388 = vmatprep.subr.bf16.mxu1 %v5387_v63 }
 0x6a3   : > { %5390 = vmatpush1.bf16.msra.mxu1 %v5389_v56 }
 0x6a6   : > { %4957 = vmatmul.mubr.msk.f32.vlgmr.msra.gmra.mrb[32].mxu1 %vm1479_vm6, %v4941_v4 }
 0x6a7   : > { %2108 = vmatprep.mubr.f32.mxu1 %v6059_v55 }
 0x6a9   : > { %v1997_v15 = vpop.permute.xlu0 %1996 }
 0x6aa   : > { %4958 = vmatmul.mubr.msk.f32.gmra.mrb[34].mxu1 %vm1479_vm6, %v4942_v5 }
 0x6ab   : > { %2114 = vmatprep.mubr.f32.mxu1 %v6059_v55 }
 0x6ad   : > { %v2002_v22 = vpop.permute.xlu1 %2001  ;;  %v2007_v18 = vpop.permute.xlu0 %2006 }
 0x6ae   : > { %4959 = vmatmul.mubr.msk.f32.gmra.mrb[36].mxu1 %vm1479_vm6, %v4943_v6 }
 0x6af   : > { %2120 = vmatprep.mubr.f32.mxu1 %v6059_v55 }
 0x6b1   : > { %v2012_v50 = vpop.permute.xlu1 %2011  ;;  %v1977_v63 = vpop.permute.xlu0 %1976 }
 0x6b2   : > { %4960 = vmatmul.mubr.msk.f32.gmra.mrb[38].mxu1 %vm1479_vm6, %v4944_v7 }
 0x6b3   : > { %2126 = vmatprep.mubr.f32.mxu1 %v6059_v55 }
 0x6b6   : > { %4961 = vmatmul.mubr.msk.f32.gmra.mrb[40].mxu1 %vm1479_vm6, %v4945_v3 }
 0x6b7   : > { %2132 = vmatprep.mubr.f32.mxu1 %v6059_v55 }
 0x6ba   : > { %4962 = vmatmul.mubr.msk.f32.gmra.mrb[42].mxu1 %vm1479_vm6, %v4946_v8 }
 0x6bb   : > { %2138 = vmatprep.mubr.f32.mxu1 %v6059_v55 }
 0x6be   : > { %4963 = vmatmul.mubr.msk.f32.gmra.mrb[44].mxu1 %vm1479_vm6, %v4947_v57  ;;  %v1982_v57 = vpop.permute.xlu1 %1981 }
 0x6bf   : > { %2144 = vmatprep.mubr.f32.mxu1 %v6059_v55 }
 0x6c2   : > { %4964 = vmatmul.mubr.msk.f32.gmra.mrb[46].mxu1 %vm1479_vm6, %v4948_v58 }
 0x6c3   : > { %2638 = vmatprep.mubr.f32.mxu1 %v6059_v55 }
 0x779   : > { %v2104_v17 = vpop.f32.mrb[32].mxu1 }
 0x77a   : > { %v2106_v26 = vpop.f32.mrb[33].mxu1  ;;  %v2105_v4 = vadd.f32 %v2104_v17, %v1977_v63 }
 0x77b   : > { %v2107_v58 = vadd.f32 %v2106_v26, %v1977_v63 }
 0x77d   : > { %v2110_v10 = vpop.f32.mrb[34].mxu1 }
 0x77e   : > { %v2112_v47 = vpop.f32.mrb[35].mxu1  ;;  %v2111_v11 = vadd.f32 %v2110_v10, %v1982_v57  ;;  %v1987_v10 = vpop.permute.xlu0 %1986 }
 0x781   : > { %v2116_v48 = vpop.f32.mrb[36].mxu1 }
 0x782   : > { %v2118_v21 = vpop.f32.mrb[37].mxu1 }
 0x785   : > { %v6915_v24 = vpop.f32.mrb[38].mxu1 }
 0x786   : > { %v6917_v16 = vpop.f32.mrb[39].mxu1 }
 0x789   : > { %v2128_v59 = vpop.f32.mrb[40].mxu1 }
 0x78a   : > { %v2129_v19 = vadd.f32 %v2128_v59, %v1997_v15  ;;  %v2130_v60 = vpop.f32.mrb[41].mxu1 }
 0x78b   : > { %v2131_v61 = vadd.f32 %v2130_v60, %v1997_v15 }
 0x78c   : > { %v4965_v44 = vmul.f32 -1.442695, %v2129_v19 }
 0x78d   : > { %v4966_v36 = vmul.f32 -1.442695, %v2131_v61  ;;  %v2134_v42 = vpop.f32.mrb[42].mxu1 }
 0x78e   : > { %5720 = vpow2.f32 %v4965_v44  ;;  %v2135_v54 = vadd.f32 %v2134_v42, %v2002_v22  ;;  %v2136_v2 = vpop.f32.mrb[43].mxu1 }
 0x78f   : > { %5722 = vpow2.f32 %v4966_v36  ;;  %v2137_v40 = vadd.f32 %v2136_v2, %v2002_v22 }
 0x790   : > { %v4967_v56 = vmul.f32 -1.442695, %v2135_v54 }
 0x791   : > { %v4968_v5 = vmul.f32 -1.442695, %v2137_v40  ;;  %v2140_v6 = vpop.f32.mrb[44].mxu1  ;;  %v2117_v40 = vadd.f32 %v2116_v48, %v1987_v10 }
 0x792   : > { %5724 = vpow2.f32 %v4967_v56  ;;  %v2141_v7 = vadd.f32 %v2140_v6, %v2007_v18  ;;  %v2142_v3 = vpop.f32.mrb[45].mxu1 }
 0x793   : > { %5726 = vpow2.f32 %v4968_v5  ;;  %v2143_v8 = vadd.f32 %v2142_v3, %v2007_v18  ;;  %v2113_v18 = vadd.f32 %v2112_v47, %v1982_v57 }
 0x794   : > { %v4969_v9 = vmul.f32 -1.442695, %v2141_v7  ;;  %5728 = vtanh.f32 %v2105_v4  ;;  %v1992_v7 = vpop.permute.xlu1 %1991 }
 0x795   : > { %v4970_v15 = vmul.f32 -1.442695, %v2143_v8  ;;  %v2146_v59 = vpop.f32.mrb[46].mxu1  ;;  %v2123_v8 = vadd.f32 %v6915_v24, %v1992_v7 }
 0x796   : > { %5730 = vpow2.f32 %v4969_v9  ;;  %v2147_v19 = vadd.f32 %v2146_v59, %v2012_v50  ;;  %v2148_v22 = vpop.f32.mrb[47].mxu1 }
 0x797   : > { %5732 = vpow2.f32 %v4970_v15  ;;  %v2149_v60 = vadd.f32 %v2148_v22, %v2012_v50  ;;  %v2119_v50 = vadd.f32 %v2118_v21, %v1987_v10  ;;  %v2125_v21 = vadd.f32 %v6917_v16, %v1992_v7 }
 0x798   : > { %v5721_v17 = vpop.eup %5720  ;;  %5734 = vtanh.f32 %v2107_v58  ;;  %v4971_v61 = vmul.f32 -1.442695, %v2147_v19 }
 0x799   : > { %v5723_v44 = vpop.eup %5722  ;;  %5736 = vtanh.f32 %v2111_v11  ;;  %v2183_v36 = vadd.f32 1.0, %v5721_v17  ;;  %v4972_v42 = vmul.f32 -1.442695, %v2149_v60 }
 0x79a   : > { %v2184_v54 = vadd.f32 1.0, %v5723_v44  ;;  %5738 = vpow2.f32 %v4971_v61 }
 0x79b   : > { %5740 = vrcp.f32 %v2183_v36 }
 0x79c   : > { %v5725_v26 = vpop.eup %5724  ;;  %5742 = vrcp.f32 %v2184_v54 }
 0x79d   : > { %v5727_v2 = vpop.eup %5726  ;;  %v2185_v63 = vadd.f32 1.0, %v5725_v26  ;;  %5744 = vpow2.f32 %v4972_v42 }
 0x79e   : > { %5746 = vtanh.f32 %v2113_v18  ;;  %v2186_v56 = vadd.f32 1.0, %v5727_v2  ;;  %v5729_v4 = vpop.eup %5728 }
 0x79f   : > { %5748 = vrcp.f32 %v2185_v63 }
 0x7a0   : > { %v5731_v5 = vpop.eup %5730  ;;  %5750 = vrcp.f32 %v2186_v56 }
 0x7a1   : > { %v5733_v6 = vpop.eup %5732  ;;  %5752 = vtanh.f32 %v2117_v40  ;;  %v2187_v47 = vadd.f32 1.0, %v5731_v5 }
 0x7a2   : > { %v5735_v3 = vpop.eup %5734  ;;  %5754 = vtanh.f32 %v2119_v50  ;;  %v2188_v57 = vadd.f32 1.0, %v5733_v6 }
 0x7a3   : > { %v5737_v58 = vpop.eup %5736  ;;  %5756 = vrcp.f32 %v2187_v47 }
 0x7a4   : > { %v5739_v48 = vpop.eup %5738  ;;  %5758 = vrcp.f32 %v2188_v57  ;;  %v4975_v57 = vld [vmem:[%s8035_s12 + $0x40] sm:$0xff] }
 0x7a5   : > { %v5741_v9 = vpop.eup %5740  ;;  %v2189_v11 = vadd.f32 1.0, %v5739_v48  ;;  %5760 = vtanh.f32 %v2123_v8  ;;  %v4974_v8 = vld [vmem:[%s8035_s12 + $0x38] sm:$0xff]  ;;  %v2232_v48 = vpop.permute.xlu0 %2231 }
 0x7a6   : > { %v5743_v15 = vpop.eup %5742  ;;  %v2207_v59 = vmul.f32 %v5741_v9, %v5729_v4  ;;  %v2237_v9 = vpop.permute.xlu1 %2236 }
 0x7a7   : > { %v5745_v19 = vpop.eup %5744  ;;  %5762 = vrcp.f32 %v2189_v11  ;;  %v2208_v22 = vmul.f32 %v5743_v15, %v5735_v3  ;;  %v4973_v3 = vld [vmem:[%s8035_s12 + $0x30] sm:$0xff] }
 0x7a8   : > { %v5747_v60 = vpop.eup %5746  ;;  %v2190_v17 = vadd.f32 1.0, %v5745_v19  ;;  %5764 = vtanh.f32 %v2125_v21 }
 0x7a9   : > { %v5749_v61 = vpop.eup %5748  ;;  %v2242_v21 = vpop.permute.xlu0 %2241 }
 0x7aa   : > { %v5751_v24 = vpop.eup %5750  ;;  %5766 = vrcp.f32 %v2190_v17  ;;  %v2209_v44 = vmul.f32 %v5749_v61, %v5737_v58  ;;  %v4976_v58 = vld [vmem:[%s8035_s12 + $0x48] sm:$0xff] }
 0x7ab   : > { %v5753_v36 = vpop.eup %5752  ;;  %v2210_v42 = vmul.f32 %v5751_v24, %v5747_v60  ;;  %v2247_v60 = vpop.permute.xlu1 %2246 }
 0x7ac   : > { %v5755_v18 = vpop.eup %5754  ;;  %v5393_v54 = vpack.c.bf16 %v2209_v44, %v2207_v59 }
 0x7ad   : > { %v5757_v26 = vpop.eup %5756  ;;  %v5391_v16 = vpack.c.bf16 %v2210_v42, %v2208_v22  ;;  %v2401_v42 = vpop.permute.xlu0 %2400 }
 0x7ae   : > { %v5759_v10 = vpop.eup %5758  ;;  %v2211_v2 = vmul.f32 %v5757_v26, %v5753_v36 }
 0x7af   : > { %5392 = vmatprep.subr.bf16.mxu0 %v5391_v16  ;;  %v2212_v40 = vmul.f32 %v5759_v10, %v5755_v18  ;;  %v5761_v63 = vpop.eup %5760 }
 0x7b0   : > { %5394 = vmatpush1.bf16.msra.mxu0 %v5393_v54 }
 0x7b1   : > { %v5763_v50 = vpop.eup %5762 }
 0x7b2   : > { %v2213_v56 = vmul.f32 %v5763_v50, %v5761_v63  ;;  %v5765_v4 = vpop.eup %5764 }
 0x7b4   : > { %v5767_v5 = vpop.eup %5766  ;;  %v5397_v6 = vpack.c.bf16 %v2213_v56, %v2211_v2 }
 0x7b5   : > { %v2214_v7 = vmul.f32 %v5767_v5, %v5765_v4 }
 0x7b7   : > { %v5395_v47 = vpack.c.bf16 %v2214_v7, %v2212_v40 }
 0x7b9   : > { %5396 = vmatprep.subr.bf16.mxu0 %v5395_v47 }
 0x7ba   : > { %5398 = vmatpush1.bf16.msra.mxu0 %v5397_v6 }
 0x7bd   : > { %4985 = vmatmul.mubr.msk.f32.vlgmr.msra.gmra.mrb[28].mxu0 %vm859_vm1, %v4973_v3 }
 0x7be   : > { %2347 = vmatprep.mubr.f32.mxu0 %v6059_v55 }
 0x7c1   : > { %4986 = vmatmul.mubr.msk.f32.gmra.mrb[30].mxu0 %vm859_vm1, %v4974_v8  ;;  %v2411_v8 = vpop.permute.xlu0 %2410 }
 0x7c2   : > { %2353 = vmatprep.mubr.f32.mxu0 %v6059_v55 }
 0x7c5   : > { %4987 = vmatmul.mubr.msk.f32.gmra.mrb[32].mxu0 %vm859_vm1, %v4975_v57 }
 0x7c6   : > { %2359 = vmatprep.mubr.f32.mxu0 %v6059_v55 }
 0x7c9   : > { %4988 = vmatmul.mubr.msk.f32.gmra.mrb[34].mxu0 %vm859_vm1, %v4976_v58 }
 0x7ca   : > { %2365 = vmatprep.mubr.f32.mxu0 %v6059_v55 }
 0x890   : > { %v2343_v11 = vpop.f32.mrb[28].mxu0 }
 0x891   : > { %v2344_v15 = vadd.f32 %v2343_v11, %v2232_v48  ;;  %v2345_v59 = vpop.f32.mrb[29].mxu0 }
 0x892   : > { %v2346_v19 = vadd.f32 %v2345_v59, %v2232_v48 }
 0x893   : > { %v2378_v22 = vadd.f32 %v2344_v15, %v6701_v0 }
 0x894   : > { %v2379_v17 = vadd.f32 %v2346_v19, %v6707_v12  ;;  %v2349_v61 = vpop.f32.mrb[30].mxu0  ;;  %v2406_v12 = vpop.permute.xlu1 %2405 }
 0x895   : > { %v2386_v24 = vmul.f32 0.70710677, %v2378_v22  ;;  %v2350_v44 = vadd.f32 %v2349_v61, %v2237_v9  ;;  %v2351_v36 = vpop.f32.mrb[31].mxu0  ;;  %v5004_v22 = vld [vmem:[%s8034_s11 + $0xa8] sm:$0xff]  ;;  %v4999_v61 = vld [vmem:[%s8034_s11 + $0x80] sm:$0xff] }
 0x896   : > { %v2352_v18 = vadd.f32 %v2351_v36, %v2237_v9  ;;  %v2387_v26 = vmul.f32 0.70710677, %v2379_v17  ;;  %v5006_v17 = vld [vmem:[%s8034_s11 + $0xb8] sm:$0xff] }
 0x897   : > { %v6943_v54 = vadd.f32 %v2401_v42, %v2386_v24  ;;  %v2380_v16 = vadd.f32 %v2350_v44, %v6709_v14  ;;  %v5000_v24 = vld [vmem:[%s8034_s11 + $0x88] sm:$0xff]  ;;  %v5001_v44 = vld [vmem:[%s8034_s11 + $0x90] sm:$0xff]  ;;  %v5002_v36 = vld [vmem:[%s8034_s11 + $0x98] sm:$0xff] }
 0x898   : > { %v2381_v10 = vadd.f32 %v2352_v18, %v6717_v23  ;;  %v2355_v2 = vpop.f32.mrb[32].mxu0  ;;  %v6949_v56 = vadd.f32 %v2401_v42, %v2387_v26  ;;  %v2416_v11 = vpop.permute.xlu1 %2415  ;;  %v5029_v42 = vld [vmem:[%s8036_s13 + $0x60] sm:$0xff]  ;;  %v5030_v18 = vld [vmem:[%s8036_s13 + $0x68] sm:$0xff]  ;;  %v5031_v26 = vld [vmem:[%s8036_s13 + $0x70] sm:$0xff] }
 0x899   : > { %v2388_v40 = vmul.f32 0.70710677, %v2380_v16  ;;  %v2356_v63 = vadd.f32 %v2355_v2, %v2242_v21  ;;  %v2357_v0 = vpop.f32.mrb[33].mxu0  ;;  %2426 = vrot.lane.b32.xlu0 %v6943_v54, %s8057_s29  ;;  %v1021_v16 = vld [vmem:[%s8032_s9 + $0x60] sm:$0xff] }
 0x89a   : > { %v2358_v50 = vadd.f32 %v2357_v0, %v2242_v21  ;;  %v2389_v5 = vmul.f32 0.70710677, %v2381_v10  ;;  %v5032_v10 = vld [vmem:[%s8036_s13 + $0x78] sm:$0xff]  ;;  %v1232_v2 = vadd.f32 %v6626_v27, %v1021_v16  ;;  %v7079_v16 = vsel %vm1324_vm13, 1.0, %v6059_v55 }
 0x89b   : > { %v6951_v4 = vadd.f32 %v2406_v12, %v2388_v40  ;;  %v2382_v6 = vadd.f32 %v2356_v63, %v6719_v43  ;;  %v1022_v40 = vld [vmem:[%s8032_s9 + $0x68] sm:$0xff]  ;;  %v1023_v63 = vld [vmem:[%s8032_s9 + $0x70] sm:$0xff] }
 0x89c   : > { %v2383_v14 = vadd.f32 %v2358_v50, %v6727_v62  ;;  %v2361_v23 = vpop.f32.mrb[34].mxu0  ;;  %v6959_v58 = vadd.f32 %v2406_v12, %v2389_v5  ;;  %v1237_v0 = vadd.f32 %v6624_v25, %v1022_v40  ;;  %v1242_v12 = vadd.f32 %v6630_v30, %v1023_v63  ;;  %v1024_v50 = vld [vmem:[%s8032_s9 + $0x78] sm:$0xff] }
 0x89d   : > { %v2390_v7 = vmul.f32 0.70710677, %v2382_v6  ;;  %v2362_v47 = vadd.f32 %v2361_v23, %v2247_v60  ;;  %v2363_v3 = vpop.f32.mrb[35].mxu0  ;;  %2428 = vrot.lane.b32.xlu1 %v6951_v4, %s8057_s29  ;;  %2434 = vrot.lane.b32.xlu0 %v6949_v56, %s8057_s29  ;;  %v1247_v27 = vadd.f32 %v6628_v28, %v1024_v50  ;;  %v7052_v25 = vsel %vm1317_vm11, 1.0, %v6059_v55 }
 0x89e   : > { %v2364_v57 = vadd.f32 %v2363_v3, %v2247_v60  ;;  %v2391_v9 = vmul.f32 0.70710677, %v2383_v14  ;;  %v5005_v60 = vld [vmem:[%s8034_s11 + $0xb0] sm:$0xff]  ;;  %v5409_v63 = vpack.c.bf16 %v6951_v4, %v6943_v54 }
 0x89f   : > { %v6961_v48 = vadd.f32 %v2411_v8, %v2390_v7  ;;  %v2384_v43 = vadd.f32 %v2362_v47, %v6729_v1 }
 0x8a0   : > { %v2385_v62 = vadd.f32 %v2364_v57, %v6735_v34  ;;  %v6969_v15 = vadd.f32 %v2411_v8, %v2391_v9  ;;  %v5003_v34 = vld [vmem:[%s8034_s11 + $0xa0] sm:$0xff] }
 0x8a1   : > { %v2392_v21 = vmul.f32 0.70710677, %v2384_v43  ;;  %2436 = vrot.lane.b32.xlu1 %v6959_v58, %s8057_s29  ;;  %2430 = vrot.lane.b32.xlu0 %v6961_v48, %s8057_s29 }
 0x8a2   : > { %v2393_v19 = vmul.f32 0.70710677, %v2385_v62 }
 0x8a3   : > { %v6971_v59 = vadd.f32 %v2416_v11, %v2392_v21 }
 0x8a4   : > { %v6977_v1 = vadd.f32 %v2416_v11, %v2393_v19 }
 0x8a5   : > { %2432 = vrot.lane.b32.xlu1 %v6971_v59, %s8057_s29  ;;  %2438 = vrot.lane.b32.xlu0 %v6969_v15, %s8057_s29 }
 0x8a9   : > { %2440 = vrot.lane.b32.xlu1 %v6977_v1, %s8057_s29  ;;  %2459 = vrot.lane.b32.xlu0 %v6943_v54, %s8055_s2  ;;  %s8077_s29 = smov 127  }
 0x8ad   : > { %2461 = vrot.lane.b32.xlu1 %v6951_v4, %s8055_s2  ;;  %2467 = vrot.lane.b32.xlu0 %v6949_v56, %s8055_s2 }
 0x8b1   : > { %2469 = vrot.lane.b32.xlu1 %v6959_v58, %s8055_s2  ;;  %2463 = vrot.lane.b32.xlu0 %v6961_v48, %s8055_s2 }
 0x8b5   : > { %2465 = vrot.lane.b32.xlu1 %v6971_v59, %s8055_s2  ;;  %2471 = vrot.lane.b32.xlu0 %v6969_v15, %s8055_s2 }
 0x8b9   : > { %2473 = vrot.lane.b32.xlu1 %v6977_v1, %s8055_s2  ;;  %2532 = vperm.xlu0 %5638, %v5003_v34   ;;  %s8080_s2 = smov 4  }
 0x8bd   : > { %2537 = vperm.xlu1 %5639, %v5004_v22   ;;  %2542 = vperm.xlu0 %5638, %v5005_v60  }
 0x8c1   : > { %2547 = vperm.xlu1 %5639, %v5006_v17   ;;  %2512 = vperm.xlu0 %5638, %v4999_v61  }
 0x8c5   : > { %2517 = vperm.xlu1 %5639, %v5000_v24   ;;  %2522 = vperm.xlu0 %5638, %v5001_v44  }
 0x8c9   : > { %2527 = vperm.xlu1 %5639, %v5002_v36   ;;  %2767 = vperm.xlu0 %5638, %v5029_v42  }
 0x8cd   : > { %2772 = vperm.xlu1 %5639, %v5030_v18   ;;  %2777 = vperm.xlu0 %5638, %v5031_v26   ;;  %v5407_v26 = vpack.c.bf16 %v6959_v58, %v6949_v56 }
 0x8d1   : > { %2782 = vperm.xlu1 %5639, %v5032_v10   ;;  %2936 = vperm.xlu0 %5638, %v1232_v2  }
 0x8d5   : > { %2941 = vperm.xlu1 %5639, %v1237_v0   ;;  %2946 = vperm.xlu0 %5638, %v1242_v12   ;;  %v5411_v0 = vpack.c.bf16 %v6977_v1, %v6969_v15 }
 0x8d9   : > { %2951 = vperm.xlu1 %5639, %v1247_v27  }
 0x90b   : > { %v2427_v5 = vpop.permute.xlu0 %2426 }
 0x90f   : > { %v2429_v6 = vpop.permute.xlu1 %2428  ;;  %v2435_v14 = vpop.permute.xlu0 %2434 }
 0x910   : > { %v2447_v30 = vsel %vm2442_vm12, %v2435_v14, %v2427_v5  ;;  %v2443_v47 = vsel %vm2442_vm12, %v2427_v5, %v2435_v14 }
 0x911   : > { %v2451_v8 = vmul.f32 %v7052_v25, %v2447_v30 }
 0x913   : > { %v2437_v23 = vpop.permute.xlu1 %2436  ;;  %v2431_v7 = vpop.permute.xlu0 %2430 }
 0x914   : > { %v2444_v28 = vsel %vm2442_vm12, %v2429_v6, %v2437_v23  ;;  %v2448_v3 = vsel %vm2442_vm12, %v2437_v23, %v2429_v6  ;;  %v5413_v6 = vpack.c.bf16 %v6971_v59, %v6961_v48 }
 0x915   : > { %v2453_v57 = vmul.f32 %v7052_v25, %v2448_v3  ;;  %v5399_v9 = vpack.c.bf16 %v2444_v28, %v2443_v47 }
 0x917   : > { %v5401_v43 = vpack.c.bf16 %v2453_v57, %v2451_v8  ;;  %v2433_v62 = vpop.permute.xlu1 %2432  ;;  %5400 = vmatprep.subr.bf16.mxu1 %v5399_v9  ;;  %v2439_v21 = vpop.permute.xlu0 %2438 }
 0x918   : > { %v2449_v11 = vsel %vm2442_vm12, %v2439_v21, %v2431_v7  ;;  %v2445_v22 = vsel %vm2442_vm12, %v2431_v7, %v2439_v21 }
 0x919   : > { %5402 = vmatpush1.bf16.msra.mxu1 %v5401_v43  ;;  %v2455_v61 = vmul.f32 %v7052_v25, %v2449_v11  ;;  %v4991_v11 = vld [vmem:[%s8033_s10 + $0x80] sm:$0xff] }
 0x91b   : > { %v2441_v19 = vpop.permute.xlu1 %2440  ;;  %v2460_v34 = vpop.permute.xlu0 %2459 }
 0x91c   : > { %v2446_v60 = vsel %vm2442_vm12, %v2433_v62, %v2441_v19  ;;  %v2450_v17 = vsel %vm2442_vm12, %v2441_v19, %v2433_v62  ;;  %v4992_v19 = vld [vmem:[%s8033_s10 + $0x88] sm:$0xff] }
 0x91d   : > { %v2457_v24 = vmul.f32 %v7052_v25, %v2450_v17  ;;  %v5403_v44 = vpack.c.bf16 %v2446_v60, %v2445_v22  ;;  %v4994_v22 = vld [vmem:[%s8033_s10 + $0x98] sm:$0xff]  ;;  %v4995_v60 = vld [vmem:[%s8033_s10 + $0xa0] sm:$0xff]  ;;  %v4996_v17 = vld [vmem:[%s8033_s10 + $0xa8] sm:$0xff] }
 0x91f   : > { %v5405_v36 = vpack.c.bf16 %v2457_v24, %v2455_v61  ;;  %v2462_v42 = vpop.permute.xlu1 %2461  ;;  %5404 = vmatprep.subr.bf16.mxu1 %v5403_v44  ;;  %v2468_v18 = vpop.permute.xlu0 %2467  ;;  %v4997_v61 = vld [vmem:[%s8033_s10 + $0xb0] sm:$0xff]  ;;  %v4998_v24 = vld [vmem:[%s8033_s10 + $0xb8] sm:$0xff] }
 0x920   : > { %v2480_v10 = vsel %vm2475_vm14, %v2468_v18, %v2460_v34  ;;  %v2476_v23 = vsel %vm2475_vm14, %v2460_v34, %v2468_v18  ;;  %v4993_v34 = vld [vmem:[%s8033_s10 + $0x90] sm:$0xff] }
 0x921   : > { %5406 = vmatpush1.bf16.msra.mxu1 %v5405_v36  ;;  %v2485_v12 = vmul.f32 %v7079_v16, %v2480_v10  ;;  %v4977_v44 = vld [vmem:[%s8035_s12 + $0x50] sm:$0xff]  ;;  %v4978_v36 = vld [vmem:[%s8035_s12 + $0x58] sm:$0xff] }
 0x922   : > { %5408 = vmatprep.subr.bf16.mxu1 %v5407_v26  ;;  %4989 = vmatmul.mubr.msk.f32.gmra.mrb[24].mxu0 %vm859_vm1, %v4977_v44 }
 0x923   : > { %v2470_v2 = vpop.permute.xlu1 %2469  ;;  %v2464_v40 = vpop.permute.xlu0 %2463  ;;  %2371 = vmatprep.mubr.f32.mxu0 %v6059_v55 }
 0x924   : > { %v2481_v29 = vsel %vm2475_vm14, %v2470_v2, %v2462_v42  ;;  %v2477_v30 = vsel %vm2475_vm14, %v2462_v42, %v2470_v2 }
 0x925   : > { %v2487_v50 = vmul.f32 %v7079_v16, %v2481_v29  ;;  %5410 = vmatpush1.bf16.msra.mxu1 %v5409_v63  ;;  %v5417_v47 = vpack.c.bf16 %v2477_v30, %v2476_v23 }
 0x926   : > { %5412 = vmatprep.subr.bf16.mxu1 %v5411_v0  ;;  %4990 = vmatmul.mubr.msk.f32.gmra.mrb[26].mxu0 %vm859_vm1, %v4978_v36 }
 0x927   : > { %v2466_v27 = vpop.permute.xlu1 %2465  ;;  %v2472_v5 = vpop.permute.xlu0 %2471  ;;  %v5415_v14 = vpack.c.bf16 %v2487_v50, %v2485_v12  ;;  %2877 = vmatprep.mubr.f32.mxu0 %v6059_v55 }
 0x928   : > { %v2482_v7 = vsel %vm2475_vm14, %v2472_v5, %v2464_v40  ;;  %v2478_v43 = vsel %vm2475_vm14, %v2464_v40, %v2472_v5 }
 0x929   : > { %5414 = vmatpush1.bf16.msra.mxu1 %v5413_v6  ;;  %v2489_v8 = vmul.f32 %v7079_v16, %v2482_v7 }
 0x92a   : > { %5416 = vmatprep.subr.bf16.mxu1 %v5415_v14 }
 0x92b   : > { %v2474_v28 = vpop.permute.xlu1 %2473 }
 0x92c   : > { %v2483_v3 = vsel %vm2475_vm14, %v2474_v28, %v2466_v27  ;;  %v2479_v57 = vsel %vm2475_vm14, %v2466_v27, %v2474_v28 }
 0x92d   : > { %v2491_v9 = vmul.f32 %v7079_v16, %v2483_v3  ;;  %5418 = vmatpush1.bf16.msra.mxu1 %v5417_v47  ;;  %v5421_v21 = vpack.c.bf16 %v2479_v57, %v2478_v43 }
 0x92f   : > { %v5419_v62 = vpack.c.bf16 %v2491_v9, %v2489_v8 }
 0x931   : > { %5420 = vmatprep.subr.bf16.mxu1 %v5419_v62 }
 0x932   : > { %5422 = vmatpush1.bf16.msra.mxu1 %v5421_v21 }
 0x935   : > { %5007 = vmatmul.mubr.msk.f32.vlgmr.msra.gmra.mrb[48].mxu1 %vm1479_vm6, %v4991_v11 }
 0x936   : > { %2644 = vmatprep.mubr.f32.mxu1 %v6059_v55 }
 0x938   : > { %v2533_v63 = vpop.permute.xlu0 %2532 }
 0x939   : > { %5008 = vmatmul.mubr.msk.f32.gmra.mrb[50].mxu1 %vm1479_vm6, %v4992_v19 }
 0x93a   : > { %2650 = vmatprep.mubr.f32.mxu1 %v6059_v55 }
 0x93c   : > { %v2538_v12 = vpop.permute.xlu1 %2537  ;;  %v2543_v27 = vpop.permute.xlu0 %2542 }
 0x93d   : > { %5009 = vmatmul.mubr.msk.f32.gmra.mrb[52].mxu1 %vm1479_vm6, %v4993_v34 }
 0x93e   : > { %2656 = vmatprep.mubr.f32.mxu1 %v6059_v55 }
 0x940   : > { %v2548_v47 = vpop.permute.xlu1 %2547  ;;  %v2513_v57 = vpop.permute.xlu0 %2512 }
 0x941   : > { %5010 = vmatmul.mubr.msk.f32.gmra.mrb[54].mxu1 %vm1479_vm6, %v4994_v22 }
 0x942   : > { %2662 = vmatprep.mubr.f32.mxu1 %v6059_v55 }
 0x944   : > { %v2518_v22 = vpop.permute.xlu1 %2517 }
 0x945   : > { %5011 = vmatmul.mubr.msk.f32.gmra.mrb[56].mxu1 %vm1479_vm6, %v4995_v60 }
 0x946   : > { %2668 = vmatprep.mubr.f32.mxu1 %v6059_v55 }
 0x949   : > { %5012 = vmatmul.mubr.msk.f32.gmra.mrb[58].mxu1 %vm1479_vm6, %v4996_v17 }
 0x94a   : > { %2674 = vmatprep.mubr.f32.mxu1 %v6059_v55 }
 0x94d   : > { %5013 = vmatmul.mubr.msk.f32.gmra.mrb[60].mxu1 %vm1479_vm6, %v4997_v61 }
 0x94e   : > { %2680 = vmatprep.mubr.f32.mxu1 %v6059_v55 }
 0x951   : > { %5014 = vmatmul.mubr.msk.f32.gmra.mrb[62].mxu1 %vm1479_vm6, %v4998_v24 }
 0x952   : > { %3172 = vmatprep.mubr.f32.mxu1 %v6059_v55 }
 0xa08   : > { %v2640_v42 = vpop.f32.mrb[48].mxu1 }
 0xa09   : > { %v2642_v18 = vpop.f32.mrb[49].mxu1  ;;  %v2641_v43 = vadd.f32 %v2640_v42, %v2513_v57 }
 0xa0a   : > { %v2643_v60 = vadd.f32 %v2642_v18, %v2513_v57 }
 0xa0c   : > { %v2646_v26 = vpop.f32.mrb[50].mxu1 }
 0xa0d   : > { %v2648_v10 = vpop.f32.mrb[51].mxu1  ;;  %v2647_v61 = vadd.f32 %v2646_v26, %v2518_v22  ;;  %v2523_v26 = vpop.permute.xlu0 %2522 }
 0xa10   : > { %v2652_v2 = vpop.f32.mrb[52].mxu1 }
 0xa11   : > { %v2654_v40 = vpop.f32.mrb[53].mxu1 }
 0xa14   : > { %v7157_v29 = vpop.f32.mrb[54].mxu1 }
 0xa15   : > { %v7159_v0 = vpop.f32.mrb[55].mxu1 }
 0xa18   : > { %v2664_v50 = vpop.f32.mrb[56].mxu1 }
 0xa19   : > { %v2665_v5 = vadd.f32 %v2664_v50, %v2533_v63  ;;  %v2666_v6 = vpop.f32.mrb[57].mxu1 }
 0xa1a   : > { %v2667_v14 = vadd.f32 %v2666_v6, %v2533_v63 }
 0xa1b   : > { %v5015_v30 = vmul.f32 -1.442695, %v2665_v5 }
 0xa1c   : > { %v5016_v23 = vmul.f32 -1.442695, %v2667_v14  ;;  %v2670_v7 = vpop.f32.mrb[58].mxu1 }
 0xa1d   : > { %5768 = vpow2.f32 %v5015_v30  ;;  %v2671_v28 = vadd.f32 %v2670_v7, %v2538_v12  ;;  %v2672_v3 = vpop.f32.mrb[59].mxu1  ;;  %v2653_v7 = vadd.f32 %v2652_v2, %v2523_v26 }
 0xa1e   : > { %5770 = vpow2.f32 %v5016_v23  ;;  %v2673_v8 = vadd.f32 %v2672_v3, %v2538_v12 }
 0xa1f   : > { %v5017_v9 = vmul.f32 -1.442695, %v2671_v28 }
 0xa20   : > { %v5018_v62 = vmul.f32 -1.442695, %v2673_v8  ;;  %v2676_v21 = vpop.f32.mrb[60].mxu1 }
 0xa21   : > { %5772 = vpow2.f32 %v5017_v9  ;;  %v2677_v11 = vadd.f32 %v2676_v21, %v2543_v27  ;;  %v2678_v19 = vpop.f32.mrb[61].mxu1 }
 0xa22   : > { %5774 = vpow2.f32 %v5018_v62  ;;  %v2679_v34 = vadd.f32 %v2678_v19, %v2543_v27  ;;  %v2649_v27 = vadd.f32 %v2648_v10, %v2518_v22 }
 0xa23   : > { %v5019_v17 = vmul.f32 -1.442695, %v2677_v11  ;;  %5776 = vtanh.f32 %v2641_v43  ;;  %v2528_v43 = vpop.permute.xlu1 %2527 }
 0xa24   : > { %v5020_v24 = vmul.f32 -1.442695, %v2679_v34  ;;  %v2682_v44 = vpop.f32.mrb[62].mxu1  ;;  %v2659_v21 = vadd.f32 %v7157_v29, %v2528_v43 }
 0xa25   : > { %5778 = vpow2.f32 %v5019_v17  ;;  %v2683_v36 = vadd.f32 %v2682_v44, %v2548_v47  ;;  %v2684_v63 = vpop.f32.mrb[63].mxu1 }
 0xa26   : > { %5780 = vpow2.f32 %v5020_v24  ;;  %v2685_v12 = vadd.f32 %v2684_v63, %v2548_v47  ;;  %v2655_v47 = vadd.f32 %v2654_v40, %v2523_v26  ;;  %v2661_v40 = vadd.f32 %v7159_v0, %v2528_v43  ;;  %v5024_v43 = vld [vmem:[%s8035_s12 + $0x68] sm:$0xff] }
 0xa27   : > { %v5769_v42 = vpop.eup %5768  ;;  %5782 = vtanh.f32 %v2643_v60  ;;  %v5021_v50 = vmul.f32 -1.442695, %v2683_v36 }
 0xa28   : > { %v5771_v5 = vpop.eup %5770  ;;  %5784 = vtanh.f32 %v2647_v61  ;;  %v2719_v6 = vadd.f32 1.0, %v5769_v42  ;;  %v5022_v14 = vmul.f32 -1.442695, %v2685_v12 }
 0xa29   : > { %v2720_v30 = vadd.f32 1.0, %v5771_v5  ;;  %5786 = vpow2.f32 %v5021_v50 }
 0xa2a   : > { %5788 = vrcp.f32 %v2719_v6 }
 0xa2b   : > { %v5773_v18 = vpop.eup %5772  ;;  %5790 = vrcp.f32 %v2720_v30 }
 0xa2c   : > { %v5775_v23 = vpop.eup %5774  ;;  %v2721_v28 = vadd.f32 1.0, %v5773_v18  ;;  %5792 = vpow2.f32 %v5022_v14 }
 0xa2d   : > { %5794 = vtanh.f32 %v2649_v27  ;;  %v2722_v3 = vadd.f32 1.0, %v5775_v23  ;;  %v5777_v8 = vpop.eup %5776 }
 0xa2e   : > { %5796 = vrcp.f32 %v2721_v28 }
 0xa2f   : > { %v5779_v57 = vpop.eup %5778  ;;  %5798 = vrcp.f32 %v2722_v3 }
 0xa30   : > { %v5781_v9 = vpop.eup %5780  ;;  %5800 = vtanh.f32 %v2653_v7  ;;  %v2723_v10 = vadd.f32 1.0, %v5779_v57 }
 0xa31   : > { %v5783_v62 = vpop.eup %5782  ;;  %5802 = vtanh.f32 %v2655_v47  ;;  %v2724_v11 = vadd.f32 1.0, %v5781_v9  ;;  %v5023_v9 = vld [vmem:[%s8035_s12 + $0x60] sm:$0xff] }
 0xa32   : > { %v5785_v19 = vpop.eup %5784  ;;  %5804 = vrcp.f32 %v2723_v10  ;;  %v5025_v10 = vld [vmem:[%s8035_s12 + $0x70] sm:$0xff] }
 0xa33   : > { %v5787_v2 = vpop.eup %5786  ;;  %5806 = vrcp.f32 %v2724_v11  ;;  %v2773_v11 = vpop.permute.xlu1 %2772 }
 0xa34   : > { %v5789_v34 = vpop.eup %5788  ;;  %v2725_v22 = vadd.f32 1.0, %v5787_v2  ;;  %5808 = vtanh.f32 %v2659_v21  ;;  %v2768_v21 = vpop.permute.xlu0 %2767 }
 0xa35   : > { %v5791_v60 = vpop.eup %5790  ;;  %v2743_v17 = vmul.f32 %v5789_v34, %v5777_v8 }
 0xa36   : > { %v5793_v61 = vpop.eup %5792  ;;  %5810 = vrcp.f32 %v2725_v22  ;;  %v2744_v24 = vmul.f32 %v5791_v60, %v5783_v62  ;;  %v5026_v62 = vld [vmem:[%s8035_s12 + $0x78] sm:$0xff] }
 0xa37   : > { %v5795_v44 = vpop.eup %5794  ;;  %v2726_v36 = vadd.f32 1.0, %v5793_v61  ;;  %5812 = vtanh.f32 %v2661_v40 }
 0xa38   : > { %v5797_v63 = vpop.eup %5796 }
 0xa39   : > { %v5799_v29 = vpop.eup %5798  ;;  %5814 = vrcp.f32 %v2726_v36  ;;  %v2745_v12 = vmul.f32 %v5797_v63, %v5785_v19  ;;  %v2778_v19 = vpop.permute.xlu0 %2777 }
 0xa3a   : > { %v5801_v42 = vpop.eup %5800  ;;  %v2746_v50 = vmul.f32 %v5799_v29, %v5795_v44 }
 0xa3b   : > { %v5803_v5 = vpop.eup %5802  ;;  %v5425_v6 = vpack.c.bf16 %v2745_v12, %v2743_v17  ;;  %v2783_v17 = vpop.permute.xlu1 %2782 }
 0xa3c   : > { %v5805_v14 = vpop.eup %5804  ;;  %v5423_v0 = vpack.c.bf16 %v2746_v50, %v2744_v24 }
 0xa3d   : > { %v5807_v27 = vpop.eup %5806  ;;  %v2747_v30 = vmul.f32 %v5805_v14, %v5801_v42  ;;  %v2937_v29 = vpop.permute.xlu0 %2936 }
 0xa3e   : > { %5424 = vmatprep.subr.bf16.mxu0 %v5423_v0  ;;  %v2748_v18 = vmul.f32 %v5807_v27, %v5803_v5  ;;  %v5809_v26 = vpop.eup %5808 }
 0xa3f   : > { %5426 = vmatpush1.bf16.msra.mxu0 %v5425_v6 }
 0xa40   : > { %v5811_v23 = vpop.eup %5810 }
 0xa41   : > { %v2749_v7 = vmul.f32 %v5811_v23, %v5809_v26  ;;  %v5813_v28 = vpop.eup %5812 }
 0xa43   : > { %v5815_v47 = vpop.eup %5814  ;;  %v5429_v3 = vpack.c.bf16 %v2749_v7, %v2747_v30 }
 0xa44   : > { %v2750_v8 = vmul.f32 %v5815_v47, %v5813_v28 }
 0xa46   : > { %v5427_v57 = vpack.c.bf16 %v2750_v8, %v2748_v18  ;;  %v2947_v8 = vpop.permute.xlu0 %2946 }
 0xa48   : > { %5428 = vmatprep.subr.bf16.mxu0 %v5427_v57 }
 0xa49   : > { %5430 = vmatpush1.bf16.msra.mxu0 %v5429_v3 }
 0xa4c   : > { %5035 = vmatmul.mubr.msk.f32.vlgmr.msra.gmra.mrb[36].mxu0 %vm859_vm1, %v5023_v9 }
 0xa4d   : > { %2883 = vmatprep.mubr.f32.mxu0 %v6059_v55 }
 0xa50   : > { %5036 = vmatmul.mubr.msk.f32.gmra.mrb[38].mxu0 %vm859_vm1, %v5024_v43 }
 0xa51   : > { %2889 = vmatprep.mubr.f32.mxu0 %v6059_v55 }
 0xa54   : > { %5037 = vmatmul.mubr.msk.f32.gmra.mrb[40].mxu0 %vm859_vm1, %v5025_v10 }
 0xa55   : > { %2895 = vmatprep.mubr.f32.mxu0 %v6059_v55 }
 0xa58   : > { %5038 = vmatmul.mubr.msk.f32.gmra.mrb[42].mxu0 %vm859_vm1, %v5026_v62 }
 0xa59   : > { %2901 = vmatprep.mubr.f32.mxu0 %v6059_v55 }
 0xb1f   : > { %v2879_v2 = vpop.f32.mrb[36].mxu0 }
 0xb20   : > { %v2880_v34 = vadd.f32 %v2879_v2, %v2768_v21  ;;  %v2881_v40 = vpop.f32.mrb[37].mxu0 }
 0xb21   : > { %v2882_v22 = vadd.f32 %v2881_v40, %v2768_v21  ;;  %v5055_v40 = vld [vmem:[%s8034_s11 + $0xf0] sm:$0xff] }
 0xb22   : > { %v2914_v60 = vadd.f32 %v2880_v34, %v6943_v54  ;;  %v5054_v34 = vld [vmem:[%s8034_s11 + $0xe8] sm:$0xff] }
 0xb23   : > { %v2915_v61 = vadd.f32 %v2882_v22, %v6949_v56  ;;  %v2885_v24 = vpop.f32.mrb[38].mxu0  ;;  %v2942_v56 = vpop.permute.xlu1 %2941  ;;  %v5056_v22 = vld [vmem:[%s8034_s11 + $0xf8] sm:$0xff] }
 0xb24   : > { %v2922_v44 = vmul.f32 0.70710677, %v2914_v60  ;;  %v2886_v36 = vadd.f32 %v2885_v24, %v2773_v11  ;;  %v2887_v63 = vpop.f32.mrb[39].mxu0  ;;  %v5049_v60 = vld [vmem:[%s8034_s11 + $0xc0] sm:$0xff]  ;;  %v5052_v24 = vld [vmem:[%s8034_s11 + $0xd8] sm:$0xff] }
 0xb25   : > { %v2888_v12 = vadd.f32 %v2887_v63, %v2773_v11  ;;  %v2923_v50 = vmul.f32 0.70710677, %v2915_v61  ;;  %v5051_v61 = vld [vmem:[%s8034_s11 + $0xd0] sm:$0xff]  ;;  %v5081_v63 = vld [vmem:[%s8036_s13 + $0xa0] sm:$0xff] }
 0xb26   : > { %v7185_v42 = vadd.f32 %v2937_v29, %v2922_v44  ;;  %v2916_v5 = vadd.f32 %v2886_v36, %v6951_v4  ;;  %v5079_v44 = vld [vmem:[%s8036_s13 + $0x90] sm:$0xff]  ;;  %v5080_v36 = vld [vmem:[%s8036_s13 + $0x98] sm:$0xff] }
 0xb27   : > { %v2917_v6 = vadd.f32 %v2888_v12, %v6959_v58  ;;  %v2891_v14 = vpop.f32.mrb[40].mxu0  ;;  %v7191_v18 = vadd.f32 %v2937_v29, %v2923_v50  ;;  %v2952_v21 = vpop.permute.xlu1 %2951  ;;  %v1025_v29 = vld [vmem:[%s8032_s9 + $0x80] sm:$0xff]  ;;  %v5082_v12 = vld [vmem:[%s8036_s13 + $0xa8] sm:$0xff] }
 0xb28   : > { %v2924_v0 = vmul.f32 0.70710677, %v2916_v5  ;;  %v2892_v27 = vadd.f32 %v2891_v14, %v2778_v19  ;;  %v2893_v54 = vpop.f32.mrb[41].mxu0  ;;  %2962 = vrot.lane.b32.xlu0 %v7185_v42, %s6057_s24  ;;  %v1252_v50 = vadd.f32 %v6634_v32, %v1025_v29  ;;  %v1026_v5 = vld [vmem:[%s8032_s9 + $0x88] sm:$0xff] }
 0xb29   : > { %v2894_v30 = vadd.f32 %v2893_v54, %v2778_v19  ;;  %v2925_v23 = vmul.f32 0.70710677, %v2917_v6  ;;  %v1027_v6 = vld [vmem:[%s8032_s9 + $0x90] sm:$0xff]  ;;  %v1257_v14 = vadd.f32 %v6632_v31, %v1026_v5 }
 0xb2a   : > { %v7193_v26 = vadd.f32 %v2942_v56, %v2924_v0  ;;  %v2918_v7 = vadd.f32 %v2892_v27, %v6961_v48  ;;  %v1262_v0 = vadd.f32 %v6638_v35, %v1027_v6  ;;  %v1028_v27 = vld [vmem:[%s8032_s9 + $0x98] sm:$0xff] }
 0xb2b   : > { %v2919_v4 = vadd.f32 %v2894_v30, %v6969_v15  ;;  %v2897_v28 = vpop.f32.mrb[42].mxu0  ;;  %v7201_v9 = vadd.f32 %v2942_v56, %v2925_v23  ;;  %v1267_v32 = vadd.f32 %v6636_v33, %v1028_v27 }
 0xb2c   : > { %v2926_v58 = vmul.f32 0.70710677, %v2918_v7  ;;  %v2898_v47 = vadd.f32 %v2897_v28, %v2783_v17  ;;  %v2899_v3 = vpop.f32.mrb[43].mxu0  ;;  %2964 = vrot.lane.b32.xlu1 %v7193_v26, %s6057_s24  ;;  %2970 = vrot.lane.b32.xlu0 %v7191_v18, %s6057_s24 }
 0xb2d   : > { %v2900_v57 = vadd.f32 %v2899_v3, %v2783_v17  ;;  %v2927_v10 = vmul.f32 0.70710677, %v2919_v4  ;;  %v5050_v17 = vld [vmem:[%s8034_s11 + $0xc8] sm:$0xff] }
 0xb2e   : > { %v7203_v43 = vadd.f32 %v2947_v8, %v2926_v58  ;;  %v2920_v48 = vadd.f32 %v2898_v47, %v6971_v59 }
 0xb2f   : > { %v2921_v15 = vadd.f32 %v2900_v57, %v6977_v1  ;;  %v7211_v11 = vadd.f32 %v2947_v8, %v2927_v10  ;;  %v5053_v1 = vld [vmem:[%s8034_s11 + $0xe0] sm:$0xff] }
 0xb30   : > { %v2928_v62 = vmul.f32 0.70710677, %v2920_v48  ;;  %2972 = vrot.lane.b32.xlu1 %v7201_v9, %s6057_s24  ;;  %2966 = vrot.lane.b32.xlu0 %v7203_v43, %s6057_s24 }
 0xb31   : > { %v2929_v2 = vmul.f32 0.70710677, %v2921_v15 }
 0xb32   : > { %v7213_v19 = vadd.f32 %v2952_v21, %v2928_v62 }
 0xb33   : > { %v7219_v59 = vadd.f32 %v2952_v21, %v2929_v2 }
 0xb34   : > { %2968 = vrot.lane.b32.xlu1 %v7213_v19, %s6057_s24  ;;  %2974 = vrot.lane.b32.xlu0 %v7211_v11, %s6057_s24 }
 0xb35   : > { %v5443_v29 = vpack.c.bf16 %v7219_v59, %v7211_v11 }
 0xb38   : > { %2976 = vrot.lane.b32.xlu1 %v7219_v59, %s6057_s24  ;;  %2994 = vrot.lane.b32.xlu0 %v7185_v42, %s8077_s29 }
 0xb3c   : > { %2996 = vrot.lane.b32.xlu1 %v7193_v26, %s8077_s29  ;;  %3002 = vrot.lane.b32.xlu0 %v7191_v18, %s8077_s29 }
 0xb40   : > { %3004 = vrot.lane.b32.xlu1 %v7201_v9, %s8077_s29  ;;  %2998 = vrot.lane.b32.xlu0 %v7203_v43, %s8077_s29 }
 0xb44   : > { %3000 = vrot.lane.b32.xlu1 %v7213_v19, %s8077_s29  ;;  %3006 = vrot.lane.b32.xlu0 %v7211_v11, %s8077_s29 }
 0xb48   : > { %3008 = vrot.lane.b32.xlu1 %v7219_v59, %s8077_s29  ;;  %3066 = vperm.xlu0 %5638, %v5053_v1   ;;  %s6064_s29 = smov [#allocation5]  }
 0xb4c   : > { %3071 = vperm.xlu1 %5639, %v5054_v34   ;;  %3076 = vperm.xlu0 %5638, %v5055_v40  }
 0xb50   : > { %3081 = vperm.xlu1 %5639, %v5056_v22   ;;  %3046 = vperm.xlu0 %5638, %v5049_v60  }
 0xb54   : > { %3051 = vperm.xlu1 %5639, %v5050_v17   ;;  %3056 = vperm.xlu0 %5638, %v5051_v61   ;;  %v5439_v61 = vpack.c.bf16 %v7201_v9, %v7191_v18 }
 0xb58   : > { %3061 = vperm.xlu1 %5639, %v5052_v24   ;;  %3301 = vperm.xlu0 %5638, %v5079_v44  }
 0xb5c   : > { %3306 = vperm.xlu1 %5639, %v5080_v36   ;;  %3311 = vperm.xlu0 %5638, %v5081_v63   ;;  %v5441_v63 = vpack.c.bf16 %v7193_v26, %v7185_v42 }
 0xb60   : > { %3316 = vperm.xlu1 %5639, %v5082_v12   ;;  %3470 = vperm.xlu0 %5638, %v1252_v50  }
 0xb64   : > { %3475 = vperm.xlu1 %5639, %v1257_v14   ;;  %3480 = vperm.xlu0 %5638, %v1262_v0   ;;  %v5445_v14 = vpack.c.bf16 %v7213_v19, %v7203_v43 }
 0xb68   : > { %3485 = vperm.xlu1 %5639, %v1267_v32  }
 0xb9a   : > { %v2963_v54 = vpop.permute.xlu0 %2962 }
 0xb9e   : > { %v2965_v56 = vpop.permute.xlu1 %2964  ;;  %v2971_v30 = vpop.permute.xlu0 %2970 }
 0xb9f   : > { %v2982_v23 = vsel %vm1373_vm3, %v2971_v30, %v2963_v54  ;;  %v2978_v31 = vsel %vm1373_vm3, %v2963_v54, %v2971_v30 }
 0xba0   : > { %v2986_v33 = vmul.f32 %v6526_v13, %v2982_v23 }
 0xba2   : > { %v2973_v7 = vpop.permute.xlu1 %2972  ;;  %v2967_v4 = vpop.permute.xlu0 %2966 }
 0xba3   : > { %v2979_v35 = vsel %vm1373_vm3, %v2965_v56, %v2973_v7  ;;  %v2983_v28 = vsel %vm1373_vm3, %v2973_v7, %v2965_v56 }
 0xba4   : > { %v2988_v58 = vmul.f32 %v6526_v13, %v2983_v28  ;;  %v5431_v47 = vpack.c.bf16 %v2979_v35, %v2978_v31 }
 0xba6   : > { %v5433_v3 = vpack.c.bf16 %v2988_v58, %v2986_v33  ;;  %v2969_v8 = vpop.permute.xlu1 %2968  ;;  %5432 = vmatprep.subr.bf16.mxu1 %v5431_v47  ;;  %v2975_v57 = vpop.permute.xlu0 %2974  ;;  %v5041_v58 = vld [vmem:[%s8033_s10 + $0xc0] sm:$0xff]  ;;  %v5043_v47 = vld [vmem:[%s8033_s10 + $0xd0] sm:$0xff] }
 0xba7   : > { %v2984_v10 = vsel %vm1373_vm3, %v2975_v57, %v2967_v4  ;;  %v2980_v62 = vsel %vm1373_vm3, %v2967_v4, %v2975_v57  ;;  %v5046_v57 = vld [vmem:[%s8033_s10 + $0xe8] sm:$0xff] }
 0xba8   : > { %5434 = vmatpush1.bf16.msra.mxu1 %v5433_v3  ;;  %v2990_v1 = vmul.f32 %v6526_v13, %v2984_v10  ;;  %v5044_v3 = vld [vmem:[%s8033_s10 + $0xd8] sm:$0xff]  ;;  %v5047_v10 = vld [vmem:[%s8033_s10 + $0xf0] sm:$0xff] }
 0xbaa   : > { %v2977_v48 = vpop.permute.xlu1 %2976  ;;  %v2995_v15 = vpop.permute.xlu0 %2994 }
 0xbab   : > { %v2981_v21 = vsel %vm1373_vm3, %v2969_v8, %v2977_v48  ;;  %v2985_v2 = vsel %vm1373_vm3, %v2977_v48, %v2969_v8  ;;  %v5045_v8 = vld [vmem:[%s8033_s10 + $0xe0] sm:$0xff]  ;;  %v5048_v48 = vld [vmem:[%s8033_s10 + $0xf8] sm:$0xff] }
 0xbac   : > { %v2992_v34 = vmul.f32 %v6526_v13, %v2985_v2  ;;  %v5435_v40 = vpack.c.bf16 %v2981_v21, %v2980_v62  ;;  %v5028_v62 = vld [vmem:[%s8035_s12 + $0x88] sm:$0xff] }
 0xbae   : > { %v5437_v22 = vpack.c.bf16 %v2992_v34, %v2990_v1  ;;  %v2997_v60 = vpop.permute.xlu1 %2996  ;;  %5436 = vmatprep.subr.bf16.mxu1 %v5435_v40  ;;  %v3003_v17 = vpop.permute.xlu0 %3002 }
 0xbaf   : > { %v3014_v24 = vsel %vm1406_vm5, %v3003_v17, %v2995_v15  ;;  %v3010_v32 = vsel %vm1406_vm5, %v2995_v15, %v3003_v17  ;;  %v5027_v15 = vld [vmem:[%s8035_s12 + $0x80] sm:$0xff] }
 0xbb0   : > { %5438 = vmatpush1.bf16.msra.mxu1 %v5437_v22  ;;  %v3019_v12 = vmul.f32 %v6556_v52, %v3014_v24  ;;  %5039 = vmatmul.mubr.msk.f32.gmra.mrb[24].mxu0 %vm859_vm1, %v5027_v15 }
 0xbb1   : > { %5440 = vmatprep.subr.bf16.mxu1 %v5439_v61  ;;  %2907 = vmatprep.mubr.f32.mxu0 %v6059_v55 }
 0xbb2   : > { %v3005_v44 = vpop.permute.xlu1 %3004  ;;  %v2999_v36 = vpop.permute.xlu0 %2998 }
 0xbb3   : > { %v3015_v13 = vsel %vm1406_vm5, %v3005_v44, %v2997_v60  ;;  %v3011_v27 = vsel %vm1406_vm5, %v2997_v60, %v3005_v44 }
 0xbb4   : > { %v3021_v50 = vmul.f32 %v6556_v52, %v3015_v13  ;;  %5442 = vmatpush1.bf16.msra.mxu1 %v5441_v63  ;;  %v5449_v56 = vpack.c.bf16 %v3011_v27, %v3010_v32  ;;  %5040 = vmatmul.mubr.msk.f32.gmra.mrb[26].mxu0 %vm859_vm1, %v5028_v62 }
 0xbb5   : > { %5444 = vmatprep.subr.bf16.mxu1 %v5443_v29  ;;  %3411 = vmatprep.mubr.f32.mxu0 %v6059_v55 }
 0xbb6   : > { %v3001_v5 = vpop.permute.xlu1 %3000  ;;  %v3007_v6 = vpop.permute.xlu0 %3006  ;;  %v5447_v0 = vpack.c.bf16 %v3021_v50, %v3019_v12 }
 0xbb7   : > { %v3016_v54 = vsel %vm1406_vm5, %v3007_v6, %v2999_v36  ;;  %v3012_v35 = vsel %vm1406_vm5, %v2999_v36, %v3007_v6 }
 0xbb8   : > { %5446 = vmatpush1.bf16.msra.mxu1 %v5445_v14  ;;  %v3023_v7 = vmul.f32 %v6556_v52, %v3016_v54 }
 0xbb9   : > { %5448 = vmatprep.subr.bf16.mxu1 %v5447_v0 }
 0xbba   : > { %v3009_v30 = vpop.permute.xlu1 %3008 }
 0xbbb   : > { %v3017_v23 = vsel %vm1406_vm5, %v3009_v30, %v3001_v5  ;;  %v3013_v4 = vsel %vm1406_vm5, %v3001_v5, %v3009_v30 }
 0xbbc   : > { %v3025_v31 = vmul.f32 %v6556_v52, %v3017_v23  ;;  %5450 = vmatpush1.bf16.msra.mxu1 %v5449_v56  ;;  %v5453_v33 = vpack.c.bf16 %v3013_v4, %v3012_v35  ;;  %v5042_v52 = vld [vmem:[%s8033_s10 + $0xc8] sm:$0xff] }
 0xbbe   : > { %v5451_v28 = vpack.c.bf16 %v3025_v31, %v3023_v7 }
 0xbc0   : > { %5452 = vmatprep.subr.bf16.mxu1 %v5451_v28 }
 0xbc1   : > { %5454 = vmatpush1.bf16.msra.mxu1 %v5453_v33 }
 0xbc4   : > { %5057 = vmatmul.mubr.msk.f32.vlgmr.msra.gmra.mrb[64].mxu1 %vm1479_vm6, %v5041_v58 }
 0xbc5   : > { %3178 = vmatprep.mubr.f32.mxu1 %v6059_v55 }
 0xbc7   : > { %v3067_v60 = vpop.permute.xlu0 %3066 }
 0xbc8   : > { %5058 = vmatmul.mubr.msk.f32.gmra.mrb[66].mxu1 %vm1479_vm6, %v5042_v52 }
 0xbc9   : > { %3184 = vmatprep.mubr.f32.mxu1 %v6059_v55 }
 0xbcb   : > { %v3072_v24 = vpop.permute.xlu1 %3071  ;;  %v3077_v36 = vpop.permute.xlu0 %3076 }
 0xbcc   : > { %5059 = vmatmul.mubr.msk.f32.gmra.mrb[68].mxu1 %vm1479_vm6, %v5043_v47 }
 0xbcd   : > { %3190 = vmatprep.mubr.f32.mxu1 %v6059_v55 }
 0xbcf   : > { %v3082_v6 = vpop.permute.xlu1 %3081  ;;  %v3047_v32 = vpop.permute.xlu0 %3046 }
 0xbd0   : > { %5060 = vmatmul.mubr.msk.f32.gmra.mrb[70].mxu1 %vm1479_vm6, %v5044_v3 }
 0xbd1   : > { %3196 = vmatprep.mubr.f32.mxu1 %v6059_v55 }
 0xbd3   : > { %v3052_v35 = vpop.permute.xlu1 %3051 }
 0xbd4   : > { %5061 = vmatmul.mubr.msk.f32.gmra.mrb[72].mxu1 %vm1479_vm6, %v5045_v8 }
 0xbd5   : > { %3202 = vmatprep.mubr.f32.mxu1 %v6059_v55 }
 0xbd8   : > { %5062 = vmatmul.mubr.msk.f32.gmra.mrb[74].mxu1 %vm1479_vm6, %v5046_v57 }
 0xbd9   : > { %3208 = vmatprep.mubr.f32.mxu1 %v6059_v55 }
 0xbdc   : > { %5063 = vmatmul.mubr.msk.f32.gmra.mrb[76].mxu1 %vm1479_vm6, %v5047_v10 }
 0xbdd   : > { %3214 = vmatprep.mubr.f32.mxu1 %v6059_v55 }
 0xbe0   : > { %5064 = vmatmul.mubr.msk.f32.gmra.mrb[78].mxu1 %vm1479_vm6, %v5048_v48 }
 0xbe1   : > { %4240 = vmatprep.mubr.f32.mxu1 %v6059_v55 }
 0xc97   : > { %v3174_v21 = vpop.f32.mrb[64].mxu1 }
 0xc98   : > { %v3176_v2 = vpop.f32.mrb[65].mxu1  ;;  %v3175_v56 = vadd.f32 %v3174_v21, %v3047_v32 }
 0xc99   : > { %v3177_v28 = vadd.f32 %v3176_v2, %v3047_v32 }
 0xc9b   : > { %v3180_v1 = vpop.f32.mrb[66].mxu1 }
 0xc9c   : > { %v3182_v34 = vpop.f32.mrb[67].mxu1  ;;  %v3181_v58 = vadd.f32 %v3180_v1, %v3052_v35  ;;  %v3057_v1 = vpop.permute.xlu0 %3056 }
 0xc9f   : > { %v3186_v40 = vpop.f32.mrb[68].mxu1 }
 0xca0   : > { %v3188_v22 = vpop.f32.mrb[69].mxu1 }
 0xca3   : > { %v7389_v17 = vpop.f32.mrb[70].mxu1 }
 0xca4   : > { %v7391_v61 = vpop.f32.mrb[71].mxu1 }
 0xca7   : > { %v3198_v44 = vpop.f32.mrb[72].mxu1 }
 0xca8   : > { %v3199_v63 = vadd.f32 %v3198_v44, %v3067_v60  ;;  %v3200_v13 = vpop.f32.mrb[73].mxu1 }
 0xca9   : > { %v3201_v29 = vadd.f32 %v3200_v13, %v3067_v60  ;;  %v3183_v60 = vadd.f32 %v3182_v34, %v3052_v35  ;;  %v3189_v13 = vadd.f32 %v3188_v22, %v3057_v1 }
 0xcaa   : > { %v5065_v12 = vmul.f32 -1.442695, %v3199_v63 }
 0xcab   : > { %v5066_v50 = vmul.f32 -1.442695, %v3201_v29  ;;  %v3204_v5 = vpop.f32.mrb[74].mxu1 }
 0xcac   : > { %5816 = vpow2.f32 %v5065_v12  ;;  %v3205_v14 = vadd.f32 %v3204_v5, %v3072_v24  ;;  %v3206_v0 = vpop.f32.mrb[75].mxu1 }
 0xcad   : > { %5818 = vpow2.f32 %v5066_v50  ;;  %v3207_v27 = vadd.f32 %v3206_v0, %v3072_v24 }
 0xcae   : > { %v5067_v54 = vmul.f32 -1.442695, %v3205_v14 }
 0xcaf   : > { %v5068_v30 = vmul.f32 -1.442695, %v3207_v27  ;;  %v3210_v23 = vpop.f32.mrb[76].mxu1 }
 0xcb0   : > { %5820 = vpow2.f32 %v5067_v54  ;;  %v3211_v7 = vadd.f32 %v3210_v23, %v3077_v36  ;;  %v3212_v4 = vpop.f32.mrb[77].mxu1 }
 0xcb1   : > { %5822 = vpow2.f32 %v5068_v30  ;;  %v3213_v31 = vadd.f32 %v3212_v4, %v3077_v36  ;;  %v3187_v36 = vadd.f32 %v3186_v40, %v3057_v1 }
 0xcb2   : > { %v5069_v33 = vmul.f32 -1.442695, %v3211_v7  ;;  %5824 = vtanh.f32 %v3175_v56 }
 0xcb3   : > { %v5070_v52 = vmul.f32 -1.442695, %v3213_v31  ;;  %v3216_v47 = vpop.f32.mrb[78].mxu1 }
 0xcb4   : > { %5826 = vpow2.f32 %v5069_v33  ;;  %v3217_v3 = vadd.f32 %v3216_v47, %v3082_v6  ;;  %v3218_v8 = vpop.f32.mrb[79].mxu1 }
 0xcb5   : > { %5828 = vpow2.f32 %v5070_v52  ;;  %v3219_v57 = vadd.f32 %v3218_v8, %v3082_v6  ;;  %v3062_v6 = vpop.permute.xlu1 %3061 }
 0xcb6   : > { %v5817_v10 = vpop.eup %5816  ;;  %5830 = vtanh.f32 %v3177_v28  ;;  %v5071_v48 = vmul.f32 -1.442695, %v3217_v3  ;;  %v3193_v0 = vadd.f32 %v7389_v17, %v3062_v6  ;;  %v3195_v22 = vadd.f32 %v7391_v61, %v3062_v6 }
 0xcb7   : > { %v5819_v15 = vpop.eup %5818  ;;  %5832 = vtanh.f32 %v3181_v58  ;;  %v3253_v62 = vadd.f32 1.0, %v5817_v10  ;;  %v5072_v21 = vmul.f32 -1.442695, %v3219_v57 }
 0xcb8   : > { %v3254_v24 = vadd.f32 1.0, %v5819_v15  ;;  %5834 = vpow2.f32 %v5071_v48 }
 0xcb9   : > { %5836 = vrcp.f32 %v3253_v62 }
 0xcba   : > { %v5821_v2 = vpop.eup %5820  ;;  %5838 = vrcp.f32 %v3254_v24 }
 0xcbb   : > { %v5823_v44 = vpop.eup %5822  ;;  %v3255_v63 = vadd.f32 1.0, %v5821_v2  ;;  %5840 = vpow2.f32 %v5072_v21 }
 0xcbc   : > { %5842 = vtanh.f32 %v3183_v60  ;;  %v3256_v29 = vadd.f32 1.0, %v5823_v44  ;;  %v5825_v12 = vpop.eup %5824 }
 0xcbd   : > { %5844 = vrcp.f32 %v3255_v63  ;;  %v5074_v63 = vld [vmem:[%s8035_s12 + $0x98] sm:$0xff] }
 0xcbe   : > { %v5827_v50 = vpop.eup %5826  ;;  %5846 = vrcp.f32 %v3256_v29  ;;  %v5076_v29 = vld [vmem:[%s8035_s12 + $0xa8] sm:$0xff] }
 0xcbf   : > { %v5829_v5 = vpop.eup %5828  ;;  %5848 = vtanh.f32 %v3187_v36  ;;  %v3257_v34 = vadd.f32 1.0, %v5827_v50  ;;  %v5073_v36 = vld [vmem:[%s8035_s12 + $0x90] sm:$0xff]  ;;  %v3307_v50 = vpop.permute.xlu1 %3306 }
 0xcc0   : > { %v5831_v14 = vpop.eup %5830  ;;  %5850 = vtanh.f32 %v3189_v13  ;;  %v3258_v27 = vadd.f32 1.0, %v5829_v5  ;;  %v5075_v13 = vld [vmem:[%s8035_s12 + $0xa0] sm:$0xff] }
 0xcc1   : > { %v5833_v32 = vpop.eup %5832  ;;  %5852 = vrcp.f32 %v3257_v34 }
 0xcc2   : > { %v5835_v40 = vpop.eup %5834  ;;  %5854 = vrcp.f32 %v3258_v27 }
 0xcc3   : > { %v5837_v54 = vpop.eup %5836  ;;  %v3259_v56 = vadd.f32 1.0, %v5835_v40  ;;  %5856 = vtanh.f32 %v3193_v0 }
 0xcc4   : > { %v5839_v30 = vpop.eup %5838  ;;  %v3277_v23 = vmul.f32 %v5837_v54, %v5825_v12  ;;  %v3302_v12 = vpop.permute.xlu0 %3301 }
 0xcc5   : > { %v5841_v7 = vpop.eup %5840  ;;  %5858 = vrcp.f32 %v3259_v56  ;;  %v3278_v4 = vmul.f32 %v5839_v30, %v5831_v14 }
 0xcc6   : > { %v5843_v31 = vpop.eup %5842  ;;  %v3260_v35 = vadd.f32 1.0, %v5841_v7  ;;  %5860 = vtanh.f32 %v3195_v22 }
 0xcc7   : > { %v5845_v28 = vpop.eup %5844 }
 0xcc8   : > { %v5847_v17 = vpop.eup %5846  ;;  %5862 = vrcp.f32 %v3260_v35  ;;  %v3279_v33 = vmul.f32 %v5845_v28, %v5833_v32  ;;  %v3312_v5 = vpop.permute.xlu0 %3311 }
 0xcc9   : > { %v5849_v58 = vpop.eup %5848  ;;  %v3280_v52 = vmul.f32 %v5847_v17, %v5843_v31  ;;  %v3317_v32 = vpop.permute.xlu1 %3316 }
 0xcca   : > { %v5851_v47 = vpop.eup %5850  ;;  %v5457_v3 = vpack.c.bf16 %v3279_v33, %v3277_v23 }
 0xccb   : > { %v5853_v8 = vpop.eup %5852  ;;  %v5455_v61 = vpack.c.bf16 %v3280_v52, %v3278_v4 }
 0xccc   : > { %v5855_v57 = vpop.eup %5854  ;;  %v3281_v10 = vmul.f32 %v5853_v8, %v5849_v58  ;;  %v3471_v23 = vpop.permute.xlu0 %3470 }
 0xccd   : > { %5456 = vmatprep.subr.bf16.mxu0 %v5455_v61  ;;  %v3282_v48 = vmul.f32 %v5855_v57, %v5851_v47  ;;  %v5857_v15 = vpop.eup %5856 }
 0xcce   : > { %5458 = vmatpush1.bf16.msra.mxu0 %v5457_v3 }
 0xccf   : > { %v5859_v62 = vpop.eup %5858 }
 0xcd0   : > { %v3283_v21 = vmul.f32 %v5859_v62, %v5857_v15  ;;  %v5861_v60 = vpop.eup %5860  ;;  %v3481_v15 = vpop.permute.xlu0 %3480 }
 0xcd2   : > { %v5863_v24 = vpop.eup %5862  ;;  %v5461_v2 = vpack.c.bf16 %v3283_v21, %v3281_v10 }
 0xcd3   : > { %v3284_v1 = vmul.f32 %v5863_v24, %v5861_v60 }
 0xcd5   : > { %v5459_v44 = vpack.c.bf16 %v3284_v1, %v3282_v48 }
 0xcd7   : > { %5460 = vmatprep.subr.bf16.mxu0 %v5459_v44 }
 0xcd8   : > { %5462 = vmatpush1.bf16.msra.mxu0 %v5461_v2 }
 0xcdb   : > { %5085 = vmatmul.mubr.msk.f32.vlgmr.msra.gmra.mrb[44].mxu0 %vm859_vm1, %v5073_v36 }
 0xcdc   : > { %3417 = vmatprep.mubr.f32.mxu0 %v6059_v55 }
 0xcdf   : > { %5086 = vmatmul.mubr.msk.f32.gmra.mrb[46].mxu0 %vm859_vm1, %v5074_v63 }
 0xce0   : > { %3423 = vmatprep.mubr.f32.mxu0 %v6059_v55 }
 0xce3   : > { %5087 = vmatmul.mubr.msk.f32.gmra.mrb[48].mxu0 %vm859_vm1, %v5075_v13  ;;  %v5078_v13 = vld [vmem:[%s8035_s12 + $0xb8] sm:$0xff] }
 0xce4   : > { %3429 = vmatprep.mubr.f32.mxu0 %v6059_v55 }
 0xce7   : > { %5088 = vmatmul.mubr.msk.f32.gmra.mrb[50].mxu0 %vm859_vm1, %v5076_v29  ;;  %v5103_v29 = vld [vmem:[%s8034_s11 + $0x120] sm:$0xff] }
 0xce8   : > { %3435 = vmatprep.mubr.f32.mxu0 %v6059_v55 }
 0xdae   : > { %v3413_v6 = vpop.f32.mrb[44].mxu0 }
 0xdaf   : > { %v3414_v34 = vadd.f32 %v3413_v6, %v3302_v12  ;;  %v3415_v14 = vpop.f32.mrb[45].mxu0  ;;  %v5099_v6 = vld [vmem:[%s8034_s11 + $0x100] sm:$0xff] }
 0xdb0   : > { %v3416_v0 = vadd.f32 %v3415_v14, %v3302_v12  ;;  %v5104_v12 = vld [vmem:[%s8034_s11 + $0x128] sm:$0xff]  ;;  %v5101_v14 = vld [vmem:[%s8034_s11 + $0x110] sm:$0xff] }
 0xdb1   : > { %v3448_v27 = vadd.f32 %v3414_v34, %v7185_v42  ;;  %v5100_v34 = vld [vmem:[%s8034_s11 + $0x108] sm:$0xff] }
 0xdb2   : > { %v3449_v40 = vadd.f32 %v3416_v0, %v7191_v18  ;;  %v3419_v54 = vpop.f32.mrb[46].mxu0  ;;  %v3476_v18 = vpop.permute.xlu1 %3475  ;;  %v5102_v0 = vld [vmem:[%s8034_s11 + $0x118] sm:$0xff] }
 0xdb3   : > { %v3456_v22 = vmul.f32 0.70710677, %v3448_v27  ;;  %v3420_v56 = vadd.f32 %v3419_v54, %v3307_v50  ;;  %v3421_v30 = vpop.f32.mrb[47].mxu0  ;;  %v5129_v27 = vld [vmem:[%s8036_s13 + $0xc0] sm:$0xff] }
 0xdb4   : > { %v3422_v7 = vadd.f32 %v3421_v30, %v3307_v50  ;;  %v3457_v31 = vmul.f32 0.70710677, %v3449_v40  ;;  %v5105_v50 = vld [vmem:[%s8034_s11 + $0x130] sm:$0xff]  ;;  %v1029_v54 = vld [vmem:[%s8032_s9 + $0xa0] sm:$0xff]  ;;  %v1030_v30 = vld [vmem:[%s8032_s9 + $0xa8] sm:$0xff] }
 0xdb5   : > { %v7417_v4 = vadd.f32 %v3471_v23, %v3456_v22  ;;  %v3450_v35 = vadd.f32 %v3420_v56, %v7193_v26  ;;  %v5131_v40 = vld [vmem:[%s8036_s13 + $0xd0] sm:$0xff]  ;;  %v5132_v22 = vld [vmem:[%s8036_s13 + $0xd8] sm:$0xff]  ;;  %v1272_v56 = vadd.f32 %v6642_v38, %v1029_v54 }
 0xdb6   : > { %v3451_v28 = vadd.f32 %v3422_v7, %v7201_v9  ;;  %v3425_v17 = vpop.f32.mrb[48].mxu0  ;;  %v7423_v47 = vadd.f32 %v3471_v23, %v3457_v31  ;;  %v3486_v1 = vpop.permute.xlu1 %3485  ;;  %v1031_v23 = vld [vmem:[%s8032_s9 + $0xb0] sm:$0xff]  ;;  %v1277_v7 = vadd.f32 %v6640_v37, %v1030_v30 }
 0xdb7   : > { %v3458_v33 = vmul.f32 0.70710677, %v3450_v35  ;;  %v3426_v58 = vadd.f32 %v3425_v17, %v3312_v5  ;;  %v3427_v42 = vpop.f32.mrb[49].mxu0  ;;  %3496 = vrot.lane.b32.xlu0 %v7417_v4, %s8078_s5  ;;  %v1282_v31 = vadd.f32 %v6646_v41, %v1031_v23  ;;  %v1032_v35 = vld [vmem:[%s8032_s9 + $0xb8] sm:$0xff] }
 0xdb8   : > { %v3428_v52 = vadd.f32 %v3427_v42, %v3312_v5  ;;  %v3459_v8 = vmul.f32 0.70710677, %v3451_v28  ;;  %v5106_v5 = vld [vmem:[%s8034_s11 + $0x138] sm:$0xff]  ;;  %v1287_v38 = vadd.f32 %v6644_v39, %v1032_v35 }
 0xdb9   : > { %v7425_v3 = vadd.f32 %v3476_v18, %v3458_v33  ;;  %v3452_v61 = vadd.f32 %v3426_v58, %v7203_v43 }
 0xdba   : > { %v3453_v26 = vadd.f32 %v3428_v52, %v7211_v11  ;;  %v3431_v57 = vpop.f32.mrb[50].mxu0  ;;  %v7433_v21 = vadd.f32 %v3476_v18, %v3459_v8 }
 0xdbb   : > { %v3460_v9 = vmul.f32 0.70710677, %v3452_v61  ;;  %v3432_v10 = vadd.f32 %v3431_v57, %v3317_v32  ;;  %v3433_v48 = vpop.f32.mrb[51].mxu0  ;;  %3498 = vrot.lane.b32.xlu1 %v7425_v3, %s8078_s5  ;;  %3504 = vrot.lane.b32.xlu0 %v7423_v47, %s8078_s5 }
 0xdbc   : > { %v3434_v62 = vadd.f32 %v3433_v48, %v3317_v32  ;;  %v3461_v24 = vmul.f32 0.70710677, %v3453_v26  ;;  %v5130_v32 = vld [vmem:[%s8036_s13 + $0xc8] sm:$0xff] }
 0xdbd   : > { %v7435_v60 = vadd.f32 %v3481_v15, %v3460_v9  ;;  %v3454_v43 = vadd.f32 %v3432_v10, %v7213_v19 }
 0xdbe   : > { %v3455_v11 = vadd.f32 %v3434_v62, %v7219_v59  ;;  %v7443_v44 = vadd.f32 %v3481_v15, %v3461_v24  ;;  %v5077_v59 = vld [vmem:[%s8035_s12 + $0xb0] sm:$0xff] }
 0xdbf   : > { %v3462_v2 = vmul.f32 0.70710677, %v3454_v43  ;;  %3506 = vrot.lane.b32.xlu1 %v7433_v21, %s8078_s5  ;;  %3500 = vrot.lane.b32.xlu0 %v7435_v60, %s8078_s5 }
 0xdc0   : > { %v3463_v63 = vmul.f32 0.70710677, %v3455_v11  ;;  %5089 = vmatmul.mubr.msk.f32.gmra.mrb[24].mxu0 %vm859_vm1, %v5077_v59 }
 0xdc1   : > { %v7445_v36 = vadd.f32 %v3486_v1, %v3462_v2  ;;  %3441 = vmatprep.mubr.f32.mxu0 %v6059_v55 }
 0xdc2   : > { %v7451_v19 = vadd.f32 %v3486_v1, %v3463_v63 }
 0xdc3   : > { %3502 = vrot.lane.b32.xlu1 %v7445_v36, %s8078_s5  ;;  %3508 = vrot.lane.b32.xlu0 %v7443_v44, %s8078_s5 }
 0xdc4   : > { %5090 = vmatmul.mubr.msk.f32.gmra.mrb[26].mxu0 %vm859_vm1, %v5078_v13 }
 0xdc5   : > { %3706 = vmatprep.mubr.f32.mxu0 %v6059_v55 }
 0xdc7   : > { %3510 = vrot.lane.b32.xlu1 %v7451_v19, %s8078_s5  ;;  %3528 = vrot.lane.b32.xlu0 %v7417_v4, %s8079_s30 }
 0xdcb   : > { %3530 = vrot.lane.b32.xlu1 %v7425_v3, %s8079_s30  ;;  %3536 = vrot.lane.b32.xlu0 %v7423_v47, %s8079_s30 }
 0xdcf   : > { %3538 = vrot.lane.b32.xlu1 %v7433_v21, %s8079_s30  ;;  %3532 = vrot.lane.b32.xlu0 %v7435_v60, %s8079_s30 }
 0xdd3   : > { %3534 = vrot.lane.b32.xlu1 %v7445_v36, %s8079_s30  ;;  %3540 = vrot.lane.b32.xlu0 %v7443_v44, %s8079_s30 }
 0xdd7   : > { %3542 = vrot.lane.b32.xlu1 %v7451_v19, %s8079_s30  ;;  %3600 = vperm.xlu0 %5638, %v5103_v29   ;;  %v5471_v29 = vpack.c.bf16 %v7433_v21, %v7423_v47  ;;  %s5964_s30 = sshll.u32 %s6064_s29, 4  ;;  %s5965_s30 = int_to_ptr.vmem [resolvable:$false] %s5964_s30 }
 0xddb   : > { %3605 = vperm.xlu1 %5639, %v5104_v12   ;;  %3610 = vperm.xlu0 %5638, %v5105_v50  }
 0xddf   : > { %3615 = vperm.xlu1 %5639, %v5106_v5   ;;  %3580 = vperm.xlu0 %5638, %v5099_v6   ;;  %v5473_v6 = vpack.c.bf16 %v7425_v3, %v7417_v4 }
 0xde3   : > { %3585 = vperm.xlu1 %5639, %v5100_v34   ;;  %3590 = vperm.xlu0 %5638, %v5101_v14   ;;  %v5475_v34 = vpack.c.bf16 %v7451_v19, %v7443_v44 }
 0xde7   : > { %3595 = vperm.xlu1 %5639, %v5102_v0   ;;  %3835 = vperm.xlu0 %5638, %v5129_v27  }
 0xdeb   : > { %3840 = vperm.xlu1 %5639, %v5130_v32   ;;  %3845 = vperm.xlu0 %5638, %v5131_v40   ;;  %v5477_v40 = vpack.c.bf16 %v7445_v36, %v7435_v60 }
 0xdef   : > { %3850 = vperm.xlu1 %5639, %v5132_v22   ;;  %4004 = vperm.xlu0 %5638, %v1272_v56  }
 0xdf3   : > { %4009 = vperm.xlu1 %5639, %v1277_v7   ;;  %4014 = vperm.xlu0 %5638, %v1282_v31  }
 0xdf7   : > { %4019 = vperm.xlu1 %5639, %v1287_v38  }
 0xe29   : > { %v3497_v28 = vpop.permute.xlu0 %3496 }
 0xe2d   : > { %v3499_v17 = vpop.permute.xlu1 %3498  ;;  %v3505_v33 = vpop.permute.xlu0 %3504 }
 0xe2e   : > { %v3516_v58 = vsel %vm1906_vm8, %v3505_v33, %v3497_v28  ;;  %v3512_v37 = vsel %vm1906_vm8, %v3497_v28, %v3505_v33 }
 0xe2f   : > { %v3520_v39 = vmul.f32 %v6810_v20, %v3516_v58 }
 0xe31   : > { %v3507_v42 = vpop.permute.xlu1 %3506  ;;  %v3501_v18 = vpop.permute.xlu0 %3500 }
 0xe32   : > { %v3513_v41 = vsel %vm1906_vm8, %v3499_v17, %v3507_v42  ;;  %v3517_v52 = vsel %vm1906_vm8, %v3507_v42, %v3499_v17  ;;  %v5091_v42 = vld [vmem:[%s8033_s10 + $0x100] sm:$0xff] }
 0xe33   : > { %v3522_v8 = vmul.f32 %v6810_v20, %v3517_v52  ;;  %v5463_v61 = vpack.c.bf16 %v3513_v41, %v3512_v37  ;;  %v5094_v37 = vld [vmem:[%s8033_s10 + $0x118] sm:$0xff]  ;;  %v5095_v41 = vld [vmem:[%s8033_s10 + $0x120] sm:$0xff]  ;;  %v5096_v52 = vld [vmem:[%s8033_s10 + $0x128] sm:$0xff] }
 0xe35   : > { %v5465_v26 = vpack.c.bf16 %v3522_v8, %v3520_v39  ;;  %v3503_v57 = vpop.permute.xlu1 %3502  ;;  %5464 = vmatprep.subr.bf16.mxu0 %v5463_v61  ;;  %v3509_v9 = vpop.permute.xlu0 %3508  ;;  %v5097_v39 = vld [vmem:[%s8033_s10 + $0x130] sm:$0xff]  ;;  %v5098_v8 = vld [vmem:[%s8033_s10 + $0x138] sm:$0xff] }
 0xe36   : > { %v3518_v10 = vsel %vm1906_vm8, %v3509_v9, %v3501_v18  ;;  %v3514_v62 = vsel %vm1906_vm8, %v3501_v18, %v3509_v9  ;;  %v5093_v18 = vld [vmem:[%s8033_s10 + $0x110] sm:$0xff] }
 0xe37   : > { %5466 = vmatpush1.bf16.msra.mxu0 %v5465_v26  ;;  %v3524_v11 = vmul.f32 %v6810_v20, %v3518_v10 }
 0xe39   : > { %v3511_v48 = vpop.permute.xlu1 %3510  ;;  %v3529_v15 = vpop.permute.xlu0 %3528 }
 0xe3a   : > { %v3515_v24 = vsel %vm1906_vm8, %v3503_v57, %v3511_v48  ;;  %v3519_v43 = vsel %vm1906_vm8, %v3511_v48, %v3503_v57 }
 0xe3b   : > { %v3526_v2 = vmul.f32 %v6810_v20, %v3519_v43  ;;  %v5467_v1 = vpack.c.bf16 %v3515_v24, %v3514_v62 }
 0xe3d   : > { %v5469_v63 = vpack.c.bf16 %v3526_v2, %v3524_v11  ;;  %v3531_v59 = vpop.permute.xlu1 %3530  ;;  %5468 = vmatprep.subr.bf16.mxu0 %v5467_v1  ;;  %v3537_v13 = vpop.permute.xlu0 %3536 }
 0xe3e   : > { %v3548_v12 = vsel %vm1939_vm10, %v3537_v13, %v3529_v15  ;;  %v3544_v56 = vsel %vm1939_vm10, %v3529_v15, %v3537_v13 }
 0xe3f   : > { %5470 = vmatpush1.bf16.msra.mxu0 %v5469_v63  ;;  %v3553_v14 = vmul.f32 %v6837_v46, %v3548_v12 }
 0xe40   : > { %5472 = vmatprep.subr.bf16.mxu0 %v5471_v29 }
 0xe41   : > { %v3539_v50 = vpop.permute.xlu1 %3538  ;;  %v3533_v5 = vpop.permute.xlu0 %3532 }
 0xe42   : > { %v3549_v20 = vsel %vm1939_vm10, %v3539_v50, %v3531_v59  ;;  %v3545_v22 = vsel %vm1939_vm10, %v3531_v59, %v3539_v50 }
 0xe43   : > { %v3555_v0 = vmul.f32 %v6837_v46, %v3549_v20  ;;  %5474 = vmatpush1.bf16.msra.mxu0 %v5473_v6  ;;  %v5481_v23 = vpack.c.bf16 %v3545_v22, %v3544_v56 }
 0xe44   : > { %5476 = vmatprep.subr.bf16.mxu0 %v5475_v34 }
 0xe45   : > { %v3535_v27 = vpop.permute.xlu1 %3534  ;;  %v3541_v32 = vpop.permute.xlu0 %3540  ;;  %v5479_v54 = vpack.c.bf16 %v3555_v0, %v3553_v14 }
 0xe46   : > { %v3550_v30 = vsel %vm1939_vm10, %v3541_v32, %v3533_v5  ;;  %v3546_v17 = vsel %vm1939_vm10, %v3533_v5, %v3541_v32 }
 0xe47   : > { %5478 = vmatpush1.bf16.msra.mxu0 %v5477_v40  ;;  %v3557_v35 = vmul.f32 %v6837_v46, %v3550_v30 }
 0xe48   : > { %5480 = vmatprep.subr.bf16.mxu0 %v5479_v54 }
 0xe49   : > { %v3543_v7 = vpop.permute.xlu1 %3542 }
 0xe4a   : > { %v3551_v31 = vsel %vm1939_vm10, %v3543_v7, %v3535_v27  ;;  %v3547_v38 = vsel %vm1939_vm10, %v3535_v27, %v3543_v7 }
 0xe4b   : > { %v3559_v28 = vmul.f32 %v6837_v46, %v3551_v31  ;;  %5482 = vmatpush1.bf16.msra.mxu0 %v5481_v23  ;;  %v5485_v58 = vpack.c.bf16 %v3547_v38, %v3546_v17  ;;  %v5092_v46 = vld [vmem:[%s8033_s10 + $0x108] sm:$0xff] }
 0xe4d   : > { %v5483_v33 = vpack.c.bf16 %v3559_v28, %v3557_v35 }
 0xe4f   : > { %5484 = vmatprep.subr.bf16.mxu0 %v5483_v33 }
 0xe50   : > { %5486 = vmatpush1.bf16.msra.mxu0 %v5485_v58 }
 0xe53   : > { %5107 = vmatmul.mubr.msk.f32.vlgmr.msra.gmra.mrb[52].mxu0 %vm1479_vm6, %v5091_v42 }
 0xe54   : > { %3712 = vmatprep.mubr.f32.mxu0 %v6059_v55 }
 0xe56   : > { %v3601_v15 = vpop.permute.xlu0 %3600 }
 0xe57   : > { %5108 = vmatmul.mubr.msk.f32.gmra.mrb[54].mxu0 %vm1479_vm6, %v5092_v46 }
 0xe58   : > { %3718 = vmatprep.mubr.f32.mxu0 %v6059_v55 }
 0xe5a   : > { %v3606_v43 = vpop.permute.xlu1 %3605  ;;  %v3611_v2 = vpop.permute.xlu0 %3610 }
 0xe5b   : > { %5109 = vmatmul.mubr.msk.f32.gmra.mrb[56].mxu0 %vm1479_vm6, %v5093_v18 }
 0xe5c   : > { %3724 = vmatprep.mubr.f32.mxu0 %v6059_v55 }
 0xe5e   : > { %v3616_v50 = vpop.permute.xlu1 %3615  ;;  %v3581_v34 = vpop.permute.xlu0 %3580 }
 0xe5f   : > { %5110 = vmatmul.mubr.msk.f32.gmra.mrb[58].mxu0 %vm1479_vm6, %v5094_v37 }
 0xe60   : > { %3730 = vmatprep.mubr.f32.mxu0 %v6059_v55 }
 0xe62   : > { %v3586_v56 = vpop.permute.xlu1 %3585 }
 0xe63   : > { %5111 = vmatmul.mubr.msk.f32.gmra.mrb[60].mxu0 %vm1479_vm6, %v5095_v41 }
 0xe64   : > { %3736 = vmatprep.mubr.f32.mxu0 %v6059_v55 }
 0xe67   : > { %5112 = vmatmul.mubr.msk.f32.gmra.mrb[62].mxu0 %vm1479_vm6, %v5096_v52 }
 0xe68   : > { %3742 = vmatprep.mubr.f32.mxu0 %v6059_v55 }
 0xe6b   : > { %5113 = vmatmul.mubr.msk.f32.gmra.mrb[64].mxu0 %vm1479_vm6, %v5097_v39  ;;  %v3591_v39 = vpop.permute.xlu0 %3590 }
 0xe6c   : > { %3748 = vmatprep.mubr.f32.mxu0 %v6059_v55 }
 0xe6f   : > { %5114 = vmatmul.mubr.msk.f32.gmra.mrb[66].mxu0 %vm1479_vm6, %v5098_v8 }
 0xe70   : > { %3945 = vmatprep.mubr.f32.mxu0 %v6059_v55 }
 0xf26   : > { %v3708_v61 = vpop.f32.mrb[52].mxu0 }
 0xf27   : > { %v3710_v26 = vpop.f32.mrb[53].mxu0  ;;  %v3709_v0 = vadd.f32 %v3708_v61, %v3581_v34 }
 0xf28   : > { %v3711_v30 = vadd.f32 %v3710_v26, %v3581_v34 }
 0xf2a   : > { %v3714_v57 = vpop.f32.mrb[54].mxu0 }
 0xf2b   : > { %v3716_v9 = vpop.f32.mrb[55].mxu0  ;;  %v3715_v7 = vadd.f32 %v3714_v57, %v3586_v56 }
 0xf2c   : > { %v3717_v37 = vadd.f32 %v3716_v9, %v3586_v56 }
 0xf2e   : > { %v3720_v10 = vpop.f32.mrb[56].mxu0 }
 0xf2f   : > { %v3722_v48 = vpop.f32.mrb[57].mxu0  ;;  %v3721_v61 = vadd.f32 %v3720_v10, %v3591_v39 }
 0xf30   : > { %v3723_v57 = vadd.f32 %v3722_v48, %v3591_v39  ;;  %v3836_v39 = vpop.permute.xlu0 %3835 }
 0xf32   : > { %v7621_v62 = vpop.f32.mrb[58].mxu0 }
 0xf33   : > { %v7623_v24 = vpop.f32.mrb[59].mxu0 }
 0xf36   : > { %v3732_v11 = vpop.f32.mrb[60].mxu0 }
 0xf37   : > { %v3733_v1 = vadd.f32 %v3732_v11, %v3601_v15  ;;  %v3734_v63 = vpop.f32.mrb[61].mxu0 }
 0xf38   : > { %v3735_v59 = vadd.f32 %v3734_v63, %v3601_v15 }
 0xf39   : > { %v5115_v13 = vmul.f32 -1.442695, %v3733_v1  ;;  %v3596_v1 = vpop.permute.xlu1 %3595 }
 0xf3a   : > { %v5116_v29 = vmul.f32 -1.442695, %v3735_v59  ;;  %v3738_v12 = vpop.f32.mrb[62].mxu0  ;;  %v3727_v59 = vadd.f32 %v7621_v62, %v3596_v1  ;;  %v3729_v48 = vadd.f32 %v7623_v24, %v3596_v1 }
 0xf3b   : > { %5864 = vpow2.f32 %v5115_v13  ;;  %v3739_v5 = vadd.f32 %v3738_v12, %v3606_v43  ;;  %v3740_v6 = vpop.f32.mrb[63].mxu0 }
 0xf3c   : > { %5866 = vpow2.f32 %v5116_v29  ;;  %v3741_v20 = vadd.f32 %v3740_v6, %v3606_v43 }
 0xf3d   : > { %v5117_v14 = vmul.f32 -1.442695, %v3739_v5 }
 0xf3e   : > { %v5118_v27 = vmul.f32 -1.442695, %v3741_v20  ;;  %v3744_v32 = vpop.f32.mrb[64].mxu0 }
 0xf3f   : > { %5868 = vpow2.f32 %v5117_v14  ;;  %v3745_v40 = vadd.f32 %v3744_v32, %v3611_v2  ;;  %v3746_v54 = vpop.f32.mrb[65].mxu0 }
 0xf40   : > { %5870 = vpow2.f32 %v5118_v27  ;;  %v3747_v22 = vadd.f32 %v3746_v54, %v3611_v2 }
 0xf41   : > { %v5119_v23 = vmul.f32 -1.442695, %v3745_v40  ;;  %5872 = vtanh.f32 %v3709_v0 }
 0xf42   : > { %v5120_v31 = vmul.f32 -1.442695, %v3747_v22  ;;  %v3750_v35 = vpop.f32.mrb[66].mxu0 }
 0xf43   : > { %5874 = vpow2.f32 %v5119_v23  ;;  %v3751_v38 = vadd.f32 %v3750_v35, %v3616_v50  ;;  %v3752_v28 = vpop.f32.mrb[67].mxu0 }
 0xf44   : > { %5876 = vpow2.f32 %v5120_v31  ;;  %v3753_v17 = vadd.f32 %v3752_v28, %v3616_v50 }
 0xf45   : > { %v5865_v33 = vpop.eup %5864  ;;  %5878 = vtanh.f32 %v3711_v30  ;;  %v5121_v58 = vmul.f32 -1.442695, %v3751_v38 }
 0xf46   : > { %v5867_v42 = vpop.eup %5866  ;;  %5880 = vtanh.f32 %v3715_v7  ;;  %v3787_v46 = vadd.f32 1.0, %v5865_v33  ;;  %v5122_v18 = vmul.f32 -1.442695, %v3753_v17 }
 0xf47   : > { %v3788_v41 = vadd.f32 1.0, %v5867_v42  ;;  %5882 = vpow2.f32 %v5121_v58 }
 0xf48   : > { %5884 = vrcp.f32 %v3787_v46 }
 0xf49   : > { %v5869_v52 = vpop.eup %5868  ;;  %5886 = vrcp.f32 %v3788_v41  ;;  %v5125_v41 = vld [vmem:[%s8035_s12 + $0xd0] sm:$0xff] }
 0xf4a   : > { %v5871_v8 = vpop.eup %5870  ;;  %v3789_v26 = vadd.f32 1.0, %v5869_v52  ;;  %5888 = vpow2.f32 %v5122_v18  ;;  %v5123_v18 = vld [vmem:[%s8035_s12 + $0xc0] sm:$0xff]  ;;  %v5126_v52 = vld [vmem:[%s8035_s12 + $0xd8] sm:$0xff] }
 0xf4b   : > { %5890 = vtanh.f32 %v3717_v37  ;;  %v3790_v15 = vadd.f32 1.0, %v5871_v8  ;;  %v5873_v43 = vpop.eup %5872  ;;  %v5124_v37 = vld [vmem:[%s8035_s12 + $0xc8] sm:$0xff]  ;;  %v3841_v8 = vpop.permute.xlu1 %3840 }
 0xf4c   : > { %5892 = vrcp.f32 %v3789_v26 }
 0xf4d   : > { %v5875_v11 = vpop.eup %5874  ;;  %5894 = vrcp.f32 %v3790_v15 }
 0xf4e   : > { %v5877_v2 = vpop.eup %5876  ;;  %5896 = vtanh.f32 %v3721_v61  ;;  %v3791_v9 = vadd.f32 1.0, %v5875_v11  ;;  %v3846_v61 = vpop.permute.xlu0 %3845 }
 0xf4f   : > { %v5879_v63 = vpop.eup %5878  ;;  %5898 = vtanh.f32 %v3723_v57  ;;  %v3792_v13 = vadd.f32 1.0, %v5877_v2  ;;  %v3851_v2 = vpop.permute.xlu1 %3850 }
 0xf50   : > { %v5881_v29 = vpop.eup %5880  ;;  %5900 = vrcp.f32 %v3791_v9 }
 0xf51   : > { %v5883_v10 = vpop.eup %5882  ;;  %5902 = vrcp.f32 %v3792_v13 }
 0xf52   : > { %v5885_v12 = vpop.eup %5884  ;;  %v3793_v50 = vadd.f32 1.0, %v5883_v10  ;;  %5904 = vtanh.f32 %v3727_v59 }
 0xf53   : > { %v5887_v5 = vpop.eup %5886  ;;  %v3811_v6 = vmul.f32 %v5885_v12, %v5873_v43 }
 0xf54   : > { %v5889_v20 = vpop.eup %5888  ;;  %5906 = vrcp.f32 %v3793_v50  ;;  %v3812_v34 = vmul.f32 %v5887_v5, %v5879_v63 }
 0xf55   : > { %v5891_v14 = vpop.eup %5890  ;;  %v3794_v0 = vadd.f32 1.0, %v5889_v20  ;;  %5908 = vtanh.f32 %v3729_v48 }
 0xf56   : > { %v5893_v27 = vpop.eup %5892 }
 0xf57   : > { %v5895_v62 = vpop.eup %5894  ;;  %5910 = vrcp.f32 %v3794_v0  ;;  %v3813_v32 = vmul.f32 %v5893_v27, %v5881_v29  ;;  %v4005_v29 = vpop.permute.xlu0 %4004 }
 0xf58   : > { %v5897_v40 = vpop.eup %5896  ;;  %v3814_v54 = vmul.f32 %v5895_v62, %v5891_v14 }
 0xf59   : > { %v5899_v22 = vpop.eup %5898  ;;  %v5489_v56 = vpack.c.bf16 %v3813_v32, %v3811_v6 }
 0xf5a   : > { %v5901_v30 = vpop.eup %5900  ;;  %v5487_v24 = vpack.c.bf16 %v3814_v54, %v3812_v34 }
 0xf5b   : > { %v5903_v23 = vpop.eup %5902  ;;  %v3815_v7 = vmul.f32 %v5901_v30, %v5897_v40 }
 0xf5c   : > { %5488 = vmatprep.subr.bf16.mxu0 %v5487_v24  ;;  %v3816_v31 = vmul.f32 %v5903_v23, %v5899_v22  ;;  %v5905_v35 = vpop.eup %5904  ;;  %v4015_v24 = vpop.permute.xlu0 %4014 }
 0xf5d   : > { %5490 = vmatpush1.bf16.msra.mxu0 %v5489_v56 }
 0xf5e   : > { %v5907_v38 = vpop.eup %5906 }
 0xf5f   : > { %v3817_v28 = vmul.f32 %v5907_v38, %v5905_v35  ;;  %v5909_v17 = vpop.eup %5908 }
 0xf61   : > { %v5911_v33 = vpop.eup %5910  ;;  %v5493_v58 = vpack.c.bf16 %v3817_v28, %v3815_v7 }
 0xf62   : > { %v3818_v42 = vmul.f32 %v5911_v33, %v5909_v17 }
 0xf64   : > { %v5491_v46 = vpack.c.bf16 %v3818_v42, %v3816_v31 }
 0xf66   : > { %5492 = vmatprep.subr.bf16.mxu0 %v5491_v46  ;;  %v5153_v46 = vld [vmem:[%s8034_s11 + $0x160] sm:$0xff] }
 0xf67   : > { %5494 = vmatpush1.bf16.msra.mxu0 %v5493_v58 }
 0xf6a   : > { %5135 = vmatmul.mubr.msk.f32.vlgmr.msra.gmra.mrb[68].mxu0 %vm859_vm1, %v5123_v18  ;;  %v5154_v18 = vld [vmem:[%s8034_s11 + $0x168] sm:$0xff] }
 0xf6b   : > { %3951 = vmatprep.mubr.f32.mxu0 %v6059_v55 }
 0xf6e   : > { %5136 = vmatmul.mubr.msk.f32.gmra.mrb[70].mxu0 %vm859_vm1, %v5124_v37  ;;  %v5155_v37 = vld [vmem:[%s8034_s11 + $0x170] sm:$0xff] }
 0xf6f   : > { %3957 = vmatprep.mubr.f32.mxu0 %v6059_v55 }
 0xf72   : > { %5137 = vmatmul.mubr.msk.f32.gmra.mrb[72].mxu0 %vm859_vm1, %v5125_v41  ;;  %v5156_v41 = vld [vmem:[%s8034_s11 + $0x178] sm:$0xff] }
 0xf73   : > { %3963 = vmatprep.mubr.f32.mxu0 %v6059_v55 }
 0xf76   : > { %5138 = vmatmul.mubr.msk.f32.gmra.mrb[74].mxu0 %vm859_vm1, %v5126_v52  ;;  %v5149_v52 = vld [vmem:[%s8034_s11 + $0x140] sm:$0xff] }
 0xf77   : > { %3969 = vmatprep.mubr.f32.mxu0 %v6059_v55 }
0x103d   : > { %v3947_v26 = vpop.f32.mrb[68].mxu0 }
0x103e   : > { %v3948_v57 = vadd.f32 %v3947_v26, %v3836_v39  ;;  %v3949_v15 = vpop.f32.mrb[69].mxu0  ;;  %v1691_v26 = vld [vmem:[%s8036_s13 + $0x20] sm:$0xff] }
0x103f   : > { %v3950_v43 = vadd.f32 %v3949_v15, %v3836_v39  ;;  %v5150_v39 = vld [vmem:[%s8034_s11 + $0x148] sm:$0xff]  ;;  %v4983_v15 = vld [vmem:[%s8036_s13 + $0x50] sm:$0xff] }
0x1040   : > { %v3982_v11 = vadd.f32 %v3948_v57, %v7417_v4  ;;  %v1692_v57 = vld [vmem:[%s8036_s13 + $0x28] sm:$0xff] }
0x1041   : > { %v3983_v1 = vadd.f32 %v3950_v43, %v7423_v47  ;;  %v3953_v9 = vpop.f32.mrb[70].mxu0  ;;  %v4010_v47 = vpop.permute.xlu1 %4009  ;;  %v4984_v43 = vld [vmem:[%s8036_s13 + $0x58] sm:$0xff] }
0x1042   : > { %v3990_v63 = vmul.f32 0.70710677, %v3982_v11  ;;  %v3954_v59 = vadd.f32 %v3953_v9, %v3841_v8  ;;  %v3955_v13 = vpop.f32.mrb[71].mxu0  ;;  %v5033_v11 = vld [vmem:[%s8036_s13 + $0x80] sm:$0xff]  ;;  %v5084_v9 = vld [vmem:[%s8036_s13 + $0xb8] sm:$0xff] }
0x1043   : > { %v3956_v10 = vadd.f32 %v3955_v13, %v3841_v8  ;;  %v3991_v48 = vmul.f32 0.70710677, %v3983_v1  ;;  %v5151_v8 = vld [vmem:[%s8034_s11 + $0x150] sm:$0xff] }
0x1044   : > { %v7649_v12 = vadd.f32 %v4005_v29, %v3990_v63  ;;  %v3984_v50 = vadd.f32 %v3954_v59, %v7425_v3  ;;  %v5083_v1 = vld [vmem:[%s8036_s13 + $0xb0] sm:$0xff]  ;;  %v5133_v63 = vld [vmem:[%s8036_s13 + $0xe0] sm:$0xff]  ;;  %v5134_v59 = vld [vmem:[%s8036_s13 + $0xe8] sm:$0xff] }
0x1045   : > { %v3985_v5 = vadd.f32 %v3956_v10, %v7433_v21  ;;  %v3959_v6 = vpop.f32.mrb[72].mxu0  ;;  %v7655_v27 = vadd.f32 %v4005_v29, %v3991_v48  ;;  %v4020_v28 = vpop.permute.xlu1 %4019  ;;  %v5183_v13 = vld [vmem:[%s8036_s13 + $0x110] sm:$0xff]  ;;  %v5184_v29 = vld [vmem:[%s8036_s13 + $0x118] sm:$0xff]  ;;  %v4518_v10 = vld [vmem:[%s8038_s15] sm:$0xff] }
0x1046   : > { %v3992_v20 = vmul.f32 0.70710677, %v3984_v50  ;;  %v3960_v34 = vadd.f32 %v3959_v6, %v3846_v61  ;;  %v3961_v4 = vpop.f32.mrb[73].mxu0  ;;  %4030 = vrot.lane.b32.xlu0 %v7649_v12, %s8080_s2  ;;  %v4519_v48 = vld [vmem:[%s8038_s15 + $0x8] sm:$0xff]  ;;  %v4618_v50 = vld [vmem:[#allocation2] sm:$0x1] }
0x1047   : > { %v3993_v14 = vmul.f32 0.70710677, %v3985_v5  ;;  %v3962_v0 = vadd.f32 %v3961_v4, %v3846_v61  ;;  %v5152_v61 = vld [vmem:[%s8034_s11 + $0x158] sm:$0xff] }
0x1048   : > { %v7657_v62 = vadd.f32 %v4010_v47, %v3992_v20  ;;  %v3986_v32 = vadd.f32 %v3960_v34, %v7435_v60 }
0x1049   : > { %v7660_v40 = vadd.f32 %v4010_v47, %v3993_v14  ;;  %v3987_v3 = vadd.f32 %v3962_v0, %v7443_v44  ;;  %v3965_v21 = vpop.f32.mrb[74].mxu0 }
0x104a   : > { %v3994_v54 = vmul.f32 0.70710677, %v3986_v32  ;;  %v3966_v22 = vadd.f32 %v3965_v21, %v3851_v2  ;;  %v3967_v56 = vpop.f32.mrb[75].mxu0  ;;  %4032 = vrot.lane.b32.xlu1 %v7657_v62, %s8080_s2  ;;  %4038 = vrot.lane.b32.xlu0 %v7655_v27, %s8080_s2  ;;  %v5505_v30 = vpack.c.bf16 %v7657_v62, %v7649_v12 }
0x104b   : > { %v3968_v23 = vadd.f32 %v3967_v56, %v3851_v2  ;;  %v5503_v60 = vpack.c.bf16 %v7660_v40, %v7655_v27  ;;  %v3995_v44 = vmul.f32 0.70710677, %v3987_v3  ;;  %v5034_v2 = vld [vmem:[%s8036_s13 + $0x88] sm:$0xff] }
0x104c   : > { %v7671_v7 = vadd.f32 %v4015_v24, %v3994_v54  ;;  %v3988_v31 = vadd.f32 %v3966_v22, %v7445_v36 }
0x104d   : > { %v3989_v35 = vadd.f32 %v3968_v23, %v7451_v19  ;;  %v7679_v33 = vadd.f32 %v4015_v24, %v3995_v44 }
0x104e   : > { %v3996_v38 = vmul.f32 0.70710677, %v3988_v31  ;;  %4040 = vrot.lane.b32.xlu1 %v7660_v40, %s8080_s2  ;;  %4034 = vrot.lane.b32.xlu0 %v7671_v7, %s8080_s2 }
0x104f   : > { %v3997_v17 = vmul.f32 0.70710677, %v3989_v35 }
0x1050   : > { %v7681_v58 = vadd.f32 %v4020_v28, %v3996_v38 }
0x1051   : > { %v7683_v42 = vadd.f32 %v4020_v28, %v3997_v17 }
0x1052   : > { %4036 = vrot.lane.b32.xlu1 %v7681_v58, %s8080_s2  ;;  %4042 = vrot.lane.b32.xlu0 %v7679_v33, %s8080_s2  ;;  %v5509_v36 = vpack.c.bf16 %v7681_v58, %v7671_v7 }
0x1053   : > { %v5507_v19 = vpack.c.bf16 %v7683_v42, %v7679_v33 }
0x1056   : > { %4044 = vrot.lane.b32.xlu1 %v7683_v42, %s8080_s2  ;;  %4062 = vrot.lane.b32.xlu0 %v7649_v12, %s8081_s27  ;;  %s5204_s2 = sshll.u32 %s6193_s17, 9 }
0x1057   : > { %s7945_s1 = scalar_lea.hbm %s8042_s19, %s5204_s2 }
0x105a   : > { %4064 = vrot.lane.b32.xlu1 %v7657_v62, %s8081_s27  ;;  %4070 = vrot.lane.b32.xlu0 %v7655_v27, %s8081_s27 }
0x105e   : > { %4072 = vrot.lane.b32.xlu1 %v7660_v40, %s8081_s27  ;;  %4066 = vrot.lane.b32.xlu0 %v7671_v7, %s8081_s27 }
0x1062   : > { %4068 = vrot.lane.b32.xlu1 %v7681_v58, %s8081_s27  ;;  %4074 = vrot.lane.b32.xlu0 %v7679_v33, %s8081_s27 }
0x1066   : > { %4076 = vrot.lane.b32.xlu1 %v7683_v42, %s8081_s27  ;;  %4134 = vperm.xlu0 %5638, %v5153_v46   ;;  %s7915_s27 = sand.u32 1, %s6046_s21  }
0x1067   : > { %s4869_s28 = sshll.u32 %s7915_s27, 5 }
0x1068   : > { %s7918_s4 = scalar_lea.vmem [#allocation5], %s4869_s28 }
0x1069   : > { %s4758_s24 = sshll.u32 %s7918_s4, 4  ;;  %s7939_s24 = int_to_ptr.vmem [resolvable:$true] %s4758_s24 }
0x106a   : > { %4139 = vperm.xlu1 %5639, %v5154_v18   ;;  %4144 = vperm.xlu0 %5638, %v5155_v37   ;;  %s5960_s25 = scalar_lea.vmem %s7939_s24, 512  ;;  %p5967_p0 = scmp.lt.s32.totalorder %s7939_s24, %s5965_s30 }
0x106b   : > { %p5961_p11 = scmp.ne.s32.totalorder %s7939_s24, %s5960_s25 }
0x106d   : > { %p5962_p12 = pnand %p5961_p11, %p6210_p5 }
0x106e   : > { %4149 = vperm.xlu1 %5639, %v5156_v41   ;;  %4114 = vperm.xlu0 %5638, %v5149_v52  }
0x106f   : > { %p5963_p13 = pneg %p5962_p12 }
0x1072   : > { %4119 = vperm.xlu1 %5639, %v5150_v39   ;;  %4124 = vperm.xlu0 %5638, %v5151_v8  }
0x1076   : > { %4129 = vperm.xlu1 %5639, %v5152_v61   ;;  %1715 = vperm.xlu0 %5638, %v1691_v26  }
0x107a   : > { %1720 = vperm.xlu1 %5639, %v1692_v57   ;;  %2251 = vperm.xlu0 %5638, %v4983_v15  }
0x107e   : > { %2256 = vperm.xlu1 %5639, %v4984_v43   ;;  %2787 = vperm.xlu0 %5638, %v5033_v11  }
0x1082   : > { %2792 = vperm.xlu1 %5639, %v5034_v2   ;;  %3321 = vperm.xlu0 %5638, %v5083_v1   ;;  %v5141_v2 = vld [vmem:[%s8033_s10 + $0x140] sm:$0xff]  ;;  %v5144_v1 = vld [vmem:[%s8033_s10 + $0x158] sm:$0xff] }
0x1086   : > { %3326 = vperm.xlu1 %5639, %v5084_v9   ;;  %3855 = vperm.xlu0 %5638, %v5133_v63   ;;  %v5145_v9 = vld [vmem:[%s8033_s10 + $0x160] sm:$0xff]  ;;  %v5146_v63 = vld [vmem:[%s8033_s10 + $0x168] sm:$0xff] }
0x108a   : > { %3860 = vperm.xlu1 %5639, %v5134_v59   ;;  %4385 = vperm.xlu0 %5638, %v5183_v13   ;;  %v5147_v59 = vld [vmem:[%s8033_s10 + $0x170] sm:$0xff]  ;;  %v5148_v13 = vld [vmem:[%s8033_s10 + $0x178] sm:$0xff] }
0x108e   : > { %4390 = vperm.xlu1 %5639, %v5184_v29   ;;  %4522 = vperm.xlu0 %5638, %v4518_v10   ;;  %v5127_v29 = vld [vmem:[%s8035_s12 + $0xe0] sm:$0xff]  ;;  %v5128_v10 = vld [vmem:[%s8035_s12 + $0xe8] sm:$0xff] }
0x108f   : > { %5139 = vmatmul.mubr.msk.f32.gmra.mrb[24].mxu0 %vm859_vm1, %v5127_v29 }
0x1090   : > { %3975 = vmatprep.mubr.f32.mxu0 %v6059_v55 }
0x1092   : > { %4527 = vperm.xlu1 %5639, %v4519_v48   ;;  %4621 = vperm.xlu0 %5638, %v4618_v50  }
0x1093   : > { %5140 = vmatmul.mubr.msk.f32.gmra.mrb[26].mxu0 %vm859_vm1, %v5128_v10 }
0x1094   : > { %4475 = vmatprep.mubr.f32.mxu0 %v6059_v55 }
0x10b8   : > { %v4031_v5 = vpop.permute.xlu0 %4030 }
0x10bc   : > { %v4033_v6 = vpop.permute.xlu1 %4032  ;;  %v4039_v20 = vpop.permute.xlu0 %4038 }
0x10bd   : > { %v4050_v34 = vsel %vm2442_vm12, %v4039_v20, %v4031_v5  ;;  %v4046_v14 = vsel %vm2442_vm12, %v4031_v5, %v4039_v20 }
0x10be   : > { %v4054_v3 = vmul.f32 %v7052_v25, %v4050_v34 }
0x10c0   : > { %v4041_v4 = vpop.permute.xlu1 %4040  ;;  %v4035_v47 = vpop.permute.xlu0 %4034 }
0x10c1   : > { %v4047_v0 = vsel %vm2442_vm12, %v4033_v6, %v4041_v4  ;;  %v4051_v32 = vsel %vm2442_vm12, %v4041_v4, %v4033_v6 }
0x10c2   : > { %v4056_v21 = vmul.f32 %v7052_v25, %v4051_v32  ;;  %v5495_v54 = vpack.c.bf16 %v4047_v0, %v4046_v14 }
0x10c4   : > { %v5497_v22 = vpack.c.bf16 %v4056_v21, %v4054_v3  ;;  %v4037_v56 = vpop.permute.xlu1 %4036  ;;  %5496 = vmatprep.subr.bf16.mxu1 %v5495_v54  ;;  %v4043_v24 = vpop.permute.xlu0 %4042 }
0x10c5   : > { %v4052_v23 = vsel %vm2442_vm12, %v4043_v24, %v4035_v47  ;;  %v4048_v35 = vsel %vm2442_vm12, %v4035_v47, %v4043_v24 }
0x10c6   : > { %5498 = vmatpush1.bf16.msra.mxu1 %v5497_v22  ;;  %v4058_v17 = vmul.f32 %v7052_v25, %v4052_v23 }
0x10c8   : > { %v4045_v44 = vpop.permute.xlu1 %4044  ;;  %v4063_v31 = vpop.permute.xlu0 %4062 }
0x10c9   : > { %v4049_v38 = vsel %vm2442_vm12, %v4037_v56, %v4045_v44  ;;  %v4053_v28 = vsel %vm2442_vm12, %v4045_v44, %v4037_v56 }
0x10ca   : > { %v4060_v46 = vmul.f32 %v7052_v25, %v4053_v28  ;;  %v5499_v18 = vpack.c.bf16 %v4049_v38, %v4048_v35 }
0x10cc   : > { %v5501_v37 = vpack.c.bf16 %v4060_v46, %v4058_v17  ;;  %v4065_v41 = vpop.permute.xlu1 %4064  ;;  %5500 = vmatprep.subr.bf16.mxu1 %v5499_v18  ;;  %v4071_v52 = vpop.permute.xlu0 %4070 }
0x10cd   : > { %v4082_v39 = vsel %vm2475_vm14, %v4071_v52, %v4063_v31  ;;  %v4078_v43 = vsel %vm2475_vm14, %v4063_v31, %v4071_v52 }
0x10ce   : > { %5502 = vmatpush1.bf16.msra.mxu1 %v5501_v37  ;;  %v4087_v25 = vmul.f32 %v7079_v16, %v4082_v39 }
0x10cf   : > { %5504 = vmatprep.subr.bf16.mxu1 %v5503_v60 }
0x10d0   : > { %v4073_v8 = vpop.permute.xlu1 %4072  ;;  %v4067_v61 = vpop.permute.xlu0 %4066 }
0x10d1   : > { %v4083_v26 = vsel %vm2475_vm14, %v4073_v8, %v4065_v41  ;;  %v4079_v60 = vsel %vm2475_vm14, %v4065_v41, %v4073_v8 }
0x10d2   : > { %v4089_v57 = vmul.f32 %v7079_v16, %v4083_v26  ;;  %5506 = vmatpush1.bf16.msra.mxu1 %v5505_v30  ;;  %v5513_v62 = vpack.c.bf16 %v4079_v60, %v4078_v43 }
0x10d3   : > { %5508 = vmatprep.subr.bf16.mxu1 %v5507_v19 }
0x10d4   : > { %v4069_v15 = vpop.permute.xlu1 %4068  ;;  %v4075_v27 = vpop.permute.xlu0 %4074  ;;  %v5511_v40 = vpack.c.bf16 %v4089_v57, %v4087_v25 }
0x10d5   : > { %v4084_v12 = vsel %vm2475_vm14, %v4075_v27, %v4067_v61  ;;  %v4080_v58 = vsel %vm2475_vm14, %v4067_v61, %v4075_v27 }
0x10d6   : > { %5510 = vmatpush1.bf16.msra.mxu1 %v5509_v36  ;;  %v4091_v42 = vmul.f32 %v7079_v16, %v4084_v12 }
0x10d7   : > { %5512 = vmatprep.subr.bf16.mxu1 %v5511_v40 }
0x10d8   : > { %v4077_v30 = vpop.permute.xlu1 %4076 }
0x10d9   : > { %v4085_v33 = vsel %vm2475_vm14, %v4077_v30, %v4069_v15  ;;  %v4081_v19 = vsel %vm2475_vm14, %v4069_v15, %v4077_v30 }
0x10da   : > { %v4093_v7 = vmul.f32 %v7079_v16, %v4085_v33  ;;  %5514 = vmatpush1.bf16.msra.mxu1 %v5513_v62  ;;  %v5517_v11 = vpack.c.bf16 %v4081_v19, %v4080_v58  ;;  %v5142_v16 = vld [vmem:[%s8033_s10 + $0x148] sm:$0xff] }
0x10dc   : > { %v5515_v36 = vpack.c.bf16 %v4093_v7, %v4091_v42 }
0x10de   : > { %5516 = vmatprep.subr.bf16.mxu1 %v5515_v36 }
0x10df   : > { %5518 = vmatpush1.bf16.msra.mxu1 %v5517_v11 }
0x10e2   : > { %5157 = vmatmul.mubr.msk.f32.vlgmr.msra.gmra.mrb[80].mxu1 %vm1479_vm6, %v5141_v2 }
0x10e3   : > { %4246 = vmatprep.mubr.f32.mxu1 %v6059_v55 }
0x10e5   : > { %v4135_v4 = vpop.permute.xlu0 %4134 }
0x10e6   : > { %5158 = vmatmul.mubr.msk.f32.gmra.mrb[82].mxu1 %vm1479_vm6, %v5142_v16 }
0x10e7   : > { %4252 = vmatprep.mubr.f32.mxu1 %v6059_v55 }
0x10e9   : > { %v4140_v0 = vpop.permute.xlu1 %4139  ;;  %v4145_v3 = vpop.permute.xlu0 %4144 }
0x10ea   : > { %5159 = vmatmul.mubr.msk.f32.gmra.mrb[84].mxu1 %vm1479_vm6, %v5143_v45 }
0x10eb   : > { %4258 = vmatprep.mubr.f32.mxu1 %v6059_v55 }
0x10ed   : > { %v4150_v44 = vpop.permute.xlu1 %4149  ;;  %v4115_v28 = vpop.permute.xlu0 %4114 }
0x10ee   : > { %5160 = vmatmul.mubr.msk.f32.gmra.mrb[86].mxu1 %vm1479_vm6, %v5144_v1 }
0x10ef   : > { %4264 = vmatprep.mubr.f32.mxu1 %v6059_v55 }
0x10f1   : > { %v4120_v8 = vpop.permute.xlu1 %4119  ;;  %v4125_v58 = vpop.permute.xlu0 %4124 }
0x10f2   : > { %5161 = vmatmul.mubr.msk.f32.gmra.mrb[88].mxu1 %vm1479_vm6, %v5145_v9 }
0x10f3   : > { %4270 = vmatprep.mubr.f32.mxu1 %v6059_v55 }
0x10f6   : > { %5162 = vmatmul.mubr.msk.f32.gmra.mrb[90].mxu1 %vm1479_vm6, %v5146_v63 }
0x10f7   : > { %4276 = vmatprep.mubr.f32.mxu1 %v6059_v55 }
0x10fa   : > { %5163 = vmatmul.mubr.msk.f32.gmra.mrb[92].mxu1 %vm1479_vm6, %v5147_v59  ;;  %v4130_v59 = vpop.permute.xlu1 %4129 }
0x10fb   : > { %4282 = vmatprep.mubr.f32.mxu1 %v6059_v55 }
0x10fe   : > { %5164 = vmatmul.mubr.msk.f32.gmra.mrb[94].mxu1 %vm1479_vm6, %v5148_v13 }
0x10ff   : > { %4600 = vmatprep.mubr.f32.mxu1 %v6059_v55 }
0x11b5   : > { %v4242_v48 = vpop.f32.mrb[80].mxu1 }
0x11b6   : > { %v4244_v50 = vpop.f32.mrb[81].mxu1  ;;  %v4243_v46 = vadd.f32 %v4242_v48, %v4115_v28 }
0x11b7   : > { %v4245_v61 = vadd.f32 %v4244_v50, %v4115_v28 }
0x11b9   : > { %v4248_v5 = vpop.f32.mrb[82].mxu1 }
0x11ba   : > { %v4250_v6 = vpop.f32.mrb[83].mxu1  ;;  %v4249_v25 = vadd.f32 %v4248_v5, %v4120_v8 }
0x11bb   : > { %v4251_v42 = vadd.f32 %v4250_v6, %v4120_v8 }
0x11bd   : > { %v4254_v20 = vpop.f32.mrb[84].mxu1 }
0x11be   : > { %v4256_v34 = vpop.f32.mrb[85].mxu1  ;;  %v4255_v11 = vadd.f32 %v4254_v20, %v4125_v58 }
0x11bf   : > { %v4257_v16 = vadd.f32 %v4256_v34, %v4125_v58 }
0x11c1   : > { %v7879_v47 = vpop.f32.mrb[86].mxu1 }
0x11c2   : > { %v7881_v14 = vpop.f32.mrb[87].mxu1  ;;  %v4261_v10 = vadd.f32 %v7879_v47, %v4130_v59 }
0x11c3   : > { %v4263_v20 = vadd.f32 %v7881_v14, %v4130_v59 }
0x11c5   : > { %v4266_v32 = vpop.f32.mrb[88].mxu1 }
0x11c6   : > { %v4267_v21 = vadd.f32 %v4266_v32, %v4135_v4  ;;  %v4268_v54 = vpop.f32.mrb[89].mxu1 }
0x11c7   : > { %v4269_v22 = vadd.f32 %v4268_v54, %v4135_v4 }
0x11c8   : > { %v5165_v56 = vmul.f32 -1.442695, %v4267_v21 }
0x11c9   : > { %v5166_v24 = vmul.f32 -1.442695, %v4269_v22  ;;  %v4272_v23 = vpop.f32.mrb[90].mxu1 }
0x11ca   : > { %5912 = vpow2.f32 %v5165_v56  ;;  %v4273_v31 = vadd.f32 %v4272_v23, %v4140_v0  ;;  %v4274_v35 = vpop.f32.mrb[91].mxu1 }
0x11cb   : > { %5914 = vpow2.f32 %v5166_v24  ;;  %v4275_v38 = vadd.f32 %v4274_v35, %v4140_v0 }
0x11cc   : > { %v5167_v17 = vmul.f32 -1.442695, %v4273_v31 }
0x11cd   : > { %v5168_v18 = vmul.f32 -1.442695, %v4275_v38  ;;  %v4278_v37 = vpop.f32.mrb[92].mxu1 }
0x11ce   : > { %5916 = vpow2.f32 %v5167_v17  ;;  %v4279_v41 = vadd.f32 %v4278_v37, %v4145_v3  ;;  %v4280_v52 = vpop.f32.mrb[93].mxu1 }
0x11cf   : > { %5918 = vpow2.f32 %v5168_v18  ;;  %v4281_v39 = vadd.f32 %v4280_v52, %v4145_v3 }
0x11d0   : > { %v5169_v26 = vmul.f32 -1.442695, %v4279_v41  ;;  %5920 = vtanh.f32 %v4243_v46 }
0x11d1   : > { %v5170_v57 = vmul.f32 -1.442695, %v4281_v39  ;;  %v4284_v15 = vpop.f32.mrb[94].mxu1 }
0x11d2   : > { %5922 = vpow2.f32 %v5169_v26  ;;  %v4285_v27 = vadd.f32 %v4284_v15, %v4150_v44  ;;  %v4286_v40 = vpop.f32.mrb[95].mxu1  ;;  %v5173_v26 = vld [vmem:[%s8035_s12 + $0xf0] sm:$0xff]  ;;  %v5176_v15 = vld [vmem:[%s8035_s12 + $0x108] sm:$0xff] }
0x11d3   : > { %5924 = vpow2.f32 %v5170_v57  ;;  %v4287_v60 = vadd.f32 %v4286_v40, %v4150_v44  ;;  %v5175_v57 = vld [vmem:[%s8035_s12 + $0x100] sm:$0xff]  ;;  %v5178_v40 = vld [vmem:[%s8035_s12 + $0x118] sm:$0xff] }
0x11d4   : > { %v5913_v43 = vpop.eup %5912  ;;  %5926 = vtanh.f32 %v4245_v61  ;;  %v5171_v12 = vmul.f32 -1.442695, %v4285_v27  ;;  %v5177_v27 = vld [vmem:[%s8035_s12 + $0x110] sm:$0xff] }
0x11d5   : > { %v5915_v62 = vpop.eup %5914  ;;  %5928 = vtanh.f32 %v4249_v25  ;;  %v4321_v30 = vadd.f32 1.0, %v5913_v43  ;;  %v5172_v33 = vmul.f32 -1.442695, %v4287_v60  ;;  %v5174_v25 = vld [vmem:[%s8035_s12 + $0xf8] sm:$0xff]  ;;  %v1716_v60 = vpop.permute.xlu0 %1715 }
0x11d6   : > { %v4322_v19 = vadd.f32 1.0, %v5915_v62  ;;  %5930 = vpow2.f32 %v5171_v12  ;;  %v1721_v43 = vpop.permute.xlu1 %1720 }
0x11d7   : > { %5932 = vrcp.f32 %v4321_v30 }
0x11d8   : > { %v5917_v7 = vpop.eup %5916  ;;  %5934 = vrcp.f32 %v4322_v19 }
0x11d9   : > { %v5919_v36 = vpop.eup %5918  ;;  %v4323_v2 = vadd.f32 1.0, %v5917_v7  ;;  %5936 = vpow2.f32 %v5172_v33  ;;  %v2252_v12 = vpop.permute.xlu0 %2251 }
0x11da   : > { %5938 = vtanh.f32 %v4251_v42  ;;  %v4324_v45 = vadd.f32 1.0, %v5919_v36  ;;  %v5921_v1 = vpop.eup %5920  ;;  %v2257_v62 = vpop.permute.xlu1 %2256 }
0x11db   : > { %5940 = vrcp.f32 %v4323_v2  ;;  %v5551_v59 = vadd.f32 %v2257_v62, %v1721_v43  ;;  %v4617_v43 = vld [vmem:[%s8039_s16] sm:$0x1] }
0x11dc   : > { %v5923_v9 = vpop.eup %5922  ;;  %5942 = vrcp.f32 %v4324_v45 }
0x11dd   : > { %v5925_v63 = vpop.eup %5924  ;;  %5944 = vtanh.f32 %v4255_v11  ;;  %v4325_v13 = vadd.f32 1.0, %v5923_v9  ;;  %v2788_v30 = vpop.permute.xlu0 %2787 }
0x11de   : > { %v5927_v29 = vpop.eup %5926  ;;  %5946 = vtanh.f32 %v4257_v16  ;;  %v4326_v48 = vadd.f32 1.0, %v5925_v63  ;;  %v2793_v33 = vpop.permute.xlu1 %2792  ;;  %v5539_v16 = vadd.f32 %v2252_v12, %v1716_v60 }
0x11df   : > { %v5929_v50 = vpop.eup %5928  ;;  %5948 = vrcp.f32 %v4325_v13 }
0x11e0   : > { %v5931_v5 = vpop.eup %5930  ;;  %5950 = vrcp.f32 %v4326_v48  ;;  %v5552_v48 = vadd.f32 %v5551_v59, %v2793_v33 }
0x11e1   : > { %v5933_v6 = vpop.eup %5932  ;;  %v4327_v34 = vadd.f32 1.0, %v5931_v5  ;;  %5952 = vtanh.f32 %v4261_v10  ;;  %v3322_v42 = vpop.permute.xlu0 %3321 }
0x11e2   : > { %v5935_v4 = vpop.eup %5934  ;;  %v4345_v0 = vmul.f32 %v5933_v6, %v5921_v1  ;;  %v3327_v58 = vpop.permute.xlu1 %3326  ;;  %v5540_v1 = vadd.f32 %v5539_v16, %v2788_v30 }
0x11e3   : > { %v5937_v32 = vpop.eup %5936  ;;  %5954 = vrcp.f32 %v4327_v34  ;;  %v4346_v3 = vmul.f32 %v5935_v4, %v5927_v29  ;;  %v5553_v6 = vadd.f32 %v5552_v48, %v3327_v58 }
0x11e4   : > { %v5939_v21 = vpop.eup %5938  ;;  %v4328_v54 = vadd.f32 1.0, %v5937_v32  ;;  %5956 = vtanh.f32 %v4263_v20  ;;  %v5541_v13 = vadd.f32 %v5540_v1, %v3322_v42 }
0x11e5   : > { %v5941_v22 = vpop.eup %5940  ;;  %v3856_v2 = vpop.permute.xlu0 %3855 }
0x11e6   : > { %v5943_v47 = vpop.eup %5942  ;;  %5958 = vrcp.f32 %v4328_v54  ;;  %v4347_v56 = vmul.f32 %v5941_v22, %v5929_v50  ;;  %v3861_v63 = vpop.permute.xlu1 %3860  ;;  %v5542_v50 = vadd.f32 %v5541_v13, %v3856_v2 }
0x11e7   : > { %v5945_v24 = vpop.eup %5944  ;;  %v4348_v23 = vmul.f32 %v5943_v47, %v5939_v21 }
0x11e8   : > { %v5947_v44 = vpop.eup %5946  ;;  %v5521_v31 = vpack.c.bf16 %v4347_v56, %v4345_v0  ;;  %v5554_v0 = vadd.f32 %v5553_v6, %v3861_v63 }
0x11e9   : > { %v5949_v35 = vpop.eup %5948  ;;  %v5519_v14 = vpack.c.bf16 %v4348_v23, %v4346_v3  ;;  %v4386_v29 = vpop.permute.xlu0 %4385 }
0x11ea   : > { %v5951_v38 = vpop.eup %5950  ;;  %v4349_v28 = vmul.f32 %v5949_v35, %v5945_v24  ;;  %v5543_v20 = vadd.f32 %v5542_v50, %v4386_v29  ;;  %v4391_v34 = vpop.permute.xlu1 %4390 }
0x11eb   : > { %5520 = vmatprep.subr.bf16.mxu0 %v5519_v14  ;;  %v4350_v17 = vmul.f32 %v5951_v38, %v5947_v44  ;;  %v5953_v46 = vpop.eup %5952  ;;  %v5555_v54 = vadd.f32 %v5554_v0, %v4391_v34 }
0x11ec   : > { %5522 = vmatpush1.bf16.msra.mxu0 %v5521_v31 }
0x11ed   : > { %v5955_v18 = vpop.eup %5954 }
0x11ee   : > { %v4351_v37 = vmul.f32 %v5955_v18, %v5953_v46  ;;  %v5957_v41 = vpop.eup %5956 }
0x11f0   : > { %v5959_v52 = vpop.eup %5958  ;;  %v5525_v39 = vpack.c.bf16 %v4351_v37, %v4349_v28  ;;  %v4516_v28 = vld [vmem:[%s8037_s14] sm:$0xff]  ;;  %v4523_v37 = vpop.permute.xlu0 %4522 }
0x11f1   : > { %v4352_v8 = vmul.f32 %v5959_v52, %v5957_v41  ;;  %v4528_v52 = vpop.permute.xlu1 %4527 }
0x11f3   : > { %v5523_v61 = vpack.c.bf16 %v4352_v8, %v4350_v17  ;;  %v4517_v17 = vld [vmem:[%s8037_s14 + $0x8] sm:$0xff] }
0x11f5   : > { %5524 = vmatprep.subr.bf16.mxu0 %v5523_v61 }
0x11f6   : > { %5526 = vmatpush1.bf16.msra.mxu0 %v5525_v39 }
0x11f9   : > { %5185 = vmatmul.mubr.msk.f32.vlgmr.msra.gmra.mrb[76].mxu0 %vm859_vm1, %v5173_v26 }
0x11fa   : > { %4479 = vmatprep.mubr.f32.mxu0 %v6059_v55 }
0x11fd   : > { %5186 = vmatmul.mubr.msk.f32.gmra.mrb[78].mxu0 %vm859_vm1, %v5174_v25 }
0x11fe   : > { %4483 = vmatprep.mubr.f32.mxu0 %v6059_v55 }
0x1201   : > { %5187 = vmatmul.mubr.msk.f32.gmra.mrb[80].mxu0 %vm859_vm1, %v5175_v57 }
0x1202   : > { %4487 = vmatprep.mubr.f32.mxu0 %v6059_v55 }
0x1205   : > { %5188 = vmatmul.mubr.msk.f32.gmra.mrb[82].mxu0 %vm859_vm1, %v5176_v15 }
0x1206   : > { %4491 = vmatprep.mubr.f32.mxu0 %v6059_v55 }
0x1209   : > { %5189 = vmatmul.mubr.msk.f32.gmra.mrb[24].mxu0 %vm859_vm1, %v5177_v27 }
0x120a   : > { %4497 = vmatprep.mubr.f32.mxu0 %v6059_v55 }
0x120d   : > { %5190 = vmatmul.mubr.msk.f32.gmra.mrb[26].mxu0 %vm859_vm1, %v5178_v40 }
0x12cc   : > { %v4477_v19 = vpop.f32.mrb[76].mxu0 }
0x12cd   : > { %v4478_v7 = vpop.f32.mrb[77].mxu0 }
0x12d0   : > { %v4481_v36 = vpop.f32.mrb[78].mxu0 }
0x12d1   : > { %v4482_v11 = vpop.f32.mrb[79].mxu0 }
0x12d4   : > { %v4485_v45 = vpop.f32.mrb[80].mxu0 }
0x12d5   : > { %v4486_v9 = vpop.f32.mrb[81].mxu0 }
0x12d8   : > { %v4489_v10 = vpop.f32.mrb[82].mxu0 }
0x12d9   : > { %v4490_v5 = vpop.f32.mrb[83].mxu0 }
0x12dc   : > { %v4493_v4 = vpop.f32.mrb[24].mxu0 }
0x12dd   : > { %v5544_v32 = vadd.f32 %v5543_v20, %v4493_v4  ;;  %v4495_v3 = vpop.f32.mrb[25].mxu0 }
0x12de   : > { %v5550_v21 = vadd.f32 %v5543_v20, %v4495_v3 }
0x12df   : > { %v4508_v22 = vmul.f32 0.4082483, %v5544_v32 }
0x12e0   : > { %v4509_v47 = vmul.f32 0.4082483, %v5550_v21  ;;  %v4499_v56 = vpop.f32.mrb[26].mxu0 }
0x12e1   : > { %4512 = vst [vmem:[%s7918_s4] sm:$0xff] %v4508_v22  ;;  %v5556_v24 = vadd.f32 %v5555_v54, %v4499_v56  ;;  %v4501_v23 = vpop.f32.mrb[27].mxu0 }
0x12e2   : > { %4513 = vst [vmem:[%s7918_s4 + $0x8] sm:$0xff] %v4509_v47  ;;  %v5562_v44 = vadd.f32 %v5555_v54, %v4501_v23 }
0x12e3   : > { %v4510_v31 = vmul.f32 0.4082483, %v5556_v24 }
0x12e4   : > { %v4511_v35 = vmul.f32 0.4082483, %v5562_v44 }
0x12e5   : > { %4514 = vst [vmem:[%s7918_s4 + $0x10] sm:$0xff] %v4510_v31  ;;  %v5529_v14 = vpack.c.bf16 %v4510_v31, %v4508_v22 }
0x12e6   : > { %4515 = vst [vmem:[%s7918_s4 + $0x18] sm:$0xff] %v4511_v35  ;;  %v5527_v38 = vpack.c.bf16 %v4511_v35, %v4509_v47  ;;  %s5966_s4 = scalar_lea.vmem %s5965_s30, 1024 }
0x12e7   : > { %p5968_p1 = scmp.lt.s32.totalorder %s5966_s4, %s5960_s25 }
0x12e8   : > { %5528 = vmatprep.subr.bf16.mxu1 %v5527_v38 }
0x12e9   : > { %5530 = vmatpush1.bf16.msra.mxu1 %v5529_v14  ;;  %p5969_p2 = por %p5968_p1, %p5967_p0 }
0x12eb   : > { %p5970_p3 = pnand %p5969_p2, %p5963_p13 }
0x12ec   : > { %5191 = vmatmul.mubr.msk.f32.vlgmr.msra.gmra.mrb[96].mxu1 %vm725_vm0, %v4516_v28 }
0x12ed   : > { %4606 = vmatprep.mubr.f32.mxu1 %v6059_v55 }
0x12f0   : > { %5192 = vmatmul.mubr.msk.f32.gmra.mrb[98].mxu1 %vm725_vm0, %v4517_v17 }
0x12f1   : > { %4695 = vmatprep.mubr.f32.mxu1 %v6059_v55 }
0x13bf   : > { %v4602_v46 = vpop.f32.mrb[96].mxu1 }
0x13c0   : > { %v4604_v18 = vpop.f32.mrb[97].mxu1  ;;  %v4603_v41 = vadd.f32 %v4602_v46, %v4523_v37 }
0x13c1   : > { %v4605_v39 = vadd.f32 %v4604_v18, %v4523_v37 }
0x13c2   : > { %v4613_v57 = vmax.f32 %v4603_v41, 0.0 }
0x13c3   : > { %v4608_v8 = vpop.f32.mrb[98].mxu1  ;;  %v4614_v27 = vmax.f32 %v4605_v39, 0.0 }
0x13c4   : > { %v4609_v61 = vadd.f32 %v4608_v8, %v4528_v52  ;;  %v4610_v26 = vpop.f32.mrb[99].mxu1 }
0x13c5   : > { %v4611_v25 = vadd.f32 %v4610_v26, %v4528_v52 }
0x13c6   : > { %v4615_v15 = vmax.f32 %v4609_v61, 0.0 }
0x13c7   : > { %v4616_v40 = vmax.f32 %v4611_v25, 0.0 }
0x13c8   : > { %v5533_v60 = vpack.c.bf16 %v4615_v15, %v4613_v57 }
0x13c9   : > { %v5531_v55 = vpack.c.bf16 %v4616_v40, %v4614_v27 }
0x13cb   : > { %5532 = vmatprep.subr.bf16.mxu1 %v5531_v55 }
0x13cc   : > { %5534 = vmatpush1.bf16.msra.mxu1 %v5533_v60 }
0x13cf   : > { %5193 = vmatmul.mubr.msk.f32.vlgmr.msra.gmra.mrb[100].mxu1 %vm725_vm0, %v4617_v43 }
0x13d0   : > { %5973 = shalt.err (!%p5970_p3)
}
0x13d1   : > { %s5974_s2 = scalar_lea.hbm %s7945_s1, 512  ;;  %s5978_s29 = scalar_lea.hbm %s8042_s19, 1024 }
0x13d2   : > { %p5975_p4 = scmp.ne.s32.totalorder %s7945_s1, %s5974_s2  ;;  %p5979_p9 = scmp.lt.u32.totalorder %s7945_s1, %s8042_s19 }
0x13d3   : > { %p5980_p10 = scmp.lt.u32.totalorder %s5978_s29, %s5974_s2  ;;  %p5982_p12 = scmp.lt.u32.totalorder %s5974_s2, %s7945_s1 }
0x13d4   : > { %p5976_p7 = pnand %p5975_p4, %p6210_p5 }
0x13d5   : > { %p5981_p11 = por %p5980_p10, %p5979_p9 }
0x13d6   : > { %p5977_p8 = pneg %p5976_p7 }
0x13d7   : > { %p5983_p13 = por %p5982_p12, %p5981_p11 }
0x13d9   : > { %p5984_p0 = pnand %p5983_p13, %p5977_p8 }
0x13db   : > { %5987 = shalt.err (!%p5984_p0)
}
0x13dc   : > { %s6065_s25 = smov 256   ;;  %s6066_s4 = smov 16   ;;  %v6067_v12 = vmov 1966171168   ;;  %v4622_v30 = vpop.permute.xlu0 %4621  ;;  %vm4722_vm15 = vcmp.lt.s32.totalorder %v657_v49, 256 }
0x13dd   : > { %s8082_s28 = scalar_lea.sflag [#allocation6], %s7915_s27  ;;  %v4706_v62 = vunpack.c.l.s4 %v6067_v12  ;;  %v4627_v42 = vrot.slane %v4622_v30, %v659_v53  ;;  %s4868_s0 = sshll.u32 %s7915_s27, 1 }
0x13de   : > { %5584 = dma.vmem_to_hbm [thread:$0]  (%p6210_p5), %s7939_s24, 512, %s7945_s1, %s8082_s28, %s6065_s25, %s6065_s25, %s6066_s4  }
0x13df   : > { %v4707_v33 = vunpack.c.0.s8 %v4706_v62  ;;  %s5203_s2 = sshll.u32 %s6193_s17, 5  ;;  %s614_s5 = scalar_lea.vmem [#allocation3], %s4868_s0 }
0x13e0   : > { %s4745_s24 = sshll.u32 %s614_s5, 4  ;;  %s7980_s30 = scalar_lea.hbm %s8041_s18, %s5203_s2  ;;  %s7982_s24 = int_to_ptr.vmem [resolvable:$true] %s4745_s24 }
0x13e1   : > { %v4710_v11 = vsub.s32 %v4707_v33, %v6362_v51  ;;  %s4726_s25 = scalar_lea.sflag [#allocation4], %s7915_s27  ;;  %s5988_s4 = scalar_lea.vmem %s7982_s24, 32 }
0x13e2   : > { %p5989_p1 = scmp.ne.s32.totalorder %s7982_s24, %s5988_s4  ;;  %s6068_s17 = smov [#allocation3]  }
0x13e3   : > { %s5992_s28 = sshll.u32 %s6068_s17, 4  ;;  %s5993_s28 = int_to_ptr.vmem [resolvable:$false] %s5992_s28 }
0x13e4   : > { %p5990_p2 = pnand %p5989_p1, %p6210_p5  ;;  %s5994_s0 = scalar_lea.vmem %s5993_s28, 64 }
0x13e5   : > { %p5995_p4 = scmp.lt.s32.totalorder %s7982_s24, %s5993_s28  ;;  %p5996_p7 = scmp.lt.s32.totalorder %s5994_s0, %s5988_s4 }
0x13e6   : > { %p5991_p3 = pneg %p5990_p2 }
0x13e7   : > { %p5997_p8 = por %p5996_p7, %p5995_p4 }
0x13e9   : > { %p5998_p9 = pnand %p5997_p8, %p5991_p3 }
0x14a2   : > { %v4697_v19 = vpop.f32.mrb[100].mxu1 }
0x14a3   : > { %v4698_v7 = vadd.f32 %v4697_v19, %v4627_v42  ;;  %v4699_v58 = vpop.f32.mrb[101].mxu1 }
0x14a4   : > { %v4700_v36 = vadd.f32 %v4699_v58, %v4627_v42 }
0x14a6   : > { %v4704_v2 = vcombine.low %v4698_v7, %v4700_v36 }
0x14a8   : > { %v4711_v16 = vrot.slane %v4704_v2, %v4710_v11 }
0x14aa   : > { %v4718_v45 = vrot.slane %v4711_v16, %v4710_v11 }
0x14ac   : > { %4724 = vst.msk [vmem:[%s614_s5] sm:$0x3] %vm4722_vm15, %v4718_v45 }
0x14ad   : > { %6001 = shalt.err (!%p5998_p9)
}
0x14ae   : > { %s6002_s27 = scalar_lea.hbm %s7980_s30, 32  ;;  %s6006_s1 = scalar_lea.hbm %s8041_s18, 64 }
0x14af   : > { %p6003_p10 = scmp.ne.s32.totalorder %s7980_s30, %s6002_s27  ;;  %p6007_p13 = scmp.lt.u32.totalorder %s7980_s30, %s8041_s18 }
0x14b0   : > { %p6008_p0 = scmp.lt.u32.totalorder %s6006_s1, %s6002_s27  ;;  %p6010_p2 = scmp.lt.u32.totalorder %s6002_s27, %s7980_s30 }
0x14b1   : > { %p6004_p11 = pnand %p6003_p10, %p6210_p5 }
0x14b2   : > { %p6009_p1 = por %p6008_p0, %p6007_p13 }
0x14b3   : > { %p6005_p12 = pneg %p6004_p11 }
0x14b4   : > { %p6011_p3 = por %p6010_p2, %p6009_p1 }
0x14b6   : > { %p6012_p4 = pnand %p6011_p3, %p6005_p12 }
0x14b8   : > { %6015 = shalt.err (!%p6012_p4)
}
0x14b9   : > { %5583 = dma.vmem_to_hbm [thread:$0]  (%p6210_p5), %s7982_s24, 32, %s7980_s30, %s4726_s25  }
0x14ba PF: > { %p5594_p7 = scmp.ge.s32.totalorder %s6054_s22, 2  ;;  %s4773_s28 = sand.u32 1, %s6042_s20  }
0x14bb   : > { %s4774_s0 = scalar_lea.sflag [#allocation4], %s4773_s28 }
0x14bc   : > { %p5588_p8 = pnand %p5594_p7, %p6214_p6 }
0x14be   : > { %6033 = dma.done.wait (!%p5588_p8), %s4774_s0, 32  }
0x14bf   : > { %6035 = vsyncadd (!%p5588_p8), %s4774_s0, 4294967264  ;;  %s4783_s27 = scalar_lea.sflag [#allocation6], %s4773_s28 }
0x14c0   : > { %6037 = dma.done.wait (!%p5588_p8), %s4783_s27, 512  }
0x14c1   : > { %6039 = vsyncadd (!%p5588_p8), %s4783_s27, 4294966784  ;;  %s8084_s22 = sld [smem:[#allocation10_spill]]  ;;  %s8085_s26 = sld [smem:[#allocation9_spill]] }
0x14c2   : > { %s8086_s1 = sld [smem:[#allocation11_spill]]  ;;  %s8087_s20 = smov %s6046_s21 }
0x14c7   : > { %p35_p5 = scmp.ge.s32.totalorder %s8084_s22, 4   ;;  %s8088_s21 = smov %s8085_s26 }
0x14c9   :  { %37 = sbr.rel (!%p35_p5) target bundleno = 12 (0xc), region = 167 }
0x14d0   :  { %4788 = vsyncpa [#allocation4], 1 }
0x14d1   :  { %4790 = vsyncpa [#allocation4 + $0x1], 1 }
0x14d2   :  { %4791 = vsyncpa [#allocation6], 1 }
0x14d3   :  { %4793 = vsyncpa [#allocation6 + $0x1], 1 }

</bundles_post_ra>
